<compile_context>
chip_gen: v6e
topology: v6e:2x2x1
jax: 0.10.0
libtpu: 0.0.40
codegen_flags: <defaults>
</compile_context>

<pallas_src>
import functools

import jax
import jax.numpy as jnp
from jax.experimental import pallas as pl
from jax.experimental.pallas import tpu as pltpu

LANE = 128
VMEM_LIMIT_BYTES = 32 * 1024 * 1024   # safe across v5e/v6e/v7x scoped VMEM
FUSE_MAX_NODES = 1024                 # whole-network-in-VMEM path threshold


def _round_up(x, m):
    return ((x + m - 1) // m) * m


def _pick_tile(n, pref, min_blocks=1):
    """Largest multiple of 128 dividing n, <= pref, leaving >= min_blocks blocks."""
    assert n % LANE == 0
    cap = n // max(min_blocks, 1)
    cap = max(LANE, (cap // LANE) * LANE)
    t = max(LANE, min((max(pref, LANE) // LANE) * LANE, cap, n))
    while n % t:
        t -= LANE
    return t


# ---------------------------------------------------------------------------
# Tiled per-layer kernel (large-N path):
#   out = act(norm_r * (A @ ((h * norm_c) @ W)) + bias)
# The (tk, Dpad) feature-transform tile is recomputed per grid step (cheap,
# Din <= 128) instead of round-tripping xw through HBM. Both matmuls are
# bf16 x bf16 with f32 accumulation into a VMEM scratch accumulator.
# ---------------------------------------------------------------------------
def gcn_layer_kernel(h_ref, normc_ref, w_ref, a_ref, normr_ref, b_ref,
                     o_ref, acc_ref, *, apply_relu):
    k = pl.program_id(1)

    @pl.when(k == 0)
    def _init():
        acc_ref[...] = jnp.zeros_like(acc_ref)

    # Fused phase 1: transform this column block's features (bf16 MXU path).
    hn = (h_ref[...] * normc_ref[...]).astype(jnp.bfloat16)          # [tk, Din]
    xw = jnp.dot(hn, w_ref[...], preferred_element_type=jnp.float32)  # [tk, Dpad]

    # Phase 2: aggregation. A tile is bf16 (exact 0/1) -> native bf16 MXU,
    # accumulation stays float32 in VMEM scratch.
    acc_ref[...] += jnp.dot(a_ref[...], xw.astype(jnp.bfloat16),
                            preferred_element_type=jnp.float32)

    @pl.when(k == pl.num_programs(1) - 1)
    def _finalize():
        out = acc_ref[...] * normr_ref[...] + b_ref[...]
        if apply_relu:
            out = jnp.maximum(out, 0.0)
        o_ref[...] = out.astype(o_ref.dtype)


def gcn_layer_tiled(h, adj_bf16, norm, w_pad_bf16, b_pad, *, tm, tk, apply_relu):
    n_pad, din = h.shape
    dpad = w_pad_bf16.shape[1]
    assert n_pad % tm == 0 and n_pad % tk == 0
    kernel = functools.partial(gcn_layer_kernel, apply_relu=apply_relu)
    # NOTE: if profiling ever shows exposed A-tile DMA, add
    # pipeline_mode=pl.Buffered(3) on the A BlockSpec below.
    return pl.pallas_call(
        kernel,
        out_shape=jax.ShapeDtypeStruct((n_pad, dpad), jnp.float32),
        grid_spec=pltpu.PrefetchScalarGridSpec(
            num_scalar_prefetch=0,
            grid=(n_pad // tm, n_pad // tk),          # reduction axis (k) last
            in_specs=[
                pl.BlockSpec((tk, din), lambda i, k: (k, 0)),     # h col-block (f32)
                pl.BlockSpec((tk, 1), lambda i, k: (k, 0)),       # norm col-block
                pl.BlockSpec((din, dpad), lambda i, k: (0, 0)),   # W (bf16, constant)
                pl.BlockSpec((tm, tk), lambda i, k: (i, k)),      # A tile (bf16)
                pl.BlockSpec((tm, 1), lambda i, k: (i, 0)),       # norm row-block
                pl.BlockSpec((1, dpad), lambda i, k: (0, 0)),     # bias (constant)
            ],
            out_specs=pl.BlockSpec((tm, dpad), lambda i, k: (i, 0)),
            scratch_shapes=[pltpu.VMEM((tm, dpad), jnp.float32)],
        ),
        compiler_params=pltpu.CompilerParams(
            dimension_semantics=("parallel", "arbitrary"),
            vmem_limit_bytes=VMEM_LIMIT_BYTES,
        ),
    )(h, norm, w_pad_bf16, adj_bf16, norm, b_pad)


# ---------------------------------------------------------------------------
# Fully fused small-graph kernel: the whole multi-layer GCN in ONE pallas_call
# (A, features, weights, intermediates all resident in VMEM; one launch).
# ---------------------------------------------------------------------------
def gcn_fused_kernel(x_ref, a_ref, norm_ref, *rest, num_layers):
    o_ref = rest[-1]
    wb = rest[:-1]                        # (w0, b0, w1, b1, ...)
    a = a_ref[...]                        # [N, N] bf16 (exact 0/1)
    norm = norm_ref[...]                  # [N, 1] f32
    h = x_ref[...]                        # [N, Din0] f32
    for li in range(num_layers):
        w = wb[2 * li][...]               # [Din_pad, Dpad] bf16
        b = wb[2 * li + 1][...]           # [1, Dpad] f32
        hn = (h * norm).astype(jnp.bfloat16)
        xw = jnp.dot(hn, w, preferred_element_type=jnp.float32)
        agg = jnp.dot(a, xw.astype(jnp.bfloat16),
                      preferred_element_type=jnp.float32)
        h = agg * norm + b
        if li < num_layers - 1:
            h = jnp.maximum(h, 0.0)
    o_ref[...] = h.astype(o_ref.dtype)


def gcn_fused(x, adj_bf16, norm, w_pads_bf16, b_pads):
    n_pad, din0 = x.shape
    dpad_last = w_pads_bf16[-1].shape[1]
    n_layers = len(w_pads_bf16)
    kernel = functools.partial(gcn_fused_kernel, num_layers=n_layers)

    in_specs = [
        pl.BlockSpec((n_pad, din0), lambda i: (0, 0)),
        pl.BlockSpec((n_pad, n_pad), lambda i: (0, 0)),
        pl.BlockSpec((n_pad, 1), lambda i: (0, 0)),
    ]
    args = [x, adj_bf16, norm]
    for wp, bp in zip(w_pads_bf16, b_pads):
        in_specs.append(pl.BlockSpec(wp.shape, lambda i: (0, 0)))
        in_specs.append(pl.BlockSpec(bp.shape, lambda i: (0, 0)))
        args.extend([wp, bp])

    return pl.pallas_call(
        kernel,
        out_shape=jax.ShapeDtypeStruct((n_pad, dpad_last), jnp.float32),
        grid_spec=pltpu.PrefetchScalarGridSpec(
            num_scalar_prefetch=0,
            grid=(1,),
            in_specs=in_specs,
            out_specs=pl.BlockSpec((n_pad, dpad_last), lambda i: (0, 0)),
        ),
        compiler_params=pltpu.CompilerParams(
            dimension_semantics=("arbitrary",),
            vmem_limit_bytes=VMEM_LIMIT_BYTES,
        ),
    )(*args)


# ---------------------------------------------------------------------------
# Layer stack
# ---------------------------------------------------------------------------
def gcn_forward(features, weights, biases, adj_bf16, norm, *,
                tm=512, tk=1024, force_path=None):
    """GraphConv stack: ReLU on all but the last layer. Returns [N, n_classes]."""
    n, din0 = features.shape
    n_pad = _round_up(n, LANE)
    if n_pad != n:
        features = jnp.zeros((n_pad, din0), features.dtype).at[:n, :].set(features)
        norm = jnp.zeros((n_pad, 1), norm.dtype).at[:n, :].set(norm)
        adj_bf16 = jnp.zeros((n_pad, n_pad), adj_bf16.dtype).at[:n, :n].set(adj_bf16)

    # Pad weights to lane-dense widths; W is cast to bf16 once per layer here.
    w_pads, b_pads = [], []
    cur_in = din0
    for w, b in zip(weights, biases):
        din, dout = w.shape
        dpad = _round_up(dout, LANE)
        w_pad = (jnp.zeros((cur_in, dpad), jnp.float32)
                 .at[:din, :dout].set(w).astype(jnp.bfloat16))
        b_pad = jnp.zeros((1, dpad), jnp.float32).at[0, :dout].set(b)
        w_pads.append(w_pad)
        b_pads.append(b_pad)
        cur_in = dpad

    use_fused = (force_path == "fused" or
                 (force_path is None and n_pad <= FUSE_MAX_NODES))
    if use_fused:
        h = gcn_fused(features, adj_bf16, norm, w_pads, b_pads)
    else:
        # Row axis keeps >= 2 blocks so v7x megacore shards it; reduction last.
        tm_eff = _pick_tile(n_pad, tm, min_blocks=2)
        tk_eff = _pick_tile(n_pad, tk, min_blocks=1)
        h = features
        n_layers = len(w_pads)
        for i, (wp, bp) in enumerate(zip(w_pads, b_pads)):
            h = gcn_layer_tiled(h, adj_bf16, norm, wp, bp,
                                tm=tm_eff, tk=tk_eff,
                                apply_relu=(i < n_layers - 1))

    return h[:n, : weights[-1].shape[1]]          # strip all padding at the end


# ---------------------------------------------------------------------------
# Host-side graph construction + pure-JAX references
# ---------------------------------------------------------------------------
def build_ring_graph(num_nodes):
    """Deterministic undirected ring graph with self-loops (in_degree == 3)."""
    i = jnp.arange(num_nodes)
    adj = jnp.zeros((num_nodes, num_nodes), dtype=jnp.float32)
    adj = adj.at[i, i].set(1.0)
    adj = adj.at[i, (i + 1) % num_nodes].set(1.0)
    adj = adj.at[i, (i - 1) % num_nodes].set(1.0)
    degs = jnp.sum(adj, axis=1)
    norm = jnp.where(degs > 0, 1.0 / jnp.sqrt(jnp.maximum(degs, 1.0)), 0.0)
    norm = norm.reshape(num_nodes, 1).astype(jnp.float32)
    adj_bf16 = adj.astype(jnp.bfloat16)           # 0/1 entries -> lossless cast
    return adj, adj_bf16, norm


def gcn_reference(features, weights, biases, adj_f32, norm, *, emulate_bf16):
    """Reference GraphConv stack. If emulate_bf16, mirrors the kernels' bf16
    operand roundings (accumulation stays f32), otherwise pure float32."""
    hi = jax.lax.Precision.HIGHEST

    def rnd(x):
        return x.astype(jnp.bfloat16).astype(jnp.float32) if emulate_bf16 else x

    h = features
    for li, (w, b) in enumerate(zip(weights, biases)):
        hn = rnd(h * norm)
        xw = jnp.dot(hn, rnd(w), precision=hi)
        h = jnp.dot(adj_f32, rnd(xw), precision=hi) * norm + b.reshape(1, -1)
        if li < len(weights) - 1:
            h = jnp.maximum(h, 0.0)
    return h


if __name__ == "__main__":
    # Shapes consistent with GCN(g, n_infeat, n_hidden, n_classes, n_layers=1, relu)
    num_nodes = 512
    n_infeat = 16
    n_hidden = 32
    n_classes = 8
    n_layers = 1   # -> GraphConv(in, hid, relu) + GraphConv(hid, classes)

    key = jax.random.PRNGKey(0)
    k_feat, k_w = jax.random.split(key)

    features = jax.random.normal(k_feat, (num_nodes, n_infeat), dtype=jnp.float32)
    adj_f32, adj_bf16, norm = build_ring_graph(num_nodes)

    # Deterministic parameter init (synthetic, no checkpoint).
    dims = [n_infeat] + [n_hidden] * n_layers + [n_classes]
    weights, biases = [], []
    for li in range(len(dims) - 1):
        k_w, kw_i = jax.random.split(k_w)
        fan_in, fan_out = dims[li], dims[li + 1]
        weights.append(jax.random.normal(kw_i, (fan_in, fan_out), jnp.float32) * 0.1)
        biases.append(jnp.full((fan_out,), 0.01, dtype=jnp.float32))

    # Path 1: whole-network fused into a single pallas_call (demo-size winner).
    out_fused = gcn_forward(features, weights, biases, adj_bf16, norm,
                            force_path="fused")
    # Path 2: tiled large-N path, small tiles so the 4x4 reduction grid and the
    # VMEM accumulator init/finalize logic are genuinely exercised.
    out_tiled = gcn_forward(features, weights, biases, adj_bf16, norm,
                            force_path="tiled", tm=128, tk=128)
    out_fused, out_tiled = jax.block_until_ready((out_fused, out_tiled))

    ref_f32 = gcn_reference(features, weights, biases, adj_f32, norm,
                            emulate_bf16=False)
    ref_bf16 = gcn_reference(features, weights, biases, adj_f32, norm,
                             emulate_bf16=True)

    for out in (out_fused, out_tiled):
        assert out.shape == (num_nodes, n_classes), out.shape
        # Tight check vs a reference with matching bf16 operand roundings.
        assert jnp.allclose(out, ref_bf16, atol=2e-3, rtol=1e-2), \
            float(jnp.max(jnp.abs(out - ref_bf16)))
        # Looser check vs the pure-float32 GraphConv semantics (only deviation
        # is bf16 rounding of the matmul operands; accumulation is f32).
        assert jnp.allclose(out, ref_f32, atol=1e-2, rtol=2e-2), \
            float(jnp.max(jnp.abs(out - ref_f32)))

    print("KERNEL_OK")
</pallas_src>

<mosaic_0001>
module attributes {stable_mosaic.version = 11 : i64} {
  func.func @gcn_fused_kernel(%arg0: i32, %arg1: memref<512x16xf32, #tpu.memory_space<vmem>>, %arg2: memref<512x512xbf16, #tpu.memory_space<vmem>>, %arg3: memref<512x1xf32, #tpu.memory_space<vmem>>, %arg4: memref<16x128xbf16, #tpu.memory_space<vmem>>, %arg5: memref<1x128xf32, #tpu.memory_space<vmem>>, %arg6: memref<128x128xbf16, #tpu.memory_space<vmem>>, %arg7: memref<1x128xf32, #tpu.memory_space<vmem>>, %arg8: memref<512x128xf32, #tpu.memory_space<vmem>>) attributes {dimension_semantics = [#tpu.dimension_semantics<arbitrary>], iteration_bounds = array<i64: 1>, scalar_prefetch = 0 : i64, scratch_operands = 0 : i64, tpu.core_type = #tpu.core_type<tc>, window_params = [{pipeline_mode = #tpu.pipeline_mode<synchronous>, transform_indices = @transform_0, window_bounds = array<i64: 512, 16>}, {pipeline_mode = #tpu.pipeline_mode<synchronous>, transform_indices = @transform_1, window_bounds = array<i64: 512, 512>}, {pipeline_mode = #tpu.pipeline_mode<synchronous>, transform_indices = @transform_2, window_bounds = array<i64: 512, 1>}, {pipeline_mode = #tpu.pipeline_mode<synchronous>, transform_indices = @transform_3, window_bounds = array<i64: 16, 128>}, {pipeline_mode = #tpu.pipeline_mode<synchronous>, transform_indices = @transform_4, window_bounds = array<i64: 1, 128>}, {pipeline_mode = #tpu.pipeline_mode<synchronous>, transform_indices = @transform_5, window_bounds = array<i64: 128, 128>}, {pipeline_mode = #tpu.pipeline_mode<synchronous>, transform_indices = @transform_6, window_bounds = array<i64: 1, 128>}, {pipeline_mode = #tpu.pipeline_mode<synchronous>, transform_indices = @transform_7, window_bounds = array<i64: 512, 128>}]} {
    %c0 = arith.constant 0 : index
    %c0_0 = arith.constant 0 : index
    %0 = vector.load %arg2[%c0, %c0_0] : memref<512x512xbf16, #tpu.memory_space<vmem>>, vector<512x512xbf16>
    %c0_1 = arith.constant 0 : index
    %c0_2 = arith.constant 0 : index
    %1 = vector.load %arg3[%c0_1, %c0_2] : memref<512x1xf32, #tpu.memory_space<vmem>>, vector<512x1xf32>
    %c0_3 = arith.constant 0 : index
    %c0_4 = arith.constant 0 : index
    %2 = vector.load %arg1[%c0_3, %c0_4] : memref<512x16xf32, #tpu.memory_space<vmem>>, vector<512x16xf32>
    %c0_5 = arith.constant 0 : index
    %c0_6 = arith.constant 0 : index
    %3 = vector.load %arg4[%c0_5, %c0_6] : memref<16x128xbf16, #tpu.memory_space<vmem>>, vector<16x128xbf16>
    %c0_7 = arith.constant 0 : index
    %c0_8 = arith.constant 0 : index
    %4 = vector.load %arg5[%c0_7, %c0_8] : memref<1x128xf32, #tpu.memory_space<vmem>>, vector<1x128xf32>
    %5 = vector.broadcast %1 : vector<512x1xf32> to vector<512x16xf32>
    %6 = arith.mulf %2, %5 : vector<512x16xf32>
    %7 = arith.truncf %6 : vector<512x16xf32> to vector<512x16xbf16>
    %cst = arith.constant dense<0.000000e+00> : vector<512x128xf32>
    %8 = tpu.matmul %7, %3, %cst {dimension_numbers = #tpu.dot_dimension_numbers<[1], [0], [0], [1], [0, 0, 1, 1], [], []>} : vector<512x16xbf16>, vector<16x128xbf16>, vector<512x128xf32> -> vector<512x128xf32>
    %9 = arith.truncf %8 : vector<512x128xf32> to vector<512x128xbf16>
    %cst_9 = arith.constant dense<0.000000e+00> : vector<512x128xf32>
    %10 = tpu.matmul %0, %9, %cst_9 {dimension_numbers = #tpu.dot_dimension_numbers<[1], [0], [0], [1], [0, 0, 1, 1], [], []>} : vector<512x512xbf16>, vector<512x128xbf16>, vector<512x128xf32> -> vector<512x128xf32>
    %11 = vector.broadcast %1 : vector<512x1xf32> to vector<512x128xf32>
    %12 = arith.mulf %10, %11 : vector<512x128xf32>
    %13 = vector.broadcast %4 : vector<1x128xf32> to vector<512x128xf32>
    %14 = arith.addf %12, %13 : vector<512x128xf32>
    %cst_10 = arith.constant 0.000000e+00 : f32
    %15 = vector.broadcast %cst_10 : f32 to vector<512x128xf32>
    %16 = arith.maximumf %14, %15 : vector<512x128xf32>
    %c0_11 = arith.constant 0 : index
    %c0_12 = arith.constant 0 : index
    %17 = vector.load %arg6[%c0_11, %c0_12] : memref<128x128xbf16, #tpu.memory_space<vmem>>, vector<128x128xbf16>
    %c0_13 = arith.constant 0 : index
    %c0_14 = arith.constant 0 : index
    %18 = vector.load %arg7[%c0_13, %c0_14] : memref<1x128xf32, #tpu.memory_space<vmem>>, vector<1x128xf32>
    %19 = vector.broadcast %1 : vector<512x1xf32> to vector<512x128xf32>
    %20 = arith.mulf %16, %19 : vector<512x128xf32>
    %21 = arith.truncf %20 : vector<512x128xf32> to vector<512x128xbf16>
    %cst_15 = arith.constant dense<0.000000e+00> : vector<512x128xf32>
    %22 = tpu.matmul %21, %17, %cst_15 {dimension_numbers = #tpu.dot_dimension_numbers<[1], [0], [0], [1], [0, 0, 1, 1], [], []>} : vector<512x128xbf16>, vector<128x128xbf16>, vector<512x128xf32> -> vector<512x128xf32>
    %23 = arith.truncf %22 : vector<512x128xf32> to vector<512x128xbf16>
    %cst_16 = arith.constant dense<0.000000e+00> : vector<512x128xf32>
    %24 = tpu.matmul %0, %23, %cst_16 {dimension_numbers = #tpu.dot_dimension_numbers<[1], [0], [0], [1], [0, 0, 1, 1], [], []>} : vector<512x512xbf16>, vector<512x128xbf16>, vector<512x128xf32> -> vector<512x128xf32>
    %25 = vector.broadcast %1 : vector<512x1xf32> to vector<512x128xf32>
    %26 = arith.mulf %24, %25 : vector<512x128xf32>
    %27 = vector.broadcast %18 : vector<1x128xf32> to vector<512x128xf32>
    %28 = arith.addf %26, %27 : vector<512x128xf32>
    %c0_17 = arith.constant 0 : index
    %c0_18 = arith.constant 0 : index
    %29 = vector.load %arg8[%c0_17, %c0_18] : memref<512x128xf32, #tpu.memory_space<vmem>>, vector<512x128xf32>
    tpu.vector_store %arg8[%c0_17, %c0_18], %28 {strides = array<i32>} : memref<512x128xf32, #tpu.memory_space<vmem>>, vector<512x128xf32>,
    return
  }
  func.func @transform_0(%arg0: i32) -> (i32, i32) {
    %c0_i32 = arith.constant 0 : i32
    %c0_i32_0 = arith.constant 0 : i32
    %c0_i32_1 = arith.constant 0 : i32
    return %c0_i32, %c0_i32_0 : i32, i32
  }
  func.func @transform_1(%arg0: i32) -> (i32, i32) {
    %c0_i32 = arith.constant 0 : i32
    %c0_i32_0 = arith.constant 0 : i32
    %c0_i32_1 = arith.constant 0 : i32
    return %c0_i32, %c0_i32_0 : i32, i32
  }
  func.func @transform_2(%arg0: i32) -> (i32, i32) {
    %c0_i32 = arith.constant 0 : i32
    %c0_i32_0 = arith.constant 0 : i32
    %c0_i32_1 = arith.constant 0 : i32
    return %c0_i32, %c0_i32_0 : i32, i32
  }
  func.func @transform_3(%arg0: i32) -> (i32, i32) {
    %c0_i32 = arith.constant 0 : i32
    %c0_i32_0 = arith.constant 0 : i32
    %c0_i32_1 = arith.constant 0 : i32
    return %c0_i32, %c0_i32_0 : i32, i32
  }
  func.func @transform_4(%arg0: i32) -> (i32, i32) {
    %c0_i32 = arith.constant 0 : i32
    %c0_i32_0 = arith.constant 0 : i32
    %c0_i32_1 = arith.constant 0 : i32
    return %c0_i32, %c0_i32_0 : i32, i32
  }
  func.func @transform_5(%arg0: i32) -> (i32, i32) {
    %c0_i32 = arith.constant 0 : i32
    %c0_i32_0 = arith.constant 0 : i32
    %c0_i32_1 = arith.constant 0 : i32
    return %c0_i32, %c0_i32_0 : i32, i32
  }
  func.func @transform_6(%arg0: i32) -> (i32, i32) {
    %c0_i32 = arith.constant 0 : i32
    %c0_i32_0 = arith.constant 0 : i32
    %c0_i32_1 = arith.constant 0 : i32
    return %c0_i32, %c0_i32_0 : i32, i32
  }
  func.func @transform_7(%arg0: i32) -> (i32, i32) {
    %c0_i32 = arith.constant 0 : i32
    %c0_i32_0 = arith.constant 0 : i32
    %c0_i32_1 = arith.constant 0 : i32
    return %c0_i32, %c0_i32_0 : i32, i32
  }
}

</mosaic_0001>

<bundles_post_ra>
// kernel: tpu_custom_call.1
= control target key start
LH: loop header
LB: loop body
LE: loop exit
PB: predicated region body
PF: predicated region fallthrough
CT: control target
= control target key end

     0   :  { %12 = vsyncpa [#allocation3], 0  ;;  %s6972_s0 = inlined_call_operand.vmem [shape: f32[512,16], index: 0, kind: input, shape index: {}]   ;;  %s6973_s1 = inlined_call_operand.vmem [shape: bf16[512,512], index: 1, kind: input, shape index: {}]   ;;  %s6974_s2 = inlined_call_operand.vmem [shape: f32[512,1], index: 2, kind: input, shape index: {}]   ;;  %s6975_s3 = inlined_call_operand.hbm [shape: bf16[16,128], index: 3, kind: input, shape index: {}]   ;;  %s6976_s4 = inlined_call_operand.vmem [shape: f32[1,128], index: 4, kind: input, shape index: {}]   ;;  %s6977_s5 = inlined_call_operand.vmem [shape: bf16[128,128], index: 5, kind: input, shape index: {}]   ;;  %s6978_s6 = inlined_call_operand.vmem [shape: f32[1,128], index: 6, kind: input, shape index: {}]   ;;  %s6979_s7 = inlined_call_operand.hbm [shape: f32[512,128], index: 7, kind: output, shape index: {}]  }
   0x1   :  { %13 = vsyncpa [#allocation4], 0  ;;  %s4637_s24 = smov [#allocation2]  }
   0x2   :  { %s25_s25 = sshll.u32 %s4637_s24, 4  ;;  %s26_s25 = int_to_ptr.vmem [resolvable:$true] %s25_s25 }
   0x3   :  { %s4601_s26 = scalar_lea.vmem %s26_s25, 128  ;;  %p4606_p1 = scmp.lt.s32.totalorder %s26_s25, %s26_s25 }
   0x4   :  { %p4602_p0 = scmp.ne.s32.totalorder %s26_s25, %s4601_s26  ;;  %p4607_p2 = scmp.lt.s32.totalorder %s4601_s26, %s4601_s26 }
   0x6   :  { %p4608_p3 = por %p4607_p2, %p4606_p1 }
   0x8   :  { %p4609_p4 = pnand %p4608_p3, %p4602_p0 }
   0xa   :  { %4612 = shalt.err (!%p4609_p4)
}
   0xb   :  { %s4638_s27 = smov 64   ;;  %s4639_s28 = smov 4  }
   0xc   :  { %31 = dma.hbm_to_vmem [thread:$0]  %s6975_s3, 128, %s26_s25, [#allocation3], %s4638_s27, %s4638_s27, %s4639_s28  }
   0xd   :  { %4633 = dma.done.wait [#allocation3], 128  }
   0xe   :  { %4634 = vsyncadd [#allocation3], 4294967168  ;;  %v6980_v0 = vmov 0   ;;  %v172_v1 = vld [vmem:[%s6974_s2 + $0x10] sm:$0xff]  ;;  %v170_v2 = vld [vmem:[%s6974_s2] sm:$0xff]  ;;  %vm723_vm0 = vcmask 130048  }
   0xf   :  { %4262 = vset.pattern.permute.xlu1 %v6980_v0  ;;  %4261 = vset.pattern.permute.xlu0 %v6980_v0  ;;  %v173_v3 = vld [vmem:[%s6974_s2 + $0x18] sm:$0xff]  ;;  %v171_v4 = vld [vmem:[%s6974_s2 + $0x8] sm:$0xff]  ;;  %v174_v6 = vld [vmem:[%s6974_s2 + $0x20] sm:$0xff] }
  0x10   :  { %1781 = vmatprep.subr.bf16.mxu1 %v6980_v0  ;;  %313 = vperm.xlu1 %4262, %v172_v1   ;;  %v175_v5 = vld [vmem:[%s6974_s2 + $0x28] sm:$0xff]  ;;  %v177_v7 = vld [vmem:[%s6974_s2 + $0x38] sm:$0xff]  ;;  %v176_v8 = vld [vmem:[%s6974_s2 + $0x30] sm:$0xff] }
  0x11   :  { %303 = vperm.xlu0 %4261, %v170_v2   ;;  %v179_v9 = vld [vmem:[%s6974_s2 + $0x48] sm:$0xff]  ;;  %v178_v10 = vld [vmem:[%s6974_s2 + $0x40] sm:$0xff]  ;;  %v181_v11 = vld [vmem:[%s6974_s2 + $0x58] sm:$0xff] }
  0x12   :  { %v180_v12 = vld [vmem:[%s6974_s2 + $0x50] sm:$0xff]  ;;  %v183_v13 = vld [vmem:[%s6974_s2 + $0x68] sm:$0xff]  ;;  %v182_v14 = vld [vmem:[%s6974_s2 + $0x60] sm:$0xff] }
  0x13   :  { %v4263_v15 = vld [vmem:[#allocation2] sm:$0xff]   ;;  %v185_v16 = vld [vmem:[%s6974_s2 + $0x78] sm:$0xff]  ;;  %v184_v17 = vld [vmem:[%s6974_s2 + $0x70] sm:$0xff] }
  0x14   :  { %318 = vperm.xlu1 %4262, %v173_v3   ;;  %4076 = vmatprep.subr.bf16.mxu0 %v4263_v15  ;;  %v187_v18 = vld [vmem:[%s6974_s2 + $0x88] sm:$0xff]  ;;  %v186_v19 = vld [vmem:[%s6974_s2 + $0x80] sm:$0xff]  ;;  %v189_v20 = vld [vmem:[%s6974_s2 + $0x98] sm:$0xff] }
  0x15   :  { %308 = vperm.xlu0 %4261, %v171_v4   ;;  %4077 = vmatpush3.bf16.msra.mxu0 %v4263_v15  ;;  %v188_v21 = vld [vmem:[%s6974_s2 + $0x90] sm:$0xff]  ;;  %v191_v22 = vld [vmem:[%s6974_s2 + $0xa8] sm:$0xff]  ;;  %v190_v23 = vld [vmem:[%s6974_s2 + $0xa0] sm:$0xff] }
  0x16   :  { %2070 = vmatprep.subr.bf16.mxu0 %v6980_v0  ;;  %v193_v24 = vld [vmem:[%s6974_s2 + $0xb8] sm:$0xff]  ;;  %v192_v25 = vld [vmem:[%s6974_s2 + $0xb0] sm:$0xff]  ;;  %v195_v26 = vld [vmem:[%s6974_s2 + $0xc8] sm:$0xff] }
  0x17   :  { %v194_v27 = vld [vmem:[%s6974_s2 + $0xc0] sm:$0xff]  ;;  %v197_v28 = vld [vmem:[%s6974_s2 + $0xd8] sm:$0xff]  ;;  %v196_v29 = vld [vmem:[%s6974_s2 + $0xd0] sm:$0xff] }
  0x18   :  { %328 = vperm.xlu1 %4262, %v175_v5   ;;  %v199_v30 = vld [vmem:[%s6974_s2 + $0xe8] sm:$0xff]  ;;  %v198_v31 = vld [vmem:[%s6974_s2 + $0xe0] sm:$0xff]  ;;  %v201_v32 = vld [vmem:[%s6974_s2 + $0xf8] sm:$0xff] }
  0x19   :  { %323 = vperm.xlu0 %4261, %v174_v6   ;;  %v200_v33 = vld [vmem:[%s6974_s2 + $0xf0] sm:$0xff]  ;;  %v203_v34 = vld [vmem:[%s6974_s2 + $0x108] sm:$0xff]  ;;  %v202_v35 = vld [vmem:[%s6974_s2 + $0x100] sm:$0xff] }
  0x1a   :  { %v205_v36 = vld [vmem:[%s6974_s2 + $0x118] sm:$0xff]  ;;  %v204_v37 = vld [vmem:[%s6974_s2 + $0x110] sm:$0xff]  ;;  %v207_v38 = vld [vmem:[%s6974_s2 + $0x128] sm:$0xff] }
  0x1b   :  { %v206_v39 = vld [vmem:[%s6974_s2 + $0x120] sm:$0xff]  ;;  %v209_v40 = vld [vmem:[%s6974_s2 + $0x138] sm:$0xff]  ;;  %v208_v41 = vld [vmem:[%s6974_s2 + $0x130] sm:$0xff] }
  0x1c   :  { %338 = vperm.xlu1 %4262, %v177_v7   ;;  %v211_v42 = vld [vmem:[%s6974_s2 + $0x148] sm:$0xff]  ;;  %v210_v43 = vld [vmem:[%s6974_s2 + $0x140] sm:$0xff]  ;;  %v213_v44 = vld [vmem:[%s6974_s2 + $0x158] sm:$0xff] }
  0x1d   :  { %333 = vperm.xlu0 %4261, %v176_v8   ;;  %v212_v45 = vld [vmem:[%s6974_s2 + $0x150] sm:$0xff]  ;;  %v215_v46 = vld [vmem:[%s6974_s2 + $0x168] sm:$0xff]  ;;  %v214_v47 = vld [vmem:[%s6974_s2 + $0x160] sm:$0xff] }
  0x1e   :  { %v217_v48 = vld [vmem:[%s6974_s2 + $0x178] sm:$0xff]  ;;  %v216_v49 = vld [vmem:[%s6974_s2 + $0x170] sm:$0xff]  ;;  %v219_v50 = vld [vmem:[%s6974_s2 + $0x188] sm:$0xff] }
  0x1f   :  { %v218_v51 = vld [vmem:[%s6974_s2 + $0x180] sm:$0xff]  ;;  %v221_v52 = vld [vmem:[%s6974_s2 + $0x198] sm:$0xff]  ;;  %v220_v53 = vld [vmem:[%s6974_s2 + $0x190] sm:$0xff] }
  0x20   :  { %348 = vperm.xlu1 %4262, %v179_v9   ;;  %v223_v54 = vld [vmem:[%s6974_s2 + $0x1a8] sm:$0xff]  ;;  %v222_v55 = vld [vmem:[%s6974_s2 + $0x1a0] sm:$0xff]  ;;  %v225_v56 = vld [vmem:[%s6974_s2 + $0x1b8] sm:$0xff] }
  0x21   :  { %343 = vperm.xlu0 %4261, %v178_v10   ;;  %v224_v57 = vld [vmem:[%s6974_s2 + $0x1b0] sm:$0xff]  ;;  %v227_v58 = vld [vmem:[%s6974_s2 + $0x1c8] sm:$0xff]  ;;  %v226_v59 = vld [vmem:[%s6974_s2 + $0x1c0] sm:$0xff] }
  0x22   :  { %v229_v60 = vld [vmem:[%s6974_s2 + $0x1d8] sm:$0xff]  ;;  %v228_v61 = vld [vmem:[%s6974_s2 + $0x1d0] sm:$0xff]  ;;  %v231_v62 = vld [vmem:[%s6974_s2 + $0x1e8] sm:$0xff] }
  0x23   :  { %v230_v63 = vld [vmem:[%s6974_s2 + $0x1e0] sm:$0xff]  ;;  %v233_v1 = vld [vmem:[%s6974_s2 + $0x1f8] sm:$0xff]  ;;  %v232_v2 = vld [vmem:[%s6974_s2 + $0x1f0] sm:$0xff] }
  0x24   :  { %358 = vperm.xlu1 %4262, %v181_v11   ;;  %v236_v5 = vld [vmem:[%s6972_s0 + $0x10] sm:$0xff]  ;;  %v237_v6 = vld [vmem:[%s6972_s0 + $0x18] sm:$0xff]  ;;  %v234_v7 = vld [vmem:[%s6972_s0] sm:$0xff] }
  0x25   :  { %353 = vperm.xlu0 %4261, %v180_v12   ;;  %v235_v8 = vld [vmem:[%s6972_s0 + $0x8] sm:$0xff] }
  0x26   :  { %v239_v15 = vld [vmem:[%s6972_s0 + $0x28] sm:$0xff] }
  0x28   :  { %368 = vperm.xlu1 %4262, %v183_v13  }
  0x29   :  { %363 = vperm.xlu0 %4261, %v182_v14  }
  0x2c   :  { %378 = vperm.xlu1 %4262, %v185_v16   ;;  %v238_v16 = vld [vmem:[%s6972_s0 + $0x20] sm:$0xff] }
  0x2d   :  { %373 = vperm.xlu0 %4261, %v184_v17  }
  0x30   :  { %388 = vperm.xlu1 %4262, %v187_v18  }
  0x31   :  { %383 = vperm.xlu0 %4261, %v186_v19  }
  0x34   :  { %398 = vperm.xlu1 %4262, %v189_v20  }
  0x35   :  { %393 = vperm.xlu0 %4261, %v188_v21  }
  0x38   :  { %408 = vperm.xlu1 %4262, %v191_v22  }
  0x39   :  { %403 = vperm.xlu0 %4261, %v190_v23   ;;  %v241_v23 = vld [vmem:[%s6972_s0 + $0x38] sm:$0xff] }
  0x3c   :  { %418 = vperm.xlu1 %4262, %v193_v24   ;;  %v240_v24 = vld [vmem:[%s6972_s0 + $0x30] sm:$0xff] }
  0x3d   :  { %413 = vperm.xlu0 %4261, %v192_v25  }
  0x40   :  { %428 = vperm.xlu1 %4262, %v195_v26  }
  0x41   :  { %423 = vperm.xlu0 %4261, %v194_v27  }
  0x44   :  { %438 = vperm.xlu1 %4262, %v197_v28  }
  0x45   :  { %433 = vperm.xlu0 %4261, %v196_v29  }
  0x48   :  { %448 = vperm.xlu1 %4262, %v199_v30   ;;  %v243_v30 = vld [vmem:[%s6972_s0 + $0x48] sm:$0xff] }
  0x49   :  { %443 = vperm.xlu0 %4261, %v198_v31   ;;  %v242_v31 = vld [vmem:[%s6972_s0 + $0x40] sm:$0xff] }
  0x4c   :  { %458 = vperm.xlu1 %4262, %v201_v32  }
  0x4d   :  { %453 = vperm.xlu0 %4261, %v200_v33  }
  0x50   :  { %468 = vperm.xlu1 %4262, %v203_v34  }
  0x51   :  { %463 = vperm.xlu0 %4261, %v202_v35  }
  0x54   :  { %478 = vperm.xlu1 %4262, %v205_v36  }
  0x55   :  { %473 = vperm.xlu0 %4261, %v204_v37   ;;  %v245_v37 = vld [vmem:[%s6972_s0 + $0x58] sm:$0xff] }
  0x58   :  { %488 = vperm.xlu1 %4262, %v207_v38   ;;  %v244_v38 = vld [vmem:[%s6972_s0 + $0x50] sm:$0xff] }
  0x59   :  { %483 = vperm.xlu0 %4261, %v206_v39  }
  0x5c   :  { %498 = vperm.xlu1 %4262, %v209_v40  }
  0x5d   :  { %493 = vperm.xlu0 %4261, %v208_v41  }
  0x60   :  { %508 = vperm.xlu1 %4262, %v211_v42  }
  0x61   :  { %503 = vperm.xlu0 %4261, %v210_v43  }
  0x64   :  { %518 = vperm.xlu1 %4262, %v213_v44   ;;  %v247_v44 = vld [vmem:[%s6972_s0 + $0x68] sm:$0xff] }
  0x65   :  { %513 = vperm.xlu0 %4261, %v212_v45   ;;  %v246_v45 = vld [vmem:[%s6972_s0 + $0x60] sm:$0xff] }
  0x68   :  { %528 = vperm.xlu1 %4262, %v215_v46  }
  0x69   :  { %523 = vperm.xlu0 %4261, %v214_v47  }
  0x6c   :  { %538 = vperm.xlu1 %4262, %v217_v48  }
  0x6d   :  { %533 = vperm.xlu0 %4261, %v216_v49  }
  0x70   :  { %548 = vperm.xlu1 %4262, %v219_v50  }
  0x71   :  { %543 = vperm.xlu0 %4261, %v218_v51   ;;  %v249_v51 = vld [vmem:[%s6972_s0 + $0x78] sm:$0xff] }
  0x74   :  { %558 = vperm.xlu1 %4262, %v221_v52   ;;  %v248_v52 = vld [vmem:[%s6972_s0 + $0x70] sm:$0xff] }
  0x75   :  { %553 = vperm.xlu0 %4261, %v220_v53  }
  0x78   :  { %568 = vperm.xlu1 %4262, %v223_v54  }
  0x79   :  { %563 = vperm.xlu0 %4261, %v222_v55  }
  0x7c   :  { %578 = vperm.xlu1 %4262, %v225_v56  }
  0x7d   :  { %573 = vperm.xlu0 %4261, %v224_v57  }
  0x80   :  { %588 = vperm.xlu1 %4262, %v227_v58   ;;  %v251_v58 = vld [vmem:[%s6972_s0 + $0x88] sm:$0xff] }
  0x81   :  { %583 = vperm.xlu0 %4261, %v226_v59   ;;  %v250_v59 = vld [vmem:[%s6972_s0 + $0x80] sm:$0xff] }
  0x84   :  { %598 = vperm.xlu1 %4262, %v229_v60  }
  0x85   :  { %593 = vperm.xlu0 %4261, %v228_v61  }
  0x88   :  { %608 = vperm.xlu1 %4262, %v231_v62  }
  0x89   :  { %603 = vperm.xlu0 %4261, %v230_v63  }
  0x8b   :  { %v4883_v3 = vpop.permute.xlu1 %313 }
  0x8c   :  { %7091 = vst [vmem:[#allocation8_spill] sm:$0xff] %v4883_v3  ;;  %v4885_v4 = vpop.permute.xlu0 %303  ;;  %618 = vperm.xlu1 %4262, %v233_v1   ;;  %v623_v11 = vmul.f32 %v4883_v3, %v236_v5  ;;  %v252_v5 = vld [vmem:[%s6972_s0 + $0x90] sm:$0xff] }
  0x8d   :  { %7092 = vst [vmem:[#allocation9_spill] sm:$0xff] %v4885_v4  ;;  %613 = vperm.xlu0 %4261, %v232_v2   ;;  %v621_v13 = vmul.f32 %v4885_v4, %v234_v7  ;;  %v253_v2 = vld [vmem:[%s6972_s0 + $0x98] sm:$0xff] }
  0x8f   :  { %v4899_v9 = vpop.permute.xlu1 %318 }
  0x90   :  { %7093 = vst [vmem:[#allocation10_spill] sm:$0xff] %v4899_v9  ;;  %v4901_v10 = vpop.permute.xlu0 %308  ;;  %v624_v12 = vmul.f32 %v4899_v9, %v237_v6 }
  0x91   :  { %7094 = vst [vmem:[#allocation11_spill] sm:$0xff] %v4901_v10  ;;  %v622_v14 = vmul.f32 %v4901_v10, %v235_v8 }
  0x92   :  { %v686_v18 = vpack.c.bf16 %v624_v12, %v623_v11 }
  0x93   :  { %v685_v17 = vpack.c.bf16 %v622_v14, %v621_v13  ;;  %v4913_v19 = vpop.permute.xlu1 %328  ;;  %v255_v13 = vld [vmem:[%s6972_s0 + $0xa8] sm:$0xff]  ;;  %v254_v14 = vld [vmem:[%s6972_s0 + $0xa0] sm:$0xff] }
  0x94   :  { %7095 = vst [vmem:[#allocation12_spill] sm:$0xff] %v4913_v19  ;;  %v4915_v20 = vpop.permute.xlu0 %323  ;;  %v626_v21 = vmul.f32 %v4913_v19, %v239_v15 }
  0x95   :  { %7096 = vst [vmem:[#allocation13_spill] sm:$0xff] %v4915_v20  ;;  %v625_v22 = vmul.f32 %v4915_v20, %v238_v16  ;;  %4078 = vmatprep.mubr.msk.bf16.mxu0 %vm723_vm0, %v685_v17 }
  0x96   :  { %4079 = vmatmul.mubr.msk.bf16.vlgmr.msra.gmra.mxu0 %vm723_vm0, %v686_v18 }
  0x97   :  { %v687_v25 = vpack.c.bf16 %v626_v21, %v625_v22  ;;  %v4927_v26 = vpop.permute.xlu1 %338  ;;  %v257_v22 = vld [vmem:[%s6972_s0 + $0xb8] sm:$0xff] }
  0x98   :  { %v4929_v27 = vpop.permute.xlu0 %333  ;;  %v628_v28 = vmul.f32 %v4927_v26, %v241_v23  ;;  %v256_v23 = vld [vmem:[%s6972_s0 + $0xb0] sm:$0xff] }
  0x99   :  { %v627_v29 = vmul.f32 %v4929_v27, %v240_v24  ;;  %4082 = vmatprep.mubr.msk.bf16.mxu0 %vm723_vm0, %v687_v25 }
  0x9b   :  { %v688_v32 = vpack.c.bf16 %v628_v28, %v627_v29  ;;  %v4940_v33 = vpop.permute.xlu1 %348 }
  0x9c   :  { %v4942_v34 = vpop.permute.xlu0 %343  ;;  %v630_v35 = vmul.f32 %v4940_v33, %v243_v30 }
  0x9d   :  { %v629_v36 = vmul.f32 %v4942_v34, %v242_v31  ;;  %v259_v31 = vld [vmem:[%s6972_s0 + $0xc8] sm:$0xff] }
  0x9e   :  { %4083 = vmatmul.mubr.msk.bf16.gmra.mxu0 %vm723_vm0, %v688_v32  ;;  %v258_v32 = vld [vmem:[%s6972_s0 + $0xc0] sm:$0xff] }
  0x9f   :  { %v689_v39 = vpack.c.bf16 %v630_v35, %v629_v36  ;;  %v4953_v40 = vpop.permute.xlu1 %358 }
  0xa0   :  { %v4955_v41 = vpop.permute.xlu0 %353  ;;  %v632_v42 = vmul.f32 %v4953_v40, %v245_v37 }
  0xa1   :  { %v631_v43 = vmul.f32 %v4955_v41, %v244_v38  ;;  %4086 = vmatprep.mubr.msk.bf16.mxu0 %vm723_vm0, %v689_v39 }
  0xa3   :  { %v690_v46 = vpack.c.bf16 %v632_v42, %v631_v43  ;;  %v4966_v47 = vpop.permute.xlu1 %368  ;;  %v261_v42 = vld [vmem:[%s6972_s0 + $0xd8] sm:$0xff]  ;;  %v260_v43 = vld [vmem:[%s6972_s0 + $0xd0] sm:$0xff] }
  0xa4   :  { %v4968_v48 = vpop.permute.xlu0 %363  ;;  %v634_v49 = vmul.f32 %v4966_v47, %v247_v44 }
  0xa5   :  { %v633_v50 = vmul.f32 %v4968_v48, %v246_v45 }
  0xa6   :  { %4087 = vmatmul.mubr.msk.bf16.gmra.mxu0 %vm723_vm0, %v690_v46 }
  0xa7   :  { %v691_v53 = vpack.c.bf16 %v634_v49, %v633_v50  ;;  %v4979_v54 = vpop.permute.xlu1 %378 }
  0xa8   :  { %v4981_v55 = vpop.permute.xlu0 %373  ;;  %v636_v56 = vmul.f32 %v4979_v54, %v249_v51  ;;  %v263_v51 = vld [vmem:[%s6972_s0 + $0xe8] sm:$0xff] }
  0xa9   :  { %v635_v57 = vmul.f32 %v4981_v55, %v248_v52  ;;  %4090 = vmatprep.mubr.msk.bf16.mxu0 %vm723_vm0, %v691_v53  ;;  %v262_v52 = vld [vmem:[%s6972_s0 + $0xe0] sm:$0xff] }
  0xab   :  { %v692_v60 = vpack.c.bf16 %v636_v56, %v635_v57  ;;  %v4992_v61 = vpop.permute.xlu1 %388 }
  0xac   :  { %v4994_v62 = vpop.permute.xlu0 %383  ;;  %v638_v63 = vmul.f32 %v4992_v61, %v251_v58 }
  0xad   :  { %v637_v1 = vmul.f32 %v4994_v62, %v250_v59 }
  0xae   :  { %4091 = vmatmul.mubr.msk.bf16.gmra.mxu0 %vm723_vm0, %v692_v60  ;;  %v265_v60 = vld [vmem:[%s6972_s0 + $0xf8] sm:$0xff] }
  0xaf   :  { %v693_v6 = vpack.c.bf16 %v638_v63, %v637_v1  ;;  %v5005_v7 = vpop.permute.xlu1 %398  ;;  %v264_v63 = vld [vmem:[%s6972_s0 + $0xf0] sm:$0xff] }
  0xb0   :  { %v5007_v8 = vpop.permute.xlu0 %393  ;;  %v640_v11 = vmul.f32 %v5005_v7, %v253_v2 }
  0xb1   :  { %v639_v12 = vmul.f32 %v5007_v8, %v252_v5  ;;  %4094 = vmatprep.mubr.msk.bf16.mxu0 %vm723_vm0, %v693_v6 }
  0xb3   :  { %v694_v15 = vpack.c.bf16 %v640_v11, %v639_v12  ;;  %v5018_v16 = vpop.permute.xlu1 %408  ;;  %v267_v12 = vld [vmem:[%s6972_s0 + $0x108] sm:$0xff] }
  0xb4   :  { %v5020_v17 = vpop.permute.xlu0 %403  ;;  %v642_v18 = vmul.f32 %v5018_v16, %v255_v13  ;;  %v266_v13 = vld [vmem:[%s6972_s0 + $0x100] sm:$0xff] }
  0xb5   :  { %v641_v21 = vmul.f32 %v5020_v17, %v254_v14 }
  0xb6   :  { %4095 = vmatmul.mubr.msk.bf16.gmra.mxu0 %vm723_vm0, %v694_v15 }
  0xb7   :  { %v695_v24 = vpack.c.bf16 %v642_v18, %v641_v21  ;;  %v5031_v25 = vpop.permute.xlu1 %418 }
  0xb8   :  { %v5033_v28 = vpop.permute.xlu0 %413  ;;  %v644_v29 = vmul.f32 %v5031_v25, %v257_v22 }
  0xb9   :  { %v643_v30 = vmul.f32 %v5033_v28, %v256_v23  ;;  %4098 = vmatprep.mubr.msk.bf16.mxu0 %vm723_vm0, %v695_v24  ;;  %v269_v23 = vld [vmem:[%s6972_s0 + $0x118] sm:$0xff]  ;;  %v268_v24 = vld [vmem:[%s6972_s0 + $0x110] sm:$0xff] }
  0xbb   :  { %v696_v35 = vpack.c.bf16 %v644_v29, %v643_v30  ;;  %v5044_v36 = vpop.permute.xlu1 %428 }
  0xbc   :  { %v5046_v37 = vpop.permute.xlu0 %423  ;;  %v646_v38 = vmul.f32 %v5044_v36, %v259_v31 }
  0xbd   :  { %v645_v39 = vmul.f32 %v5046_v37, %v258_v32 }
  0xbe   :  { %4099 = vmatmul.mubr.msk.bf16.gmra.mxu0 %vm723_vm0, %v696_v35 }
  0xbf   :  { %v697_v44 = vpack.c.bf16 %v646_v38, %v645_v39  ;;  %v5057_v45 = vpop.permute.xlu1 %438  ;;  %v271_v38 = vld [vmem:[%s6972_s0 + $0x128] sm:$0xff]  ;;  %v270_v39 = vld [vmem:[%s6972_s0 + $0x120] sm:$0xff] }
  0xc0   :  { %v5059_v46 = vpop.permute.xlu0 %433  ;;  %v648_v49 = vmul.f32 %v5057_v45, %v261_v42 }
  0xc1   :  { %v647_v50 = vmul.f32 %v5059_v46, %v260_v43  ;;  %4102 = vmatprep.mubr.msk.bf16.mxu0 %vm723_vm0, %v697_v44 }
  0xc3   :  { %v698_v53 = vpack.c.bf16 %v648_v49, %v647_v50  ;;  %v5070_v56 = vpop.permute.xlu1 %448 }
  0xc4   :  { %v5072_v57 = vpop.permute.xlu0 %443  ;;  %v650_v58 = vmul.f32 %v5070_v56, %v263_v51  ;;  %v273_v51 = vld [vmem:[%s6972_s0 + $0x138] sm:$0xff] }
  0xc5   :  { %v649_v59 = vmul.f32 %v5072_v57, %v262_v52  ;;  %v272_v52 = vld [vmem:[%s6972_s0 + $0x130] sm:$0xff] }
  0xc6   :  { %4103 = vmatmul.mubr.msk.bf16.gmra.mxu0 %vm723_vm0, %v698_v53 }
  0xc7   :  { %v699_v1 = vpack.c.bf16 %v650_v58, %v649_v59  ;;  %v5083_v2 = vpop.permute.xlu1 %458 }
  0xc8   :  { %7097 = vst [vmem:[#allocation14_spill] sm:$0xff] %v5083_v2  ;;  %v5085_v5 = vpop.permute.xlu0 %453  ;;  %v652_v6 = vmul.f32 %v5083_v2, %v265_v60 }
  0xc9   :  { %7098 = vst [vmem:[#allocation15_spill] sm:$0xff] %v5085_v5  ;;  %v651_v11 = vmul.f32 %v5085_v5, %v264_v63  ;;  %4106 = vmatprep.mubr.msk.bf16.mxu0 %vm723_vm0, %v699_v1  ;;  %v275_v1 = vld [vmem:[%s6972_s0 + $0x148] sm:$0xff] }
  0xcb   :  { %v700_v14 = vpack.c.bf16 %v652_v6, %v651_v11  ;;  %v5096_v15 = vpop.permute.xlu1 %468  ;;  %v274_v6 = vld [vmem:[%s6972_s0 + $0x140] sm:$0xff] }
  0xcc   :  { %7099 = vst [vmem:[#allocation16_spill] sm:$0xff] %v5096_v15  ;;  %v5098_v18 = vpop.permute.xlu0 %463  ;;  %v654_v21 = vmul.f32 %v5096_v15, %v267_v12 }
  0xcd   :  { %7100 = vst [vmem:[#allocation17_spill] sm:$0xff] %v5098_v18  ;;  %v653_v22 = vmul.f32 %v5098_v18, %v266_v13 }
  0xce   :  { %4107 = vmatmul.mubr.msk.bf16.gmra.mxu0 %vm723_vm0, %v700_v14 }
  0xcf   :  { %v701_v29 = vpack.c.bf16 %v654_v21, %v653_v22  ;;  %v5109_v30 = vpop.permute.xlu1 %478  ;;  %v277_v22 = vld [vmem:[%s6972_s0 + $0x158] sm:$0xff] }
  0xd0   :  { %7101 = vst [vmem:[#allocation18_spill] sm:$0xff] %v5109_v30  ;;  %v5111_v31 = vpop.permute.xlu0 %473  ;;  %v656_v32 = vmul.f32 %v5109_v30, %v269_v23  ;;  %v276_v23 = vld [vmem:[%s6972_s0 + $0x150] sm:$0xff] }
  0xd1   :  { %7102 = vst [vmem:[#allocation19_spill] sm:$0xff] %v5111_v31  ;;  %v655_v35 = vmul.f32 %v5111_v31, %v268_v24  ;;  %4110 = vmatprep.mubr.msk.bf16.mxu0 %vm723_vm0, %v701_v29 }
  0xd3   :  { %v702_v42 = vpack.c.bf16 %v656_v32, %v655_v35  ;;  %v5122_v43 = vpop.permute.xlu1 %488 }
  0xd4   :  { %7103 = vst [vmem:[#allocation20_spill] sm:$0xff] %v5122_v43  ;;  %v5124_v44 = vpop.permute.xlu0 %483  ;;  %v658_v49 = vmul.f32 %v5122_v43, %v271_v38 }
  0xd5   :  { %7104 = vst [vmem:[#allocation21_spill] sm:$0xff] %v5124_v44  ;;  %v657_v50 = vmul.f32 %v5124_v44, %v270_v39  ;;  %v279_v39 = vld [vmem:[%s6972_s0 + $0x168] sm:$0xff] }
  0xd6   :  { %4111 = vmatmul.mubr.msk.bf16.gmra.mxu0 %vm723_vm0, %v702_v42  ;;  %v278_v42 = vld [vmem:[%s6972_s0 + $0x160] sm:$0xff] }
  0xd7   :  { %v703_v53 = vpack.c.bf16 %v658_v49, %v657_v50  ;;  %v5135_v58 = vpop.permute.xlu1 %498 }
  0xd8   :  { %7105 = vst [vmem:[#allocation22_spill] sm:$0xff] %v5135_v58  ;;  %v5137_v59 = vpop.permute.xlu0 %493  ;;  %v660_v60 = vmul.f32 %v5135_v58, %v273_v51 }
  0xd9   :  { %7106 = vst [vmem:[#allocation23_spill] sm:$0xff] %v5137_v59  ;;  %v659_v63 = vmul.f32 %v5137_v59, %v272_v52  ;;  %4114 = vmatprep.mubr.msk.bf16.mxu0 %vm723_vm0, %v703_v53 }
  0xdb   :  { %v704_v11 = vpack.c.bf16 %v660_v60, %v659_v63  ;;  %v5148_v12 = vpop.permute.xlu1 %508  ;;  %v281_v60 = vld [vmem:[%s6972_s0 + $0x178] sm:$0xff]  ;;  %v280_v63 = vld [vmem:[%s6972_s0 + $0x170] sm:$0xff] }
  0xdc   :  { %7107 = vst [vmem:[#allocation24_spill] sm:$0xff] %v5148_v12  ;;  %v5150_v13 = vpop.permute.xlu0 %503  ;;  %v662_v14 = vmul.f32 %v5148_v12, %v275_v1 }
  0xdd   :  { %7108 = vst [vmem:[#allocation25_spill] sm:$0xff] %v5150_v13  ;;  %v661_v21 = vmul.f32 %v5150_v13, %v274_v6 }
  0xde   :  { %4115 = vmatmul.mubr.msk.bf16.gmra.mxu0 %vm723_vm0, %v704_v11 }
  0xdf   :  { %v705_v24 = vpack.c.bf16 %v662_v14, %v661_v21  ;;  %v5161_v29 = vpop.permute.xlu1 %518 }
  0xe0   :  { %7109 = vst [vmem:[#allocation26_spill] sm:$0xff] %v5161_v29  ;;  %v5163_v32 = vpop.permute.xlu0 %513  ;;  %v664_v35 = vmul.f32 %v5161_v29, %v277_v22  ;;  %v283_v22 = vld [vmem:[%s6972_s0 + $0x188] sm:$0xff] }
  0xe1   :  { %7110 = vst [vmem:[#allocation27_spill] sm:$0xff] %v5163_v32  ;;  %v663_v38 = vmul.f32 %v5163_v32, %v276_v23  ;;  %4118 = vmatprep.mubr.msk.bf16.mxu0 %vm723_vm0, %v705_v24  ;;  %v282_v23 = vld [vmem:[%s6972_s0 + $0x180] sm:$0xff] }
  0xe3   :  { %v706_v49 = vpack.c.bf16 %v664_v35, %v663_v38  ;;  %v5174_v50 = vpop.permute.xlu1 %528 }
  0xe4   :  { %7111 = vst [vmem:[#allocation28_spill] sm:$0xff] %v5174_v50  ;;  %v5176_v51 = vpop.permute.xlu0 %523  ;;  %v666_v52 = vmul.f32 %v5174_v50, %v279_v39 }
  0xe5   :  { %7112 = vst [vmem:[#allocation29_spill] sm:$0xff] %v5176_v51  ;;  %v665_v53 = vmul.f32 %v5176_v51, %v278_v42  ;;  %v7131_v51 = vmov 0  }
  0xe6   :  { %4119 = vmatmul.mubr.msk.bf16.gmra.mxu0 %vm723_vm0, %v706_v49  ;;  %v285_v49 = vld [vmem:[%s6972_s0 + $0x198] sm:$0xff] }
  0xe7   :  { %v707_v1 = vpack.c.bf16 %v666_v52, %v665_v53  ;;  %v5187_v6 = vpop.permute.xlu1 %538  ;;  %v284_v52 = vld [vmem:[%s6972_s0 + $0x190] sm:$0xff] }
  0xe8   :  { %7113 = vst [vmem:[#allocation30_spill] sm:$0xff] %v5187_v6  ;;  %v5189_v11 = vpop.permute.xlu0 %533  ;;  %v668_v14 = vmul.f32 %v5187_v6, %v281_v60 }
  0xe9   :  { %7114 = vst [vmem:[#allocation31_spill] sm:$0xff] %v5189_v11  ;;  %v667_v21 = vmul.f32 %v5189_v11, %v280_v63  ;;  %4122 = vmatprep.mubr.msk.bf16.mxu0 %vm723_vm0, %v707_v1 }
  0xeb   :  { %v708_v24 = vpack.c.bf16 %v668_v14, %v667_v21  ;;  %v5200_v35 = vpop.permute.xlu1 %548  ;;  %v287_v21 = vld [vmem:[%s6972_s0 + $0x1a8] sm:$0xff] }
  0xec   :  { %7115 = vst [vmem:[#allocation32_spill] sm:$0xff] %v5200_v35  ;;  %v5202_v38 = vpop.permute.xlu0 %543  ;;  %v670_v39 = vmul.f32 %v5200_v35, %v283_v22  ;;  %v286_v22 = vld [vmem:[%s6972_s0 + $0x1a0] sm:$0xff] }
  0xed   :  { %7116 = vst [vmem:[#allocation33_spill] sm:$0xff] %v5202_v38  ;;  %v669_v42 = vmul.f32 %v5202_v38, %v282_v23 }
  0xee   :  { %4123 = vmatmul.mubr.msk.bf16.gmra.mxu0 %vm723_vm0, %v708_v24 }
  0xef   :  { %v709_v53 = vpack.c.bf16 %v670_v39, %v669_v42  ;;  %v5213_v60 = vpop.permute.xlu1 %558 }
  0xf0   :  { %7117 = vst [vmem:[#allocation34_spill] sm:$0xff] %v5213_v60  ;;  %v5215_v63 = vpop.permute.xlu0 %553  ;;  %v672_v1 = vmul.f32 %v5213_v60, %v285_v49 }
  0xf1   :  { %7118 = vst [vmem:[#allocation35_spill] sm:$0xff] %v5215_v63  ;;  %v671_v14 = vmul.f32 %v5215_v63, %v284_v52  ;;  %4126 = vmatprep.mubr.msk.bf16.mxu0 %vm723_vm0, %v709_v53  ;;  %v289_v52 = vld [vmem:[%s6972_s0 + $0x1b8] sm:$0xff]  ;;  %v288_v53 = vld [vmem:[%s6972_s0 + $0x1b0] sm:$0xff] }
  0xf3   :  { %v710_v23 = vpack.c.bf16 %v672_v1, %v671_v14  ;;  %v5226_v24 = vpop.permute.xlu1 %568 }
  0xf4   :  { %7119 = vst [vmem:[#allocation36_spill] sm:$0xff] %v5226_v24  ;;  %v5228_v39 = vpop.permute.xlu0 %563  ;;  %v674_v42 = vmul.f32 %v5226_v24, %v287_v21 }
  0xf5   :  { %7120 = vst [vmem:[#allocation37_spill] sm:$0xff] %v5228_v39  ;;  %v673_v49 = vmul.f32 %v5228_v39, %v286_v22  ;;  %v291_v22 = vld [vmem:[%s6972_s0 + $0x1c8] sm:$0xff] }
  0xf6   :  { %4127 = vmatmul.mubr.msk.bf16.gmra.mxu0 %vm723_vm0, %v710_v23  ;;  %v290_v23 = vld [vmem:[%s6972_s0 + $0x1c0] sm:$0xff] }
  0xf7   :  { %v711_v0 = vpack.c.bf16 %v674_v42, %v673_v49  ;;  %v5239_v1 = vpop.permute.xlu1 %578 }
  0xf8   :  { %7121 = vst [vmem:[#allocation38_spill] sm:$0xff] %v5239_v1  ;;  %v5241_v14 = vpop.permute.xlu0 %573  ;;  %v676_v60 = vmul.f32 %v5239_v1, %v289_v52 }
  0xf9   :  { %7122 = vst [vmem:[#allocation39_spill] sm:$0xff] %v5241_v14  ;;  %v675_v21 = vmul.f32 %v5241_v14, %v288_v53  ;;  %4130 = vmatprep.mubr.msk.bf16.mxu0 %vm723_vm0, %v711_v0  ;;  %v293_v0 = vld [vmem:[%s6972_s0 + $0x1d8] sm:$0xff]  ;;  %v292_v53 = vld [vmem:[%s6972_s0 + $0x1d0] sm:$0xff] }
  0xfb   :  { %v712_v24 = vpack.c.bf16 %v676_v60, %v675_v21  ;;  %v5252_v42 = vpop.permute.xlu1 %588 }
  0xfc   :  { %7123 = vst [vmem:[#allocation40_spill] sm:$0xff] %v5252_v42  ;;  %v5254_v49 = vpop.permute.xlu0 %583  ;;  %v678_v39 = vmul.f32 %v5252_v42, %v291_v22 }
  0xfd   :  { %7124 = vst [vmem:[#allocation41_spill] sm:$0xff] %v5254_v49  ;;  %v677_v52 = vmul.f32 %v5254_v49, %v290_v23  ;;  %v294_v23 = vld [vmem:[%s6972_s0 + $0x1e0] sm:$0xff] }
  0xfe   :  { %4131 = vmatmul.mubr.msk.bf16.gmra.mxu0 %vm723_vm0, %v712_v24  ;;  %v295_v24 = vld [vmem:[%s6972_s0 + $0x1e8] sm:$0xff] }
  0xff   :  { %v713_v1 = vpack.c.bf16 %v678_v39, %v677_v52  ;;  %v5265_v60 = vpop.permute.xlu1 %598 }
 0x100   :  { %7125 = vst [vmem:[#allocation42_spill] sm:$0xff] %v5265_v60  ;;  %v5267_v21 = vpop.permute.xlu0 %593  ;;  %v680_v14 = vmul.f32 %v5265_v60, %v293_v0 }
 0x101   :  { %7126 = vst [vmem:[#allocation43_spill] sm:$0xff] %v5267_v21  ;;  %v679_v22 = vmul.f32 %v5267_v21, %v292_v53  ;;  %4134 = vmatprep.mubr.msk.bf16.mxu0 %vm723_vm0, %v713_v1  ;;  %v297_v1 = vld [vmem:[%s6972_s0 + $0x1f8] sm:$0xff]  ;;  %v296_v53 = vld [vmem:[%s6972_s0 + $0x1f0] sm:$0xff] }
 0x103   :  { %v714_v42 = vpack.c.bf16 %v680_v14, %v679_v22  ;;  %v5278_v39 = vpop.permute.xlu1 %608 }
 0x104   :  { %7127 = vst [vmem:[#allocation44_spill] sm:$0xff] %v5278_v39  ;;  %v5280_v52 = vpop.permute.xlu0 %603  ;;  %v682_v49 = vmul.f32 %v5278_v39, %v295_v24 }
 0x105   :  { %7128 = vst [vmem:[#allocation45_spill] sm:$0xff] %v5280_v52  ;;  %v681_v0 = vmul.f32 %v5280_v52, %v294_v23  ;;  %v4266_v23 = vld [vmem:[%s6973_s1 + $0x4] ss:$16 sps:$4 sm:$0xff]  }
 0x106   :  { %4135 = vmatmul.mubr.msk.bf16.gmra.mxu0 %vm723_vm0, %v714_v42  ;;  %1813 = vmatprep.mubr.bf16.mxu1 %v4266_v23 }
 0x107   :  { %v715_v60 = vpack.c.bf16 %v682_v49, %v681_v0  ;;  %v5291_v14 = vpop.permute.xlu1 %618 }
 0x108   :  { %7129 = vst [vmem:[#allocation46_spill] sm:$0xff] %v5291_v14  ;;  %v5293_v22 = vpop.permute.xlu0 %613  ;;  %v684_v21 = vmul.f32 %v5291_v14, %v297_v1 }
 0x109   :  { %7130 = vst [vmem:[#allocation47_spill] sm:$0xff] %v5293_v22  ;;  %v683_v24 = vmul.f32 %v5293_v22, %v296_v53  ;;  %4138 = vmatprep.mubr.msk.bf16.mxu0 %vm723_vm0, %v715_v60 }
 0x10b   :  { %v716_v42 = vpack.c.bf16 %v684_v21, %v683_v24 }
 0x10e   :  { %4139 = vmatmul.mubr.msk.bf16.gmra.mxu0 %vm723_vm0, %v716_v42  ;;  %v4283_v42 = vld [vmem:[%s6973_s1 + $0xc] ss:$16 sps:$4 sm:$0xff]  }
 0x10f   :  { %2102 = vmatprep.mubr.bf16.mxu0 %v4283_v42 }
 0x156   :  { %v4080_v39 = vpop.f32.mrf.mxu0 }
 0x158   :  { %v854_v49 = vpop.f32.mrf.mxu0 }
 0x15a   :  { %v4081_v0 = vpop.f32.mrf.mxu0 }
 0x15c   :  { %v857_v52 = vpop.f32.mrf.mxu0 }
 0x15e   :  { %v4084_v63 = vpop.f32.mrf.mxu0 }
 0x160   :  { %v870_v35 = vpop.f32.mrf.mxu0 }
 0x162   :  { %v4085_v38 = vpop.f32.mrf.mxu0 }
 0x164   :  { %v873_v1 = vpop.f32.mrf.mxu0 }
 0x165   :  { %v1111_v59 = vpack.c.bf16 %v873_v1, %v870_v35 }
 0x166   :  { %v4088_v14 = vpop.f32.mrf.mxu0 }
 0x168   :  { %v886_v53 = vpop.f32.mrf.mxu0 }
 0x16a   :  { %v4089_v22 = vpop.f32.mrf.mxu0 }
 0x16b   :  { %v1114_v13 = vpack.c.bf16 %v4089_v22, %v4088_v14 }
 0x16c   :  { %v889_v60 = vpop.f32.mrf.mxu0 }
 0x16e   :  { %v4092_v21 = vpop.f32.mrf.mxu0 }
 0x170   :  { %v902_v24 = vpop.f32.mrf.mxu0 }
 0x172   :  { %v4093_v6 = vpop.f32.mrf.mxu0 }
 0x173   :  { %v1116_v23 = vpack.c.bf16 %v4093_v6, %v4092_v21  ;;  %v1113_v21 = vpack.c.bf16 %v889_v60, %v886_v53  ;;  %v1109_v60 = vpack.c.bf16 %v857_v52, %v854_v49 }
 0x174   :  { %v905_v11 = vpop.f32.mrf.mxu0 }
 0x175   :  { %1782 = vmatpush1.bf16.msra.mxu1 %v1116_v23  ;;  %v1115_v29 = vpack.c.bf16 %v905_v11, %v902_v24  ;;  %v1112_v11 = vpack.c.bf16 %v4085_v38, %v4084_v63 }
 0x176   :  { %v5305_v50 = vpop.f32.mrf.mxu0  ;;  %1783 = vmatprep.subr.bf16.mxu1 %v7131_v51 }
 0x178   :  { %v5308_v32 = vpop.f32.mrf.mxu0 }
 0x179   :  { %1784 = vmatpush1.bf16.msra.mxu1 %v1115_v29 }
 0x17a   :  { %v5310_v12 = vpop.f32.mrf.mxu0  ;;  %1785 = vmatprep.subr.bf16.mxu1 %v7131_v51 }
 0x17c   :  { %v5313_v58 = vpop.f32.mrf.mxu0 }
 0x17d   :  { %1786 = vmatpush1.bf16.msra.mxu1 %v1114_v13  ;;  %v1110_v13 = vpack.c.bf16 %v4081_v0, %v4080_v39 }
 0x17e   :  { %v4100_v6 = vpop.f32.mrf.mxu0  ;;  %1787 = vmatprep.subr.bf16.mxu1 %v7131_v51 }
 0x180   :  { %v934_v42 = vpop.f32.mrf.mxu0 }
 0x181   :  { %1788 = vmatpush1.bf16.msra.mxu1 %v1113_v21 }
 0x182   :  { %v4101_v23 = vpop.f32.mrf.mxu0  ;;  %1789 = vmatprep.subr.bf16.mxu1 %v7131_v51 }
 0x184   :  { %v937_v24 = vpop.f32.mrf.mxu0 }
 0x185   :  { %1790 = vmatpush1.bf16.msra.mxu1 %v1112_v11 }
 0x186   :  { %v4104_v29 = vpop.f32.mrf.mxu0  ;;  %1791 = vmatprep.subr.bf16.mxu1 %v7131_v51 }
 0x188   :  { %v950_v14 = vpop.f32.mrf.mxu0 }
 0x189   :  { %1792 = vmatpush1.bf16.msra.mxu1 %v1111_v59 }
 0x18a   :  { %v4105_v22 = vpop.f32.mrf.mxu0  ;;  %1793 = vmatprep.subr.bf16.mxu1 %v7131_v51 }
 0x18b   :  { %v1122_v52 = vpack.c.bf16 %v4105_v22, %v4104_v29  ;;  %v1119_v29 = vpack.c.bf16 %v937_v24, %v934_v42  ;;  %v4264_v42 = vld [vmem:[%s6973_s1] ss:$16 sps:$4 sm:$0xff]   ;;  %v4267_v24 = vld [vmem:[%s6973_s1 + $0x24] ss:$16 sps:$4 sm:$0xff]  }
 0x18c   :  { %v953_v43 = vpop.f32.mrf.mxu0 }
 0x18d   :  { %1794 = vmatpush1.bf16.msra.mxu1 %v1110_v13  ;;  %v1121_v13 = vpack.c.bf16 %v953_v43, %v950_v14  ;;  %v1118_v43 = vpack.c.bf16 %v5310_v12, %v5305_v50 }
 0x18e   :  { %v4108_v53 = vpop.f32.mrf.mxu0  ;;  %1795 = vmatprep.subr.bf16.mxu1 %v7131_v51 }
 0x190   :  { %v966_v21 = vpop.f32.mrf.mxu0 }
 0x191   :  { %1796 = vmatpush1.bf16.msra.mxu1 %v1109_v60 }
 0x192   :  { %v4109_v38 = vpop.f32.mrf.mxu0  ;;  %1797 = vmatprep.subr.bf16.mxu1 %v7131_v51 }
 0x193   :  { %v1124_v63 = vpack.c.bf16 %v4109_v38, %v4108_v53 }
 0x194   :  { %v969_v11 = vpop.f32.mrf.mxu0 }
 0x195   :  { %1798 = vmatpush2.bf16.msra.mxu1 %v1124_v63  ;;  %v1123_v59 = vpack.c.bf16 %v969_v11, %v966_v21  ;;  %v1120_v21 = vpack.c.bf16 %v4101_v23, %v4100_v6  ;;  %v1117_v6 = vpack.c.bf16 %v5313_v58, %v5308_v32 }
 0x196   :  { %v5321_v35 = vpop.f32.mrf.mxu0  ;;  %1799 = vmatprep.subr.bf16.mxu1 %v7131_v51 }
 0x198   :  { %v5324_v39 = vpop.f32.mrf.mxu0 }
 0x199   :  { %1800 = vmatpush2.bf16.msra.mxu1 %v1123_v59 }
 0x19a   :  { %v5326_v0 = vpop.f32.mrf.mxu0  ;;  %1801 = vmatprep.subr.bf16.mxu1 %v7131_v51 }
 0x19c   :  { %v5329_v49 = vpop.f32.mrf.mxu0 }
 0x19d   :  { %1802 = vmatpush2.bf16.msra.mxu1 %v1122_v52 }
 0x19e   :  { %v4116_v1 = vpop.f32.mrf.mxu0  ;;  %1803 = vmatprep.subr.bf16.mxu1 %v7131_v51 }
 0x1a0   :  { %v5332_v53 = vpop.f32.mrf.mxu0 }
 0x1a1   :  { %1804 = vmatpush2.bf16.msra.mxu1 %v1121_v13 }
 0x1a2   :  { %v4117_v60 = vpop.f32.mrf.mxu0  ;;  %1805 = vmatprep.subr.bf16.mxu1 %v7131_v51 }
 0x1a4   :  { %v1001_v38 = vpop.f32.mrf.mxu0 }
 0x1a5   :  { %1806 = vmatpush2.bf16.msra.mxu1 %v1120_v21  ;;  %v4269_v21 = vld [vmem:[%s6973_s1 + $0x20] ss:$16 sps:$4 sm:$0xff]  }
 0x1a6   :  { %v4120_v63 = vpop.f32.mrf.mxu0  ;;  %1807 = vmatprep.subr.bf16.mxu1 %v7131_v51 }
 0x1a8   :  { %v1014_v22 = vpop.f32.mrf.mxu0 }
 0x1a9   :  { %1808 = vmatpush2.bf16.msra.mxu1 %v1119_v29  ;;  %v4270_v29 = vld [vmem:[%s6973_s1 + $0x44] ss:$16 sps:$4 sm:$0xff]  }
 0x1aa   :  { %v4121_v11 = vpop.f32.mrf.mxu0  ;;  %1809 = vmatprep.subr.bf16.mxu1 %v7131_v51 }
 0x1ac   :  { %v1017_v14 = vpop.f32.mrf.mxu0 }
 0x1ad   :  { %1810 = vmatpush2.bf16.msra.mxu1 %v1118_v43 }
 0x1ae   :  { %v4124_v59 = vpop.f32.mrf.mxu0  ;;  %1811 = vmatprep.subr.bf16.mxu1 %v7131_v51 }
 0x1b0   :  { %v1030_v23 = vpop.f32.mrf.mxu0 }
 0x1b1   :  { %1812 = vmatpush2.bf16.msra.mxu1 %v1117_v6 }
 0x1b2   :  { %v4125_v52 = vpop.f32.mrf.mxu0 }
 0x1b3   :  { %v1132_v12 = vpack.c.bf16 %v4125_v52, %v4124_v59  ;;  %v1130_v59 = vpack.c.bf16 %v4121_v11, %v4120_v63  ;;  %v4272_v52 = vld [vmem:[%s6973_s1 + $0x40] ss:$16 sps:$4 sm:$0xff]   ;;  %v1128_v11 = vpack.c.bf16 %v4117_v60, %v4116_v1  ;;  %v1126_v60 = vpack.c.bf16 %v5326_v0, %v5321_v35  ;;  %v4279_v35 = vld [vmem:[%s6973_s1 + $0xa4] ss:$16 sps:$4 sm:$0xff]  }
 0x1b4   :  { %v1033_v50 = vpop.f32.mrf.mxu0  ;;  %1814 = vmatmul.mubr.bf16.vlgmr.msra.gmra.mxu1 %v4264_v42  ;;  %v1129_v42 = vpack.c.bf16 %v1017_v14, %v1014_v22  ;;  %v1127_v22 = vpack.c.bf16 %v1001_v38, %v5332_v53  ;;  %v1125_v38 = vpack.c.bf16 %v5329_v49, %v5324_v39  ;;  %v4284_v49 = vld [vmem:[%s6973_s1 + $0xa0] ss:$16 sps:$4 sm:$0xff]  }
 0x1b5   :  { %2071 = vmatpush1.bf16.msra.mxu0 %v1132_v12  ;;  %1821 = vmatprep.mubr.bf16.mxu1 %v4267_v24  ;;  %v1131_v58 = vpack.c.bf16 %v1033_v50, %v1030_v23  ;;  %v4273_v12 = vld [vmem:[%s6973_s1 + $0x64] ss:$16 sps:$4 sm:$0xff]  }
 0x1b6   :  { %v5348_v13 = vpop.f32.mrf.mxu0  ;;  %2072 = vmatprep.subr.bf16.mxu0 %v7131_v51 }
 0x1b8   :  { %v5351_v32 = vpop.f32.mrf.mxu0 }
 0x1b9   :  { %2073 = vmatpush1.bf16.msra.mxu0 %v1131_v58 }
 0x1ba   :  { %v5359_v43 = vpop.f32.mrf.mxu0  ;;  %2074 = vmatprep.subr.bf16.mxu0 %v7131_v51 }
 0x1bc   :  { %v5362_v6 = vpop.f32.mrf.mxu0  ;;  %1822 = vmatmul.mubr.bf16.gmra.mxu1 %v4269_v21  ;;  %v4275_v21 = vld [vmem:[%s6973_s1 + $0x60] ss:$16 sps:$4 sm:$0xff]  }
 0x1bd   :  { %2075 = vmatpush1.bf16.msra.mxu0 %v1130_v59  ;;  %1829 = vmatprep.mubr.bf16.mxu1 %v4270_v29  ;;  %v4276_v29 = vld [vmem:[%s6973_s1 + $0x84] ss:$16 sps:$4 sm:$0xff]  }
 0x1be   :  { %v4132_v23 = vpop.f32.mrf.mxu0  ;;  %2076 = vmatprep.subr.bf16.mxu0 %v7131_v51 }
 0x1c0   :  { %v1062_v24 = vpop.f32.mrf.mxu0 }
 0x1c1   :  { %2077 = vmatpush1.bf16.msra.mxu0 %v1129_v42 }
 0x1c2   :  { %v4133_v63 = vpop.f32.mrf.mxu0  ;;  %2078 = vmatprep.subr.bf16.mxu0 %v7131_v51 }
 0x1c4   :  { %v1065_v50 = vpop.f32.mrf.mxu0  ;;  %1830 = vmatmul.mubr.bf16.gmra.mxu1 %v4272_v52  ;;  %v4278_v52 = vld [vmem:[%s6973_s1 + $0x80] ss:$16 sps:$4 sm:$0xff]  }
 0x1c5   :  { %2079 = vmatpush1.bf16.msra.mxu0 %v1128_v11  ;;  %1837 = vmatprep.mubr.bf16.mxu1 %v4273_v12 }
 0x1c6   :  { %v4136_v58 = vpop.f32.mrf.mxu0  ;;  %2080 = vmatprep.subr.bf16.mxu0 %v7131_v51 }
 0x1c8   :  { %v1078_v14 = vpop.f32.mrf.mxu0 }
 0x1c9   :  { %2081 = vmatpush1.bf16.msra.mxu0 %v1127_v22  ;;  %v4285_v22 = vld [vmem:[%s6973_s1 + $0xc4] ss:$16 sps:$4 sm:$0xff]  }
 0x1ca   :  { %v4137_v1 = vpop.f32.mrf.mxu0  ;;  %2082 = vmatprep.subr.bf16.mxu0 %v7131_v51 }
 0x1cc   :  { %v1081_v59 = vpop.f32.mrf.mxu0  ;;  %1838 = vmatmul.mubr.bf16.gmra.mxu1 %v4275_v21  ;;  %v1138_v21 = vpack.c.bf16 %v4137_v1, %v4136_v58  ;;  %v1135_v58 = vpack.c.bf16 %v1065_v50, %v1062_v24  ;;  %v4297_v1 = vld [vmem:[%s6973_s1 + $0x104] ss:$16 sps:$4 sm:$0xff]   ;;  %v1133_v24 = vpack.c.bf16 %v5362_v6, %v5351_v32  ;;  %v4301_v50 = vld [vmem:[%s6973_s1 + $0x100] ss:$16 sps:$4 sm:$0xff]   ;;  %v4290_v32 = vld [vmem:[%s6973_s1 + $0x28] ss:$16 sps:$4 sm:$0xff]  }
 0x1cd   :  { %2083 = vmatpush1.bf16.msra.mxu0 %v1126_v60  ;;  %1845 = vmatprep.mubr.bf16.mxu1 %v4276_v29  ;;  %v1137_v29 = vpack.c.bf16 %v1081_v59, %v1078_v14  ;;  %v4289_v60 = vld [vmem:[%s6973_s1 + $0xc0] ss:$16 sps:$4 sm:$0xff]   ;;  %v4293_v59 = vld [vmem:[%s6973_s1 + $0x4c] ss:$16 sps:$4 sm:$0xff]  }
 0x1ce   :  { %v4140_v53 = vpop.f32.mrf.mxu0  ;;  %2084 = vmatprep.subr.bf16.mxu0 %v7131_v51  ;;  %v4295_v14 = vld [vmem:[%s6973_s1 + $0xe0] ss:$16 sps:$4 sm:$0xff]  }
 0x1cf   :  { %v4307_v6 = vld [vmem:[%s6973_s1 + $0x120] ss:$16 sps:$4 sm:$0xff]  }
 0x1d0   :  { %v1094_v42 = vpop.f32.mrf.mxu0 }
 0x1d1   :  { %2085 = vmatpush1.bf16.msra.mxu0 %v1125_v38  ;;  %v1136_v38 = vpack.c.bf16 %v4133_v63, %v4132_v23  ;;  %v1134_v23 = vpack.c.bf16 %v5359_v43, %v5348_v13  ;;  %v4281_v63 = vld [vmem:[%s6973_s1 + $0x8] ss:$16 sps:$4 sm:$0xff]   ;;  %v4287_v13 = vld [vmem:[%s6973_s1 + $0x2c] ss:$16 sps:$4 sm:$0xff]   ;;  %v4303_v43 = vld [vmem:[%s6973_s1 + $0x124] ss:$16 sps:$4 sm:$0xff]  }
 0x1d2   :  { %v4141_v0 = vpop.f32.mrf.mxu0  ;;  %2086 = vmatprep.subr.bf16.mxu0 %v7131_v51 }
 0x1d3   :  { %v1140_v12 = vpack.c.bf16 %v4141_v0, %v4140_v53  ;;  %v4291_v53 = vld [vmem:[%s6973_s1 + $0xe4] ss:$16 sps:$4 sm:$0xff]   ;;  %v4299_v0 = vld [vmem:[%s6973_s1 + $0x6c] ss:$16 sps:$4 sm:$0xff]  }
 0x1d4   :  { %v1097_v11 = vpop.f32.mrf.mxu0  ;;  %1846 = vmatmul.mubr.bf16.gmra.mxu1 %v4278_v52  ;;  %v4296_v52 = vld [vmem:[%s6973_s1 + $0x48] ss:$16 sps:$4 sm:$0xff]  }
 0x1d5   :  { %2087 = vmatpush2.bf16.msra.mxu0 %v1140_v12  ;;  %1853 = vmatprep.mubr.bf16.mxu1 %v4279_v35  ;;  %v1139_v39 = vpack.c.bf16 %v1097_v11, %v1094_v42  ;;  %v4309_v42 = vld [vmem:[%s6973_s1 + $0x144] ss:$16 sps:$4 sm:$0xff]   ;;  %v4313_v35 = vld [vmem:[%s6973_s1 + $0x140] ss:$16 sps:$4 sm:$0xff]   ;;  %v4302_v11 = vld [vmem:[%s6973_s1 + $0x68] ss:$16 sps:$4 sm:$0xff]  }
 0x1d6   :  { %2088 = vmatprep.subr.bf16.mxu0 %v7131_v51  ;;  %v4315_v12 = vld [vmem:[%s6973_s1 + $0x164] ss:$16 sps:$4 sm:$0xff]  }
 0x1d9   :  { %2089 = vmatpush2.bf16.msra.mxu0 %v1139_v39  ;;  %v4319_v39 = vld [vmem:[%s6973_s1 + $0x160] ss:$16 sps:$4 sm:$0xff]  }
 0x1da   :  { %2090 = vmatprep.subr.bf16.mxu0 %v7131_v51 }
 0x1dc   :  { %1854 = vmatmul.mubr.bf16.gmra.mxu1 %v4284_v49  ;;  %v4305_v49 = vld [vmem:[%s6973_s1 + $0x8c] ss:$16 sps:$4 sm:$0xff]  }
 0x1dd   :  { %2091 = vmatpush2.bf16.msra.mxu0 %v1138_v21  ;;  %1861 = vmatprep.mubr.bf16.mxu1 %v4285_v22  ;;  %v4321_v22 = vld [vmem:[%s6973_s1 + $0x184] ss:$16 sps:$4 sm:$0xff]   ;;  %v4308_v21 = vld [vmem:[%s6973_s1 + $0x88] ss:$16 sps:$4 sm:$0xff]  }
 0x1de   :  { %2092 = vmatprep.subr.bf16.mxu0 %v7131_v51 }
 0x1e1   :  { %2093 = vmatpush2.bf16.msra.mxu0 %v1137_v29  ;;  %v4325_v29 = vld [vmem:[%s6973_s1 + $0x180] ss:$16 sps:$4 sm:$0xff]  }
 0x1e2   :  { %2094 = vmatprep.subr.bf16.mxu0 %v7131_v51 }
 0x1e4   :  { %1862 = vmatmul.mubr.bf16.gmra.mxu1 %v4289_v60  ;;  %v4311_v60 = vld [vmem:[%s6973_s1 + $0xac] ss:$16 sps:$4 sm:$0xff]  }
 0x1e5   :  { %2095 = vmatpush2.bf16.msra.mxu0 %v1136_v38  ;;  %1869 = vmatprep.mubr.bf16.mxu1 %v4291_v53  ;;  %v4327_v53 = vld [vmem:[%s6973_s1 + $0x1a4] ss:$16 sps:$4 sm:$0xff]   ;;  %v4405_v38 = vld [vmem:[%s6977_s5 + $0x38] sm:$0xff]  }
 0x1e6   :  { %2096 = vmatprep.subr.bf16.mxu0 %v7131_v51  ;;  %4142 = vmatprep.subr.bf16.mxu1 %v4405_v38 }
 0x1e7   :  { %4143 = vmatpush3.bf16.msra.mxu1 %v4405_v38  ;;  %v4344_v38 = vld [vmem:[%s6973_s1 + $0x148] ss:$16 sps:$4 sm:$0xff]  }
 0x1e9   :  { %2097 = vmatpush2.bf16.msra.mxu0 %v1135_v58  ;;  %v4314_v58 = vld [vmem:[%s6973_s1 + $0xa8] ss:$16 sps:$4 sm:$0xff]  }
 0x1ea   :  { %2098 = vmatprep.subr.bf16.mxu0 %v7131_v51 }
 0x1ec   :  { %1870 = vmatmul.mubr.bf16.gmra.mxu1 %v4295_v14  ;;  %v4331_v14 = vld [vmem:[%s6973_s1 + $0x1a0] ss:$16 sps:$4 sm:$0xff]  }
 0x1ed   :  { %2099 = vmatpush2.bf16.msra.mxu0 %v1134_v23  ;;  %1877 = vmatprep.mubr.bf16.mxu1 %v4297_v1  ;;  %v4317_v1 = vld [vmem:[%s6973_s1 + $0xcc] ss:$16 sps:$4 sm:$0xff]   ;;  %v4333_v23 = vld [vmem:[%s6973_s1 + $0x1c4] ss:$16 sps:$4 sm:$0xff]  }
 0x1ee   :  { %2100 = vmatprep.subr.bf16.mxu0 %v7131_v51 }
 0x1f1   :  { %2101 = vmatpush2.bf16.msra.mxu0 %v1133_v24  ;;  %v4320_v24 = vld [vmem:[%s6973_s1 + $0xc8] ss:$16 sps:$4 sm:$0xff]  }
 0x1f2   :  { %3039 = vmatprep.subr.bf16.mxu0 %v7131_v51 }
 0x1f4   :  { %2103 = vmatmul.mubr.bf16.vlgmr.msra.gmra.mxu0 %v4281_v63  ;;  %1878 = vmatmul.mubr.bf16.gmra.mxu1 %v4301_v50  ;;  %v4337_v63 = vld [vmem:[%s6973_s1 + $0x1c0] ss:$16 sps:$4 sm:$0xff]   ;;  %v4323_v50 = vld [vmem:[%s6973_s1 + $0xec] ss:$16 sps:$4 sm:$0xff]  }
 0x1f5   :  { %2110 = vmatprep.mubr.bf16.mxu0 %v4287_v13  ;;  %1885 = vmatprep.mubr.bf16.mxu1 %v4303_v43  ;;  %v4339_v13 = vld [vmem:[%s6973_s1 + $0x1e4] ss:$16 sps:$4 sm:$0xff]   ;;  %v4326_v43 = vld [vmem:[%s6973_s1 + $0xe8] ss:$16 sps:$4 sm:$0xff]  }
 0x1fc   :  { %2111 = vmatmul.mubr.bf16.gmra.mxu0 %v4290_v32  ;;  %1886 = vmatmul.mubr.bf16.gmra.mxu1 %v4307_v6  ;;  %v4343_v32 = vld [vmem:[%s6973_s1 + $0x1e0] ss:$16 sps:$4 sm:$0xff]   ;;  %v4329_v6 = vld [vmem:[%s6973_s1 + $0x10c] ss:$16 sps:$4 sm:$0xff]  }
 0x1fd   :  { %2118 = vmatprep.mubr.bf16.mxu0 %v4293_v59  ;;  %1893 = vmatprep.mubr.bf16.mxu1 %v4309_v42  ;;  %v4345_v59 = vld [vmem:[%s6973_s1 + $0x204] ss:$16 sps:$4 sm:$0xff]  }
 0x1fe   :  { %v4424_v42 = vld [vmem:[%s6977_s5 + $0x30] sm:$0xff]  }
 0x1ff   :  { %4144 = vmatprep.subr.bf16.mxu1 %v4424_v42 }
 0x200   :  { %4145 = vmatpush3.bf16.msra.mxu1 %v4424_v42  ;;  %v4375_v42 = vld [vmem:[%s6973_s1 + $0x2a4] ss:$16 sps:$4 sm:$0xff]  }
 0x204   :  { %2119 = vmatmul.mubr.bf16.gmra.mxu0 %v4296_v52  ;;  %1894 = vmatmul.mubr.bf16.gmra.mxu1 %v4313_v35  ;;  %v4332_v52 = vld [vmem:[%s6973_s1 + $0x108] ss:$16 sps:$4 sm:$0xff]   ;;  %v4349_v35 = vld [vmem:[%s6973_s1 + $0x200] ss:$16 sps:$4 sm:$0xff]  }
 0x205   :  { %2126 = vmatprep.mubr.bf16.mxu0 %v4299_v0  ;;  %1901 = vmatprep.mubr.bf16.mxu1 %v4315_v12  ;;  %v4335_v0 = vld [vmem:[%s6973_s1 + $0x12c] ss:$16 sps:$4 sm:$0xff]   ;;  %v4351_v12 = vld [vmem:[%s6973_s1 + $0x224] ss:$16 sps:$4 sm:$0xff]  }
 0x20c   :  { %2127 = vmatmul.mubr.bf16.gmra.mxu0 %v4302_v11  ;;  %1902 = vmatmul.mubr.bf16.gmra.mxu1 %v4319_v39  ;;  %v4431_v11 = vld [vmem:[%s6977_s5 + $0x28] sm:$0xff]   ;;  %v4432_v39 = vld [vmem:[%s6977_s5 + $0x20] sm:$0xff]  }
 0x20d   :  { %2134 = vmatprep.mubr.bf16.mxu0 %v4305_v49  ;;  %1909 = vmatprep.mubr.bf16.mxu1 %v4321_v22  ;;  %v4338_v49 = vld [vmem:[%s6973_s1 + $0x128] ss:$16 sps:$4 sm:$0xff]   ;;  %v4356_v22 = vld [vmem:[%s6973_s1 + $0x220] ss:$16 sps:$4 sm:$0xff]  }
 0x20e   :  { %4146 = vmatprep.subr.bf16.mxu1 %v4431_v11 }
 0x20f   :  { %4147 = vmatpush3.bf16.msra.mxu1 %v4431_v11  ;;  %v4365_v11 = vld [vmem:[%s6973_s1 + $0x1c8] ss:$16 sps:$4 sm:$0xff]  }
 0x210   :  { %4148 = vmatprep.subr.bf16.mxu1 %v4432_v39 }
 0x213   :  { %4149 = vmatpush3.bf16.msra.mxu1 %v4432_v39  ;;  %v4386_v39 = vld [vmem:[%s6973_s1 + $0x2c0] ss:$16 sps:$4 sm:$0xff]  }
 0x214   :  { %2135 = vmatmul.mubr.bf16.gmra.mxu0 %v4308_v21  ;;  %1910 = vmatmul.mubr.bf16.gmra.mxu1 %v4325_v29  ;;  %v4341_v21 = vld [vmem:[%s6973_s1 + $0x14c] ss:$16 sps:$4 sm:$0xff]   ;;  %v4357_v29 = vld [vmem:[%s6973_s1 + $0x244] ss:$16 sps:$4 sm:$0xff]  }
 0x215   :  { %2142 = vmatprep.mubr.bf16.mxu0 %v4311_v60  ;;  %1917 = vmatprep.mubr.bf16.mxu1 %v4327_v53  ;;  %v4439_v60 = vld [vmem:[%s6977_s5 + $0x18] sm:$0xff]   ;;  %v4440_v53 = vld [vmem:[%s6977_s5 + $0x10] sm:$0xff]  }
 0x216   :  { %4150 = vmatprep.subr.bf16.mxu1 %v4439_v60 }
 0x217   :  { %4151 = vmatpush3.bf16.msra.mxu1 %v4439_v60  ;;  %v4379_v60 = vld [vmem:[%s6973_s1 + $0x20c] ss:$16 sps:$4 sm:$0xff]  }
 0x218   :  { %4152 = vmatprep.subr.bf16.mxu1 %v4440_v53 }
 0x21b   :  { %4153 = vmatpush3.bf16.msra.mxu1 %v4440_v53  ;;  %v4393_v53 = vld [vmem:[%s6973_s1 + $0x304] ss:$16 sps:$4 sm:$0xff]  }
 0x21c   :  { %2143 = vmatmul.mubr.bf16.gmra.mxu0 %v4314_v58  ;;  %1918 = vmatmul.mubr.bf16.gmra.mxu1 %v4331_v14  ;;  %v4362_v58 = vld [vmem:[%s6973_s1 + $0x240] ss:$16 sps:$4 sm:$0xff]   ;;  %v4347_v14 = vld [vmem:[%s6973_s1 + $0x16c] ss:$16 sps:$4 sm:$0xff]  }
 0x21d   :  { %2150 = vmatprep.mubr.bf16.mxu0 %v4317_v1  ;;  %1925 = vmatprep.mubr.bf16.mxu1 %v4333_v23  ;;  %v4363_v1 = vld [vmem:[%s6973_s1 + $0x264] ss:$16 sps:$4 sm:$0xff]   ;;  %v4447_v23 = vld [vmem:[%s6977_s5 + $0x8] sm:$0xff]  }
 0x21e   :  { %4154 = vmatprep.subr.bf16.mxu1 %v4447_v23 }
 0x21f   :  { %4155 = vmatpush3.bf16.msra.mxu1 %v4447_v23 }
 0x224   :  { %2151 = vmatmul.mubr.bf16.gmra.mxu0 %v4320_v24  ;;  %1926 = vmatmul.mubr.bf16.gmra.mxu1 %v4337_v63  ;;  %v4448_v24 = vld [vmem:[%s6977_s5] sm:$0xff]   ;;  %v4350_v63 = vld [vmem:[%s6973_s1 + $0x168] ss:$16 sps:$4 sm:$0xff]  }
 0x225   :  { %2158 = vmatprep.mubr.bf16.mxu0 %v4323_v50  ;;  %1933 = vmatprep.mubr.bf16.mxu1 %v4339_v13  ;;  %v4368_v50 = vld [vmem:[%s6973_s1 + $0x260] ss:$16 sps:$4 sm:$0xff]   ;;  %v4355_v13 = vld [vmem:[%s6973_s1 + $0x18c] ss:$16 sps:$4 sm:$0xff]  }
 0x226   :  { %4156 = vmatprep.subr.bf16.mxu1 %v4448_v24 }
 0x227   :  { %4157 = vmatpush3.bf16.msra.mxu1 %v4448_v24 }
 0x228   :  { %4222 = vmatprep.subr.bf16.mxu1 %v7131_v51 }
 0x22c   :  { %2159 = vmatmul.mubr.bf16.gmra.mxu0 %v4326_v43  ;;  %1934 = vmatmul.mubr.bf16.gmra.mxu1 %v4343_v32  ;;  %v4369_v43 = vld [vmem:[%s6973_s1 + $0x284] ss:$16 sps:$4 sm:$0xff]   ;;  %v4353_v32 = vld [vmem:[%s6973_s1 + $0x188] ss:$16 sps:$4 sm:$0xff]  }
 0x22d   :  { %2166 = vmatprep.mubr.bf16.mxu0 %v4329_v6  ;;  %1941 = vmatprep.mubr.bf16.mxu1 %v4345_v59  ;;  %v4374_v6 = vld [vmem:[%s6973_s1 + $0x280] ss:$16 sps:$4 sm:$0xff]   ;;  %v4361_v59 = vld [vmem:[%s6973_s1 + $0x1ac] ss:$16 sps:$4 sm:$0xff]  }
 0x234   :  { %2167 = vmatmul.mubr.bf16.gmra.mxu0 %v4332_v52  ;;  %1942 = vmatmul.mubr.bf16.gmra.mxu1 %v4349_v35  ;;  %v4359_v52 = vld [vmem:[%s6973_s1 + $0x1a8] ss:$16 sps:$4 sm:$0xff]   ;;  %v4380_v35 = vld [vmem:[%s6973_s1 + $0x2a0] ss:$16 sps:$4 sm:$0xff]  }
 0x235   :  { %2174 = vmatprep.mubr.bf16.mxu0 %v4335_v0  ;;  %1949 = vmatprep.mubr.bf16.mxu1 %v4351_v12  ;;  %v4367_v0 = vld [vmem:[%s6973_s1 + $0x1cc] ss:$16 sps:$4 sm:$0xff]   ;;  %v4381_v12 = vld [vmem:[%s6973_s1 + $0x2c4] ss:$16 sps:$4 sm:$0xff]  }
 0x23c   :  { %2175 = vmatmul.mubr.bf16.gmra.mxu0 %v4338_v49  ;;  %1950 = vmatmul.mubr.bf16.gmra.mxu1 %v4356_v22  ;;  %v4373_v49 = vld [vmem:[%s6973_s1 + $0x1ec] ss:$16 sps:$4 sm:$0xff]   ;;  %v4387_v22 = vld [vmem:[%s6973_s1 + $0x2e4] ss:$16 sps:$4 sm:$0xff]  }
 0x23d   :  { %2182 = vmatprep.mubr.bf16.mxu0 %v4341_v21  ;;  %1957 = vmatprep.mubr.bf16.mxu1 %v4357_v29  ;;  %v4371_v21 = vld [vmem:[%s6973_s1 + $0x1e8] ss:$16 sps:$4 sm:$0xff]   ;;  %v4392_v29 = vld [vmem:[%s6973_s1 + $0x2e0] ss:$16 sps:$4 sm:$0xff]  }
 0x244   :  { %2183 = vmatmul.mubr.bf16.gmra.mxu0 %v4344_v38  ;;  %1958 = vmatmul.mubr.bf16.gmra.mxu1 %v4362_v58  ;;  %v4377_v38 = vld [vmem:[%s6973_s1 + $0x208] ss:$16 sps:$4 sm:$0xff]   ;;  %v4398_v58 = vld [vmem:[%s6973_s1 + $0x300] ss:$16 sps:$4 sm:$0xff]  }
 0x245   :  { %2190 = vmatprep.mubr.bf16.mxu0 %v4347_v14  ;;  %1965 = vmatprep.mubr.bf16.mxu1 %v4363_v1  ;;  %v4385_v14 = vld [vmem:[%s6973_s1 + $0x22c] ss:$16 sps:$4 sm:$0xff]   ;;  %v4399_v1 = vld [vmem:[%s6973_s1 + $0x324] ss:$16 sps:$4 sm:$0xff]  }
 0x24c   :  { %2191 = vmatmul.mubr.bf16.gmra.mxu0 %v4350_v63  ;;  %1966 = vmatmul.mubr.bf16.gmra.mxu1 %v4368_v50  ;;  %v4383_v63 = vld [vmem:[%s6973_s1 + $0x228] ss:$16 sps:$4 sm:$0xff]  }
 0x24d   :  { %2198 = vmatprep.mubr.bf16.mxu0 %v4355_v13  ;;  %1973 = vmatprep.mubr.bf16.mxu1 %v4369_v43  ;;  %v4404_v13 = vld [vmem:[%s6973_s1 + $0x320] ss:$16 sps:$4 sm:$0xff]   ;;  %v4391_v43 = vld [vmem:[%s6973_s1 + $0x24c] ss:$16 sps:$4 sm:$0xff]  }
 0x254   :  { %2199 = vmatmul.mubr.bf16.gmra.mxu0 %v4353_v32  ;;  %1974 = vmatmul.mubr.bf16.gmra.mxu1 %v4374_v6  ;;  %v4406_v32 = vld [vmem:[%s6973_s1 + $0x344] ss:$16 sps:$4 sm:$0xff]  }
 0x255   :  { %2206 = vmatprep.mubr.bf16.mxu0 %v4361_v59  ;;  %1981 = vmatprep.mubr.bf16.mxu1 %v4375_v42 }
 0x25c   :  { %2207 = vmatmul.mubr.bf16.gmra.mxu0 %v4359_v52  ;;  %1982 = vmatmul.mubr.bf16.gmra.mxu1 %v4380_v35  ;;  %v4389_v52 = vld [vmem:[%s6973_s1 + $0x248] ss:$16 sps:$4 sm:$0xff]  }
 0x25d   :  { %2214 = vmatprep.mubr.bf16.mxu0 %v4367_v0  ;;  %1989 = vmatprep.mubr.bf16.mxu1 %v4381_v12  ;;  %v4411_v0 = vld [vmem:[%s6973_s1 + $0x340] ss:$16 sps:$4 sm:$0xff]   ;;  %v4397_v12 = vld [vmem:[%s6973_s1 + $0x26c] ss:$16 sps:$4 sm:$0xff]  }
 0x264   :  { %2215 = vmatmul.mubr.bf16.gmra.mxu0 %v4365_v11  ;;  %1990 = vmatmul.mubr.bf16.gmra.mxu1 %v4386_v39  ;;  %v4412_v11 = vld [vmem:[%s6973_s1 + $0x364] ss:$16 sps:$4 sm:$0xff]  }
 0x265   :  { %2222 = vmatprep.mubr.bf16.mxu0 %v4373_v49  ;;  %1997 = vmatprep.mubr.bf16.mxu1 %v4387_v22 }
 0x26c   :  { %2223 = vmatmul.mubr.bf16.gmra.mxu0 %v4371_v21  ;;  %1998 = vmatmul.mubr.bf16.gmra.mxu1 %v4392_v29  ;;  %v4395_v21 = vld [vmem:[%s6973_s1 + $0x268] ss:$16 sps:$4 sm:$0xff]  }
 0x26d   :  { %2230 = vmatprep.mubr.bf16.mxu0 %v4379_v60  ;;  %2005 = vmatprep.mubr.bf16.mxu1 %v4393_v53  ;;  %v4417_v60 = vld [vmem:[%s6973_s1 + $0x360] ss:$16 sps:$4 sm:$0xff]   ;;  %v4403_v53 = vld [vmem:[%s6973_s1 + $0x28c] ss:$16 sps:$4 sm:$0xff]  }
 0x274   :  { %2231 = vmatmul.mubr.bf16.gmra.mxu0 %v4377_v38  ;;  %2006 = vmatmul.mubr.bf16.gmra.mxu1 %v4398_v58  ;;  %v5652_v23 = vpop.f32.mrf.mxu1  ;;  %v4420_v38 = vld [vmem:[%s6973_s1 + $0x384] ss:$16 sps:$4 sm:$0xff]  }
 0x275   :  { %2238 = vmatprep.mubr.bf16.mxu0 %v4385_v14  ;;  %2013 = vmatprep.mubr.bf16.mxu1 %v4399_v1 }
 0x276   :  { %v1817_v24 = vpop.f32.mrf.mxu1 }
 0x277   :  { %v4401_v24 = vld [vmem:[%s6973_s1 + $0x288] ss:$16 sps:$4 sm:$0xff]  }
 0x278   :  { %v5657_v50 = vpop.f32.mrf.mxu1 }
 0x27a   :  { %v1820_v6 = vpop.f32.mrf.mxu1 }
 0x27c   :  { %2239 = vmatmul.mubr.bf16.gmra.mxu0 %v4383_v63  ;;  %2014 = vmatmul.mubr.bf16.gmra.mxu1 %v4404_v13  ;;  %v5668_v59 = vpop.f32.mrf.mxu1  ;;  %v4418_v13 = vld [vmem:[%s6973_s1 + $0x380] ss:$16 sps:$4 sm:$0xff]  }
 0x27d   :  { %2246 = vmatprep.mubr.bf16.mxu0 %v4391_v43  ;;  %2021 = vmatprep.mubr.bf16.mxu1 %v4406_v32  ;;  %v4410_v43 = vld [vmem:[%s6973_s1 + $0x2ac] ss:$16 sps:$4 sm:$0xff]   ;;  %v4427_v32 = vld [vmem:[%s6973_s1 + $0x3a4] ss:$16 sps:$4 sm:$0xff]  }
 0x27e   :  { %v1825_v42 = vpop.f32.mrf.mxu1 }
 0x280   :  { %v5673_v35 = vpop.f32.mrf.mxu1 }
 0x282   :  { %v1828_v39 = vpop.f32.mrf.mxu1 }
 0x283   :  { %v4416_v39 = vld [vmem:[%s6973_s1 + $0x2cc] ss:$16 sps:$4 sm:$0xff]  }
 0x284   :  { %2247 = vmatmul.mubr.bf16.gmra.mxu0 %v4389_v52  ;;  %2022 = vmatmul.mubr.bf16.gmra.mxu1 %v4411_v0  ;;  %v5684_v49 = vpop.f32.mrf.mxu1  ;;  %v4408_v0 = vld [vmem:[%s6973_s1 + $0x2a8] ss:$16 sps:$4 sm:$0xff]  }
 0x285   :  { %2254 = vmatprep.mubr.bf16.mxu0 %v4397_v12  ;;  %2029 = vmatprep.mubr.bf16.mxu1 %v4412_v11  ;;  %v4425_v11 = vld [vmem:[%s6973_s1 + $0x3a0] ss:$16 sps:$4 sm:$0xff]  }
 0x286   :  { %v1833_v22 = vpop.f32.mrf.mxu1 }
 0x287   :  { %v4435_v22 = vld [vmem:[%s6973_s1 + $0x3c4] ss:$16 sps:$4 sm:$0xff]  }
 0x288   :  { %v5689_v29 = vpop.f32.mrf.mxu1 }
 0x28a   :  { %v1836_v58 = vpop.f32.mrf.mxu1 }
 0x28c   :  { %2255 = vmatmul.mubr.bf16.gmra.mxu0 %v4395_v21  ;;  %2030 = vmatmul.mubr.bf16.gmra.mxu1 %v4417_v60  ;;  %v5700_v14 = vpop.f32.mrf.mxu1 }
 0x28d   :  { %2262 = vmatprep.mubr.bf16.mxu0 %v4403_v53  ;;  %2037 = vmatprep.mubr.bf16.mxu1 %v4420_v38  ;;  %v4414_v38 = vld [vmem:[%s6973_s1 + $0x2c8] ss:$16 sps:$4 sm:$0xff]  }
 0x28e   :  { %v1841_v1 = vpop.f32.mrf.mxu1 }
 0x28f   :  { %v4433_v1 = vld [vmem:[%s6973_s1 + $0x3c0] ss:$16 sps:$4 sm:$0xff]  }
 0x290   :  { %v5705_v63 = vpop.f32.mrf.mxu1 }
 0x292   :  { %v1844_v6 = vpop.f32.mrf.mxu1 }
 0x294   :  { %2263 = vmatmul.mubr.bf16.gmra.mxu0 %v4401_v24  ;;  %2038 = vmatmul.mubr.bf16.gmra.mxu1 %v4418_v13  ;;  %v5716_v42 = vpop.f32.mrf.mxu1  ;;  %v4423_v24 = vld [vmem:[%s6973_s1 + $0x2ec] ss:$16 sps:$4 sm:$0xff]   ;;  %v4443_v13 = vld [vmem:[%s6973_s1 + $0x3e4] ss:$16 sps:$4 sm:$0xff]  }
 0x295   :  { %2270 = vmatprep.mubr.bf16.mxu0 %v4410_v43  ;;  %2045 = vmatprep.mubr.bf16.mxu1 %v4427_v32 }
 0x296   :  { %v1849_v52 = vpop.f32.mrf.mxu1 }
 0x297   :  { %v4421_v52 = vld [vmem:[%s6973_s1 + $0x2e8] ss:$16 sps:$4 sm:$0xff]  }
 0x298   :  { %v5721_v12 = vpop.f32.mrf.mxu1 }
 0x29a   :  { %v1852_v21 = vpop.f32.mrf.mxu1 }
 0x29c   :  { %2271 = vmatmul.mubr.bf16.gmra.mxu0 %v4408_v0  ;;  %2046 = vmatmul.mubr.bf16.gmra.mxu1 %v4425_v11  ;;  %v5732_v60 = vpop.f32.mrf.mxu1  ;;  %v4441_v11 = vld [vmem:[%s6973_s1 + $0x3e0] ss:$16 sps:$4 sm:$0xff]  }
 0x29d   :  { %2278 = vmatprep.mubr.bf16.mxu0 %v4416_v39  ;;  %2053 = vmatprep.mubr.bf16.mxu1 %v4435_v22  ;;  %v4430_v39 = vld [vmem:[%s6973_s1 + $0x30c] ss:$16 sps:$4 sm:$0xff]  }
 0x29e   :  { %v1857_v53 = vpop.f32.mrf.mxu1 }
 0x2a0   :  { %v5737_v58 = vpop.f32.mrf.mxu1 }
 0x2a2   :  { %v1860_v43 = vpop.f32.mrf.mxu1 }
 0x2a4   :  { %2279 = vmatmul.mubr.bf16.gmra.mxu0 %v4414_v38  ;;  %2054 = vmatmul.mubr.bf16.gmra.mxu1 %v4433_v1  ;;  %v5748_v32 = vpop.f32.mrf.mxu1  ;;  %v4428_v38 = vld [vmem:[%s6973_s1 + $0x308] ss:$16 sps:$4 sm:$0xff]  }
 0x2a5   :  { %2286 = vmatprep.mubr.bf16.mxu0 %v4423_v24  ;;  %2061 = vmatprep.mubr.bf16.mxu1 %v4443_v13  ;;  %v4438_v24 = vld [vmem:[%s6973_s1 + $0x32c] ss:$16 sps:$4 sm:$0xff]  }
 0x2a6   :  { %v1865_v6 = vpop.f32.mrf.mxu1 }
 0x2a8   :  { %v5753_v0 = vpop.f32.mrf.mxu1 }
 0x2aa   :  { %v1868_v22 = vpop.f32.mrf.mxu1 }
 0x2ac   :  { %2287 = vmatmul.mubr.bf16.gmra.mxu0 %v4421_v52  ;;  %2062 = vmatmul.mubr.bf16.gmra.mxu1 %v4441_v11  ;;  %v5761_v21 = vpop.f32.mrf.mxu1  ;;  %v5777_v11 = vld [vmem:[%s6976_s4] ss:$0 sm:$0xff] }
 0x2ad   :  { %2294 = vmatprep.mubr.bf16.mxu0 %v4430_v39 }
 0x2ae   :  { %v1873_v53 = vpop.f32.mrf.mxu1 }
 0x2b0   :  { %v5766_v1 = vpop.f32.mrf.mxu1 }
 0x2b2   :  { %v1876_v13 = vpop.f32.mrf.mxu1 }
 0x2b3   :  { %v4436_v13 = vld [vmem:[%s6973_s1 + $0x328] ss:$16 sps:$4 sm:$0xff]  }
 0x2b4   :  { %v2104_v43 = vpop.f32.mrf.mxu0  ;;  %2295 = vmatmul.mubr.bf16.gmra.mxu0 %v4428_v38  ;;  %v5771_v6 = vpop.f32.mrf.mxu1 }
 0x2b5   :  { %v2105_v52 = vadd.f32 %v2104_v43, %v5652_v23  ;;  %2302 = vmatprep.mubr.bf16.mxu0 %v4438_v24  ;;  %v4446_v24 = vld [vmem:[%s6973_s1 + $0x34c] ss:$16 sps:$4 sm:$0xff]  }
 0x2b6   :  { %v2106_v39 = vpop.f32.mrf.mxu0  ;;  %v1881_v22 = vpop.f32.mrf.mxu1 }
 0x2b7   :  { %v2359_v53 = vmul.f32 %v2105_v52, %v4885_v4 }
 0x2b8   :  { %v2107_v51 = vpop.f32.mrf.mxu0  ;;  %v5783_v38 = vpop.f32.mrf.mxu1 }
 0x2b9   :  { %v2429_v44 = vadd.f32 %v5777_v11, %v2359_v53  ;;  %v2108_v23 = vadd.f32 %v2107_v51, %v5657_v50 }
 0x2ba   :  { %v2109_v43 = vpop.f32.mrf.mxu0  ;;  %v1884_v39 = vpop.f32.mrf.mxu1 }
 0x2bb   :  { %v2360_v22 = vmul.f32 %v2108_v23, %v4901_v10  ;;  %v2493_v31 = vmax.f32 %v2429_v44, 0.0  ;;  %v4444_v23 = vld [vmem:[%s6973_s1 + $0x348] ss:$16 sps:$4 sm:$0xff]  }
 0x2bc   :  { %v2112_v52 = vpop.f32.mrf.mxu0  ;;  %2303 = vmatmul.mubr.bf16.gmra.mxu0 %v4436_v13  ;;  %v5791_v30 = vpop.f32.mrf.mxu1 }
 0x2bd   :  { %v2430_v15 = vadd.f32 %v5777_v11, %v2360_v22  ;;  %v2113_v18 = vadd.f32 %v2112_v52, %v5668_v59  ;;  %2310 = vmatprep.mubr.bf16.mxu0 %v4446_v24  ;;  %v2574_v39 = vmul.f32 %v2493_v31, %v4885_v4 }
 0x2be   :  { %v2114_v53 = vpop.f32.mrf.mxu0  ;;  %v1889_v51 = vpop.f32.mrf.mxu1 }
 0x2bf   :  { %v2494_v50 = vmax.f32 %v2430_v15, 0.0  ;;  %v2361_v2 = vmul.f32 %v2113_v18, %v4883_v3  ;;  %v4451_v15 = vld [vmem:[%s6973_s1 + $0x36c] ss:$16 sps:$4 sm:$0xff]  }
 0x2c0   :  { %v2115_v5 = vpop.f32.mrf.mxu0  ;;  %v5799_v43 = vpop.f32.mrf.mxu1 }
 0x2c1   :  { %v2431_v13 = vadd.f32 %v5777_v11, %v2361_v2  ;;  %v2116_v44 = vadd.f32 %v2115_v5, %v5673_v35  ;;  %v2575_v59 = vmul.f32 %v2494_v50, %v4901_v10 }
 0x2c2   :  { %v2117_v18 = vpop.f32.mrf.mxu0  ;;  %v1892_v24 = vpop.f32.mrf.mxu1 }
 0x2c3   :  { %v2362_v22 = vmul.f32 %v2116_v44, %v4899_v9  ;;  %v2638_v52 = vpack.c.bf16 %v2575_v59, %v2574_v39  ;;  %v2495_v2 = vmax.f32 %v2431_v13, 0.0  ;;  %v4449_v44 = vld [vmem:[%s6973_s1 + $0x368] ss:$16 sps:$4 sm:$0xff]  }
 0x2c4   :  { %v2120_v53 = vpop.f32.mrf.mxu0  ;;  %2311 = vmatmul.mubr.bf16.gmra.mxu0 %v4444_v23  ;;  %v5809_v51 = vpop.f32.mrf.mxu1 }
 0x2c5   :  { %v2432_v5 = vadd.f32 %v5777_v11, %v2362_v22  ;;  %v2121_v31 = vadd.f32 %v2120_v53, %v5684_v49  ;;  %4158 = vmatprep.mubr.bf16.mxu1 %v2638_v52  ;;  %2318 = vmatprep.mubr.bf16.mxu0 %v4451_v15  ;;  %v2576_v13 = vmul.f32 %v2495_v2, %v4883_v3  ;;  %v4454_v15 = vld [vmem:[%s6973_s1 + $0x38c] ss:$16 sps:$4 sm:$0xff]  }
 0x2c6   :  { %v2122_v35 = vpop.f32.mrf.mxu0  ;;  %v1897_v50 = vpop.f32.mrf.mxu1 }
 0x2c7   :  { %v2496_v10 = vmax.f32 %v2432_v5, 0.0  ;;  %v2363_v18 = vmul.f32 %v2121_v31, %v4915_v20 }
 0x2c8   :  { %v2123_v24 = vpop.f32.mrf.mxu0  ;;  %v5817_v23 = vpop.f32.mrf.mxu1 }
 0x2c9   :  { %v2577_v39 = vmul.f32 %v2496_v10, %v4899_v9  ;;  %v2433_v49 = vadd.f32 %v5777_v11, %v2363_v18  ;;  %v2124_v59 = vadd.f32 %v2123_v24, %v5689_v29 }
 0x2ca   :  { %v2125_v22 = vpop.f32.mrf.mxu0  ;;  %v1900_v52 = vpop.f32.mrf.mxu1 }
 0x2cb   :  { %v2639_v53 = vpack.c.bf16 %v2577_v39, %v2576_v13  ;;  %v2364_v5 = vmul.f32 %v2124_v59, %v4913_v19  ;;  %v2497_v2 = vmax.f32 %v2433_v49, 0.0  ;;  %v4452_v13 = vld [vmem:[%s6973_s1 + $0x388] ss:$16 sps:$4 sm:$0xff]  }
 0x2cc   :  { %v2128_v31 = vpop.f32.mrf.mxu0  ;;  %2319 = vmatmul.mubr.bf16.gmra.mxu0 %v4449_v44  ;;  %v5827_v35 = vpop.f32.mrf.mxu1 }
 0x2cd   :  { %v2434_v10 = vadd.f32 %v5777_v11, %v2364_v5  ;;  %v2129_v50 = vadd.f32 %v2128_v31, %v5700_v14  ;;  %4159 = vmatmul.mubr.bf16.vlgmr.msra.gmra.mxu1 %v2639_v53  ;;  %2326 = vmatprep.mubr.bf16.mxu0 %v4454_v15  ;;  %v2578_v14 = vmul.f32 %v2497_v2, %v4915_v20  ;;  %v4457_v15 = vld [vmem:[%s6973_s1 + $0x3ac] ss:$16 sps:$4 sm:$0xff]  }
 0x2ce   :  { %v2130_v29 = vpop.f32.mrf.mxu0  ;;  %v1905_v18 = vpop.f32.mrf.mxu1 }
 0x2cf   :  { %v2498_v24 = vmax.f32 %v2434_v10, 0.0  ;;  %v2365_v22 = vmul.f32 %v2129_v50, %v4929_v27 }
 0x2d0   :  { %v2131_v52 = vpop.f32.mrf.mxu0  ;;  %v5835_v44 = vpop.f32.mrf.mxu1 }
 0x2d1   :  { %v2435_v39 = vadd.f32 %v5777_v11, %v2365_v22  ;;  %v2132_v49 = vadd.f32 %v2131_v52, %v5705_v63  ;;  %v2579_v59 = vmul.f32 %v2498_v24, %v4913_v19 }
 0x2d2   :  { %v2133_v53 = vpop.f32.mrf.mxu0  ;;  %v1908_v5 = vpop.f32.mrf.mxu1 }
 0x2d3   :  { %v2366_v31 = vmul.f32 %v2132_v49, %v4927_v26  ;;  %v2640_v10 = vpack.c.bf16 %v2579_v59, %v2578_v14  ;;  %v2499_v18 = vmax.f32 %v2435_v39, 0.0  ;;  %v4455_v49 = vld [vmem:[%s6973_s1 + $0x3a8] ss:$16 sps:$4 sm:$0xff]  }
 0x2d4   :  { %v2136_v50 = vpop.f32.mrf.mxu0  ;;  %2327 = vmatmul.mubr.bf16.gmra.mxu0 %v4452_v13  ;;  %v5845_v29 = vpop.f32.mrf.mxu1 }
 0x2d5   :  { %v2436_v63 = vadd.f32 %v5777_v11, %v2366_v31  ;;  %v2137_v2 = vadd.f32 %v2136_v50, %v5716_v42  ;;  %4162 = vmatprep.mubr.bf16.mxu1 %v2640_v10  ;;  %2334 = vmatprep.mubr.bf16.mxu0 %v4457_v15  ;;  %v2580_v39 = vmul.f32 %v2499_v18, %v4929_v27  ;;  %v4460_v15 = vld [vmem:[%s6973_s1 + $0x3cc] ss:$16 sps:$4 sm:$0xff]  }
 0x2d6   :  { %v2138_v24 = vpop.f32.mrf.mxu0  ;;  %v1913_v22 = vpop.f32.mrf.mxu1 }
 0x2d7   :  { %v2500_v52 = vmax.f32 %v2436_v63, 0.0  ;;  %v2367_v53 = vmul.f32 %v2137_v2, %v4942_v34 }
 0x2d8   :  { %v2139_v5 = vpop.f32.mrf.mxu0  ;;  %v5853_v13 = vpop.f32.mrf.mxu1 }
 0x2d9   :  { %v2581_v14 = vmul.f32 %v2500_v52, %v4927_v26  ;;  %v2437_v42 = vadd.f32 %v5777_v11, %v2367_v53  ;;  %v2140_v59 = vadd.f32 %v2139_v5, %v5721_v12 }
 0x2da   :  { %v2141_v31 = vpop.f32.mrf.mxu0  ;;  %v1916_v10 = vpop.f32.mrf.mxu1 }
 0x2db   :  { %v2368_v50 = vmul.f32 %v2140_v59, %v4940_v33  ;;  %v2641_v63 = vpack.c.bf16 %v2581_v14, %v2580_v39  ;;  %v2501_v18 = vmax.f32 %v2437_v42, 0.0  ;;  %v4458_v39 = vld [vmem:[%s6973_s1 + $0x3c8] ss:$16 sps:$4 sm:$0xff]  }
 0x2dc   :  { %v2144_v2 = vpop.f32.mrf.mxu0  ;;  %2335 = vmatmul.mubr.bf16.gmra.mxu0 %v4455_v49  ;;  %v5863_v24 = vpop.f32.mrf.mxu1 }
 0x2dd   :  { %v2438_v22 = vadd.f32 %v5777_v11, %v2368_v50  ;;  %v2145_v52 = vadd.f32 %v2144_v2, %v5732_v60  ;;  %4163 = vmatmul.mubr.bf16.gmra.mxu1 %v2641_v63  ;;  %2342 = vmatprep.mubr.bf16.mxu0 %v4460_v15  ;;  %v2582_v60 = vmul.f32 %v2501_v18, %v4942_v34  ;;  %v4463_v15 = vld [vmem:[%s6973_s1 + $0x3ec] ss:$16 sps:$4 sm:$0xff]  }
 0x2de   :  { %v2146_v12 = vpop.f32.mrf.mxu0  ;;  %v1921_v53 = vpop.f32.mrf.mxu1 }
 0x2df   :  { %v2502_v5 = vmax.f32 %v2438_v22, 0.0  ;;  %v2369_v31 = vmul.f32 %v2145_v52, %v4955_v41 }
 0x2e0   :  { %v2147_v10 = vpop.f32.mrf.mxu0  ;;  %v5871_v49 = vpop.f32.mrf.mxu1 }
 0x2e1   :  { %v2439_v14 = vadd.f32 %v5777_v11, %v2369_v31  ;;  %v2148_v42 = vadd.f32 %v2147_v10, %v5737_v58  ;;  %v2583_v59 = vmul.f32 %v2502_v5, %v4940_v33 }
 0x2e2   :  { %v2149_v50 = vpop.f32.mrf.mxu0  ;;  %v1924_v63 = vpop.f32.mrf.mxu1 }
 0x2e3   :  { %v2370_v2 = vmul.f32 %v2148_v42, %v4953_v40  ;;  %v2642_v22 = vpack.c.bf16 %v2583_v59, %v2582_v60  ;;  %v2503_v53 = vmax.f32 %v2439_v14, 0.0  ;;  %v4461_v42 = vld [vmem:[%s6973_s1 + $0x3e8] ss:$16 sps:$4 sm:$0xff]  }
 0x2e4   :  { %v2152_v52 = vpop.f32.mrf.mxu0  ;;  %2343 = vmatmul.mubr.bf16.gmra.mxu0 %v4458_v39  ;;  %v5881_v12 = vpop.f32.mrf.mxu1 }
 0x2e5   :  { %v2440_v58 = vadd.f32 %v5777_v11, %v2370_v2  ;;  %v2153_v18 = vadd.f32 %v2152_v52, %v5748_v32  ;;  %4166 = vmatprep.mubr.bf16.mxu1 %v2642_v22  ;;  %2350 = vmatprep.mubr.bf16.mxu0 %v4463_v15  ;;  %v2584_v14 = vmul.f32 %v2503_v53, %v4955_v41 }
 0x2e6   :  { %v2154_v5 = vpop.f32.mrf.mxu0  ;;  %v1929_v31 = vpop.f32.mrf.mxu1 }
 0x2e7   :  { %v2504_v10 = vmax.f32 %v2440_v58, 0.0  ;;  %v2371_v50 = vmul.f32 %v2153_v18, %v4968_v48 }
 0x2e8   :  { %v2155_v63 = vpop.f32.mrf.mxu0  ;;  %v5889_v39 = vpop.f32.mrf.mxu1 }
 0x2e9   :  { %v2585_v60 = vmul.f32 %v2504_v10, %v4953_v40  ;;  %v2441_v32 = vadd.f32 %v5777_v11, %v2371_v50  ;;  %v2156_v59 = vadd.f32 %v2155_v63, %v5753_v0  ;;  %v4464_v10 = vld [vmem:[%s6973_s1 + $0x4] ss:$16 sps:$4 sm:$0xff]  }
 0x2ea   :  { %v2157_v15 = vpop.f32.mrf.mxu0  ;;  %v1932_v2 = vpop.f32.mrf.mxu1 }
 0x2eb   :  { %v2372_v22 = vmul.f32 %v2156_v59, %v4966_v47  ;;  %v2643_v52 = vpack.c.bf16 %v2585_v60, %v2584_v14  ;;  %v2505_v5 = vmax.f32 %v2441_v32, 0.0 }
 0x2ec   :  { %v2160_v58 = vpop.f32.mrf.mxu0  ;;  %2351 = vmatmul.mubr.bf16.gmra.mxu0 %v4461_v42  ;;  %v5896_v18 = vpop.f32.mrf.mxu1 }
 0x2ed   :  { %v2442_v31 = vadd.f32 %v5777_v11, %v2372_v22  ;;  %v2161_v53 = vadd.f32 %v2160_v58, %v5761_v21  ;;  %4167 = vmatmul.mubr.bf16.gmra.mxu1 %v2643_v52  ;;  %3071 = vmatprep.mubr.bf16.mxu0 %v4464_v10  ;;  %v2586_v21 = vmul.f32 %v2505_v5, %v4968_v48 }
 0x2ee   :  { %v2162_v0 = vpop.f32.mrf.mxu0  ;;  %v1937_v50 = vpop.f32.mrf.mxu1 }
 0x2ef   :  { %v2506_v63 = vmax.f32 %v2442_v31, 0.0  ;;  %v2373_v14 = vmul.f32 %v2161_v53, %v4981_v55 }
 0x2f0   :  { %v2163_v60 = vpop.f32.mrf.mxu0  ;;  %v5904_v42 = vpop.f32.mrf.mxu1 }
 0x2f1   :  { %v2443_v32 = vadd.f32 %v5777_v11, %v2373_v14  ;;  %v2164_v59 = vadd.f32 %v2163_v60, %v5766_v1  ;;  %v2587_v15 = vmul.f32 %v2506_v63, %v4966_v47 }
 0x2f2   :  { %v2165_v2 = vpop.f32.mrf.mxu0  ;;  %v1940_v22 = vpop.f32.mrf.mxu1 }
 0x2f3   :  { %v2374_v52 = vmul.f32 %v2164_v59, %v4979_v54  ;;  %v2644_v58 = vpack.c.bf16 %v2587_v15, %v2586_v21  ;;  %v2507_v53 = vmax.f32 %v2443_v32, 0.0 }
 0x2f4   :  { %v2168_v10 = vpop.f32.mrf.mxu0  ;;  %v5911_v31 = vpop.f32.mrf.mxu1 }
 0x2f5   :  { %v2444_v0 = vadd.f32 %v5777_v11, %v2374_v52  ;;  %v2169_v50 = vadd.f32 %v2168_v10, %v5771_v6  ;;  %4170 = vmatprep.mubr.bf16.mxu1 %v2644_v58  ;;  %v2588_v59 = vmul.f32 %v2507_v53, %v4981_v55 }
 0x2f6   :  { %v2170_v14 = vpop.f32.mrf.mxu0  ;;  %v1945_v1 = vpop.f32.mrf.mxu1 }
 0x2f7   :  { %v2508_v60 = vmax.f32 %v2444_v0, 0.0  ;;  %v2375_v5 = vmul.f32 %v2169_v50, %v4994_v62 }
 0x2f8   :  { %v2171_v63 = vpop.f32.mrf.mxu0  ;;  %v5916_v2 = vpop.f32.mrf.mxu1 }
 0x2f9   :  { %v2589_v21 = vmul.f32 %v2508_v60, %v4979_v54  ;;  %v2445_v15 = vadd.f32 %v5777_v11, %v2375_v5  ;;  %v2172_v32 = vadd.f32 %v2171_v63, %v5783_v38 }
 0x2fa   :  { %v2173_v22 = vpop.f32.mrf.mxu0  ;;  %v1948_v52 = vpop.f32.mrf.mxu1 }
 0x2fb   :  { %v2376_v6 = vmul.f32 %v2172_v32, %v4992_v61  ;;  %v2645_v58 = vpack.c.bf16 %v2589_v21, %v2588_v59  ;;  %v2509_v50 = vmax.f32 %v2445_v15, 0.0 }
 0x2fc   :  { %v2176_v10 = vpop.f32.mrf.mxu0  ;;  %v5923_v0 = vpop.f32.mrf.mxu1 }
 0x2fd   :  { %v2446_v14 = vadd.f32 %v5777_v11, %v2376_v6  ;;  %v2177_v1 = vadd.f32 %v2176_v10, %v5791_v30  ;;  %4171 = vmatmul.mubr.bf16.gmra.mxu1 %v2645_v58  ;;  %v2590_v21 = vmul.f32 %v2509_v50, %v4994_v62 }
 0x2fe   :  { %v2178_v53 = vpop.f32.mrf.mxu0  ;;  %v1953_v60 = vpop.f32.mrf.mxu1 }
 0x2ff   :  { %v2510_v19 = vmax.f32 %v2446_v14, 0.0  ;;  %v2377_v5 = vmul.f32 %v2177_v1, %v5007_v8 }
 0x300   :  { %v2179_v38 = vpop.f32.mrf.mxu0  ;;  %v5928_v63 = vpop.f32.mrf.mxu1 }
 0x301   :  { %v2447_v32 = vadd.f32 %v5777_v11, %v2377_v5  ;;  %v2180_v59 = vadd.f32 %v2179_v38, %v5799_v43  ;;  %v2591_v15 = vmul.f32 %v2510_v19, %v4992_v61 }
 0x302   :  { %v2181_v22 = vpop.f32.mrf.mxu0  ;;  %v1956_v52 = vpop.f32.mrf.mxu1 }
 0x303   :  { %v2378_v30 = vmul.f32 %v2180_v59, %v5005_v7  ;;  %v2646_v6 = vpack.c.bf16 %v2591_v15, %v2590_v21  ;;  %v2511_v14 = vmax.f32 %v2447_v32, 0.0 }
 0x304   :  { %v2184_v58 = vpop.f32.mrf.mxu0  ;;  %v5935_v10 = vpop.f32.mrf.mxu1 }
 0x305   :  { %v2448_v1 = vadd.f32 %v5777_v11, %v2378_v30  ;;  %v2185_v53 = vadd.f32 %v2184_v58, %v5809_v51  ;;  %4174 = vmatprep.mubr.bf16.mxu1 %v2646_v6  ;;  %v2592_v59 = vmul.f32 %v2511_v14, %v5007_v8 }
 0x306   :  { %v2186_v60 = vpop.f32.mrf.mxu0  ;;  %v1961_v43 = vpop.f32.mrf.mxu1 }
 0x307   :  { %v2512_v5 = vmax.f32 %v2448_v1, 0.0  ;;  %v2379_v50 = vmul.f32 %v2185_v53, %v5020_v17 }
 0x308   :  { %v2187_v19 = vpop.f32.mrf.mxu0  ;;  %v5940_v38 = vpop.f32.mrf.mxu1 }
 0x309   :  { %v2593_v21 = vmul.f32 %v2512_v5, %v5005_v7  ;;  %v2449_v15 = vadd.f32 %v5777_v11, %v2379_v50  ;;  %v2188_v32 = vadd.f32 %v2187_v19, %v5817_v23 }
 0x30a   :  { %v2189_v22 = vpop.f32.mrf.mxu0  ;;  %v1964_v52 = vpop.f32.mrf.mxu1 }
 0x30b   :  { %v2380_v51 = vmul.f32 %v2188_v32, %v5018_v16  ;;  %v2647_v30 = vpack.c.bf16 %v2593_v21, %v2592_v59  ;;  %v2513_v1 = vmax.f32 %v2449_v15, 0.0 }
 0x30c   :  { %v2192_v6 = vpop.f32.mrf.mxu0  ;;  %v5947_v58 = vpop.f32.mrf.mxu1 }
 0x30d   :  { %v2450_v53 = vadd.f32 %v5777_v11, %v2380_v51  ;;  %v2193_v60 = vadd.f32 %v2192_v6, %v5827_v35  ;;  %4175 = vmatmul.mubr.bf16.gmra.mxu1 %v2647_v30  ;;  %v2594_v21 = vmul.f32 %v2513_v1, %v5020_v17 }
 0x30e   :  { %v2194_v14 = vpop.f32.mrf.mxu0  ;;  %v1969_v43 = vpop.f32.mrf.mxu1 }
 0x30f   :  { %v2514_v5 = vmax.f32 %v2450_v53, 0.0  ;;  %v2381_v50 = vmul.f32 %v2193_v60, %v5033_v28 }
 0x310   :  { %v2195_v23 = vpop.f32.mrf.mxu0  ;;  %v5952_v19 = vpop.f32.mrf.mxu1 }
 0x311   :  { %v2451_v32 = vadd.f32 %v5777_v11, %v2381_v50  ;;  %v2196_v59 = vadd.f32 %v2195_v23, %v5835_v44  ;;  %v2595_v15 = vmul.f32 %v2514_v5, %v5018_v16 }
 0x312   :  { %v2197_v22 = vpop.f32.mrf.mxu0  ;;  %v1972_v52 = vpop.f32.mrf.mxu1 }
 0x313   :  { %v2382_v35 = vmul.f32 %v2196_v59, %v5031_v25  ;;  %v2648_v51 = vpack.c.bf16 %v2595_v15, %v2594_v21  ;;  %v2515_v53 = vmax.f32 %v2451_v32, 0.0 }
 0x314   :  { %v2200_v30 = vpop.f32.mrf.mxu0  ;;  %v5959_v6 = vpop.f32.mrf.mxu1 }
 0x315   :  { %v2452_v60 = vadd.f32 %v5777_v11, %v2382_v35  ;;  %v2201_v14 = vadd.f32 %v2200_v30, %v5845_v29  ;;  %4178 = vmatprep.mubr.bf16.mxu1 %v2648_v51  ;;  %v2596_v59 = vmul.f32 %v2515_v53, %v5033_v28 }
 0x316   :  { %v2202_v43 = vpop.f32.mrf.mxu0  ;;  %v1977_v44 = vpop.f32.mrf.mxu1 }
 0x317   :  { %v2516_v50 = vmax.f32 %v2452_v60, 0.0  ;;  %v2383_v1 = vmul.f32 %v2201_v14, %v5046_v37 }
 0x318   :  { %v2203_v5 = vpop.f32.mrf.mxu0  ;;  %v5964_v23 = vpop.f32.mrf.mxu1 }
 0x319   :  { %v2597_v21 = vmul.f32 %v2516_v50, %v5031_v25  ;;  %v2453_v15 = vadd.f32 %v5777_v11, %v2383_v1  ;;  %v2204_v32 = vadd.f32 %v2203_v5, %v5853_v13 }
 0x31a   :  { %v2205_v22 = vpop.f32.mrf.mxu0  ;;  %v1980_v52 = vpop.f32.mrf.mxu1 }
 0x31b   :  { %v2384_v29 = vmul.f32 %v2204_v32, %v5044_v36  ;;  %v2649_v35 = vpack.c.bf16 %v2597_v21, %v2596_v59  ;;  %v2517_v60 = vmax.f32 %v2453_v15, 0.0 }
 0x31c   :  { %v2208_v51 = vpop.f32.mrf.mxu0  ;;  %v5971_v30 = vpop.f32.mrf.mxu1 }
 0x31d   :  { %v2454_v14 = vadd.f32 %v5777_v11, %v2384_v29  ;;  %v2209_v43 = vadd.f32 %v2208_v51, %v5863_v24  ;;  %4179 = vmatmul.mubr.bf16.gmra.mxu1 %v2649_v35  ;;  %v2598_v21 = vmul.f32 %v2517_v60, %v5046_v37 }
 0x31e   :  { %v2210_v53 = vpop.f32.mrf.mxu0  ;;  %v1985_v44 = vpop.f32.mrf.mxu1 }
 0x31f   :  { %v2518_v50 = vmax.f32 %v2454_v14, 0.0  ;;  %v2385_v1 = vmul.f32 %v2209_v43, %v5059_v46 }
 0x320   :  { %v2211_v13 = vpop.f32.mrf.mxu0  ;;  %v5976_v5 = vpop.f32.mrf.mxu1 }
 0x321   :  { %v2455_v32 = vadd.f32 %v5777_v11, %v2385_v1  ;;  %v2212_v59 = vadd.f32 %v2211_v13, %v5871_v49  ;;  %v2599_v15 = vmul.f32 %v2518_v50, %v5044_v36 }
 0x322   :  { %v2213_v22 = vpop.f32.mrf.mxu0  ;;  %v1988_v52 = vpop.f32.mrf.mxu1 }
 0x323   :  { %v2386_v24 = vmul.f32 %v2212_v59, %v5057_v45  ;;  %v2650_v29 = vpack.c.bf16 %v2599_v15, %v2598_v21  ;;  %v2519_v14 = vmax.f32 %v2455_v32, 0.0 }
 0x324   :  { %v2216_v35 = vpop.f32.mrf.mxu0  ;;  %v5983_v51 = vpop.f32.mrf.mxu1 }
 0x325   :  { %v2456_v43 = vadd.f32 %v5777_v11, %v2386_v24  ;;  %v2217_v53 = vadd.f32 %v2216_v35, %v5881_v12  ;;  %4182 = vmatprep.mubr.bf16.mxu1 %v2650_v29  ;;  %v2600_v59 = vmul.f32 %v2519_v14, %v5059_v46 }
 0x326   :  { %v2218_v44 = vpop.f32.mrf.mxu0  ;;  %v1993_v49 = vpop.f32.mrf.mxu1 }
 0x327   :  { %v2520_v1 = vmax.f32 %v2456_v43, 0.0  ;;  %v2387_v60 = vmul.f32 %v2217_v53, %v5072_v57 }
 0x328   :  { %v2219_v50 = vpop.f32.mrf.mxu0  ;;  %v5988_v13 = vpop.f32.mrf.mxu1 }
 0x329   :  { %v2601_v21 = vmul.f32 %v2520_v1, %v5057_v45  ;;  %v2457_v15 = vadd.f32 %v5777_v11, %v2387_v60  ;;  %v2220_v32 = vadd.f32 %v2219_v50, %v5889_v39  ;;  %v7132_v60 = vld [vmem:[#allocation15_spill] sm:$0xff] }
 0x32a   :  { %v2221_v22 = vpop.f32.mrf.mxu0  ;;  %v1996_v52 = vpop.f32.mrf.mxu1 }
 0x32b   :  { %v2388_v12 = vmul.f32 %v2220_v32, %v5070_v56  ;;  %v2651_v24 = vpack.c.bf16 %v2601_v21, %v2600_v59  ;;  %v2521_v43 = vmax.f32 %v2457_v15, 0.0 }
 0x32c   :  { %v2224_v29 = vpop.f32.mrf.mxu0  ;;  %v5995_v35 = vpop.f32.mrf.mxu1 }
 0x32d   :  { %v2458_v53 = vadd.f32 %v5777_v11, %v2388_v12  ;;  %v2225_v44 = vadd.f32 %v2224_v29, %v5896_v18  ;;  %4183 = vmatmul.mubr.bf16.gmra.mxu1 %v2651_v24  ;;  %v2602_v21 = vmul.f32 %v2521_v43, %v5072_v57  ;;  %v7133_v18 = vld [vmem:[#allocation14_spill] sm:$0xff]  ;;  %v7134_v43 = vld [vmem:[#allocation17_spill] sm:$0xff] }
 0x32e   :  { %v2226_v14 = vpop.f32.mrf.mxu0  ;;  %v2001_v49 = vpop.f32.mrf.mxu1 }
 0x32f   :  { %v2522_v1 = vmax.f32 %v2458_v53, 0.0  ;;  %v2389_v20 = vmul.f32 %v2225_v44, %v7132_v60 }
 0x330   :  { %v2227_v39 = vpop.f32.mrf.mxu0  ;;  %v6000_v50 = vpop.f32.mrf.mxu1 }
 0x331   :  { %v2459_v32 = vadd.f32 %v5777_v11, %v2389_v20  ;;  %v2228_v59 = vadd.f32 %v2227_v39, %v5904_v42  ;;  %v2603_v15 = vmul.f32 %v2522_v1, %v5070_v56 }
 0x332   :  { %v2229_v22 = vpop.f32.mrf.mxu0  ;;  %v2004_v52 = vpop.f32.mrf.mxu1 }
 0x333   :  { %v2390_v12 = vmul.f32 %v2228_v59, %v7133_v18  ;;  %v2652_v24 = vpack.c.bf16 %v2603_v15, %v2602_v21  ;;  %v2523_v44 = vmax.f32 %v2459_v32, 0.0 }
 0x334   :  { %v2232_v29 = vpop.f32.mrf.mxu0  ;;  %v6007_v53 = vpop.f32.mrf.mxu1 }
 0x335   :  { %v2460_v14 = vadd.f32 %v5777_v11, %v2390_v12  ;;  %v2233_v49 = vadd.f32 %v2232_v29, %v5911_v31  ;;  %4186 = vmatprep.mubr.bf16.mxu1 %v2652_v24  ;;  %v2604_v59 = vmul.f32 %v2523_v44, %v7132_v60  ;;  %v7135_v31 = vld [vmem:[#allocation16_spill] sm:$0xff]  ;;  %v7150_v60 = vld [vmem:[#allocation33_spill] sm:$0xff] }
 0x336   :  { %v2234_v20 = vpop.f32.mrf.mxu0  ;;  %v2009_v42 = vpop.f32.mrf.mxu1 }
 0x337   :  { %v2524_v39 = vmax.f32 %v2460_v14, 0.0  ;;  %v2391_v9 = vmul.f32 %v2233_v49, %v7134_v43 }
 0x338   :  { %v2235_v1 = vpop.f32.mrf.mxu0  ;;  %v6012_v22 = vpop.f32.mrf.mxu1 }
 0x339   :  { %v2605_v21 = vmul.f32 %v2524_v39, %v7133_v18  ;;  %v2461_v15 = vadd.f32 %v5777_v11, %v2391_v9  ;;  %v2236_v32 = vadd.f32 %v2235_v1, %v5916_v2  ;;  %v7136_v9 = vld [vmem:[#allocation19_spill] sm:$0xff] }
 0x33a   :  { %v2237_v52 = vpop.f32.mrf.mxu0  ;;  %v2012_v12 = vpop.f32.mrf.mxu1 }
 0x33b   :  { %v2392_v24 = vmul.f32 %v2236_v32, %v7135_v31  ;;  %v2653_v29 = vpack.c.bf16 %v2605_v21, %v2604_v59  ;;  %v2525_v49 = vmax.f32 %v2461_v15, 0.0 }
 0x33c   :  { %v2240_v20 = vpop.f32.mrf.mxu0  ;;  %v6019_v14 = vpop.f32.mrf.mxu1 }
 0x33d   :  { %v2462_v42 = vadd.f32 %v5777_v11, %v2392_v24  ;;  %v2241_v3 = vadd.f32 %v2240_v20, %v5923_v0  ;;  %4187 = vmatmul.mubr.bf16.gmra.mxu1 %v2653_v29  ;;  %v2606_v21 = vmul.f32 %v2525_v49, %v7134_v43  ;;  %v7137_v0 = vld [vmem:[#allocation18_spill] sm:$0xff]  ;;  %v7138_v49 = vld [vmem:[#allocation21_spill] sm:$0xff] }
 0x33e   :  { %v2242_v44 = vpop.f32.mrf.mxu0  ;;  %v2017_v39 = vpop.f32.mrf.mxu1 }
 0x33f   :  { %v2526_v4 = vmax.f32 %v2462_v42, 0.0  ;;  %v2393_v18 = vmul.f32 %v2241_v3, %v7136_v9 }
 0x340   :  { %v2243_v2 = vpop.f32.mrf.mxu0  ;;  %v6024_v1 = vpop.f32.mrf.mxu1 }
 0x341   :  { %v2463_v32 = vadd.f32 %v5777_v11, %v2393_v18  ;;  %v2244_v59 = vadd.f32 %v2243_v2, %v5928_v63  ;;  %v2607_v15 = vmul.f32 %v2526_v4, %v7135_v31 }
 0x342   :  { %v2245_v52 = vpop.f32.mrf.mxu0  ;;  %v2020_v12 = vpop.f32.mrf.mxu1 }
 0x343   :  { %v2394_v24 = vmul.f32 %v2244_v59, %v7137_v0  ;;  %v2654_v29 = vpack.c.bf16 %v2607_v15, %v2606_v21  ;;  %v2527_v3 = vmax.f32 %v2463_v32, 0.0 }
 0x344   :  { %v2248_v20 = vpop.f32.mrf.mxu0  ;;  %v6031_v42 = vpop.f32.mrf.mxu1 }
 0x345   :  { %v2464_v44 = vadd.f32 %v5777_v11, %v2394_v24  ;;  %v2249_v39 = vadd.f32 %v2248_v20, %v5935_v10  ;;  %4190 = vmatprep.mubr.bf16.mxu1 %v2654_v29  ;;  %v2608_v59 = vmul.f32 %v2527_v3, %v7136_v9  ;;  %v7139_v10 = vld [vmem:[#allocation20_spill] sm:$0xff] }
 0x346   :  { %v2250_v18 = vpop.f32.mrf.mxu0  ;;  %v2025_v63 = vpop.f32.mrf.mxu1 }
 0x347   :  { %v2528_v2 = vmax.f32 %v2464_v44, 0.0  ;;  %v2395_v43 = vmul.f32 %v2249_v39, %v7138_v49 }
 0x348   :  { %v2251_v4 = vpop.f32.mrf.mxu0  ;;  %v6036_v52 = vpop.f32.mrf.mxu1 }
 0x349   :  { %v2609_v21 = vmul.f32 %v2528_v2, %v7137_v0  ;;  %v2465_v15 = vadd.f32 %v5777_v11, %v2395_v43  ;;  %v2252_v32 = vadd.f32 %v2251_v4, %v5940_v38  ;;  %v7140_v43 = vld [vmem:[#allocation23_spill] sm:$0xff] }
 0x34a   :  { %v2253_v12 = vpop.f32.mrf.mxu0  ;;  %v2028_v24 = vpop.f32.mrf.mxu1 }
 0x34b   :  { %v2396_v29 = vmul.f32 %v2252_v32, %v7139_v10  ;;  %v2655_v20 = vpack.c.bf16 %v2609_v21, %v2608_v59  ;;  %v2529_v39 = vmax.f32 %v2465_v15, 0.0 }
 0x34c   :  { %v2256_v18 = vpop.f32.mrf.mxu0  ;;  %v6043_v44 = vpop.f32.mrf.mxu1 }
 0x34d   :  { %v2466_v63 = vadd.f32 %v5777_v11, %v2396_v29  ;;  %v2257_v31 = vadd.f32 %v2256_v18, %v5947_v58  ;;  %4191 = vmatmul.mubr.bf16.gmra.mxu1 %v2655_v20  ;;  %v2610_v21 = vmul.f32 %v2529_v39, %v7138_v49  ;;  %v7141_v58 = vld [vmem:[#allocation22_spill] sm:$0xff]  ;;  %v7142_v39 = vld [vmem:[#allocation25_spill] sm:$0xff] }
 0x34e   :  { %v2258_v3 = vpop.f32.mrf.mxu0  ;;  %v2033_v2 = vpop.f32.mrf.mxu1 }
 0x34f   :  { %v2530_v0 = vmax.f32 %v2466_v63, 0.0  ;;  %v2397_v9 = vmul.f32 %v2257_v31, %v7140_v43 }
 0x350   :  { %v2259_v38 = vpop.f32.mrf.mxu0  ;;  %v6048_v4 = vpop.f32.mrf.mxu1 }
 0x351   :  { %v2467_v32 = vadd.f32 %v5777_v11, %v2397_v9  ;;  %v2260_v59 = vadd.f32 %v2259_v38, %v5952_v19  ;;  %v2611_v15 = vmul.f32 %v2530_v0, %v7139_v10 }
 0x352   :  { %v2261_v12 = vpop.f32.mrf.mxu0  ;;  %v2036_v24 = vpop.f32.mrf.mxu1 }
 0x353   :  { %v2398_v29 = vmul.f32 %v2260_v59, %v7141_v58  ;;  %v2656_v20 = vpack.c.bf16 %v2611_v15, %v2610_v21  ;;  %v2531_v31 = vmax.f32 %v2467_v32, 0.0 }
 0x354   :  { %v2264_v18 = vpop.f32.mrf.mxu0  ;;  %v6055_v63 = vpop.f32.mrf.mxu1 }
 0x355   :  { %v2468_v3 = vadd.f32 %v5777_v11, %v2398_v29  ;;  %v2265_v2 = vadd.f32 %v2264_v18, %v5959_v6  ;;  %4194 = vmatprep.mubr.bf16.mxu1 %v2656_v20  ;;  %v2612_v59 = vmul.f32 %v2531_v31, %v7140_v43  ;;  %v7143_v6 = vld [vmem:[#allocation24_spill] sm:$0xff] }
 0x356   :  { %v2266_v9 = vpop.f32.mrf.mxu0  ;;  %v2041_v19 = vpop.f32.mrf.mxu1 }
 0x357   :  { %v2532_v38 = vmax.f32 %v2468_v3, 0.0  ;;  %v2399_v49 = vmul.f32 %v2265_v2, %v7142_v39 }
 0x358   :  { %v2267_v0 = vpop.f32.mrf.mxu0  ;;  %v6060_v12 = vpop.f32.mrf.mxu1 }
 0x359   :  { %v2613_v21 = vmul.f32 %v2532_v38, %v7141_v58  ;;  %v2469_v15 = vadd.f32 %v5777_v11, %v2399_v49  ;;  %v2268_v32 = vadd.f32 %v2267_v0, %v5964_v23  ;;  %v7144_v49 = vld [vmem:[#allocation27_spill] sm:$0xff] }
 0x35a   :  { %v2269_v24 = vpop.f32.mrf.mxu0  ;;  %v2044_v29 = vpop.f32.mrf.mxu1 }
 0x35b   :  { %v2400_v20 = vmul.f32 %v2268_v32, %v7143_v6  ;;  %v2657_v18 = vpack.c.bf16 %v2613_v21, %v2612_v59  ;;  %v2533_v2 = vmax.f32 %v2469_v15, 0.0 }
 0x35c   :  { %v2272_v9 = vpop.f32.mrf.mxu0  ;;  %v6067_v3 = vpop.f32.mrf.mxu1 }
 0x35d   :  { %v2470_v19 = vadd.f32 %v5777_v11, %v2400_v20  ;;  %v2273_v10 = vadd.f32 %v2272_v9, %v5971_v30  ;;  %4195 = vmatmul.mubr.bf16.gmra.mxu1 %v2657_v18  ;;  %v2614_v21 = vmul.f32 %v2533_v2, %v7142_v39  ;;  %v7145_v30 = vld [vmem:[#allocation26_spill] sm:$0xff]  ;;  %v7146_v2 = vld [vmem:[#allocation29_spill] sm:$0xff] }
 0x35e   :  { %v2274_v31 = vpop.f32.mrf.mxu0  ;;  %v2049_v38 = vpop.f32.mrf.mxu1 }
 0x35f   :  { %v2534_v58 = vmax.f32 %v2470_v19, 0.0  ;;  %v2401_v43 = vmul.f32 %v2273_v10, %v7144_v49 }
 0x360   :  { %v2275_v23 = vpop.f32.mrf.mxu0  ;;  %v6072_v0 = vpop.f32.mrf.mxu1 }
 0x361   :  { %v2471_v32 = vadd.f32 %v5777_v11, %v2401_v43  ;;  %v2276_v59 = vadd.f32 %v2275_v23, %v5976_v5  ;;  %v2615_v15 = vmul.f32 %v2534_v58, %v7143_v6 }
 0x362   :  { %v2277_v24 = vpop.f32.mrf.mxu0  ;;  %v2052_v29 = vpop.f32.mrf.mxu1 }
 0x363   :  { %v2402_v20 = vmul.f32 %v2276_v59, %v7145_v30  ;;  %v2658_v18 = vpack.c.bf16 %v2615_v15, %v2614_v21  ;;  %v2535_v10 = vmax.f32 %v2471_v32, 0.0 }
 0x364   :  { %v2280_v9 = vpop.f32.mrf.mxu0  ;;  %v6079_v19 = vpop.f32.mrf.mxu1 }
 0x365   :  { %v2472_v31 = vadd.f32 %v5777_v11, %v2402_v20  ;;  %v2281_v38 = vadd.f32 %v2280_v9, %v5983_v51  ;;  %4198 = vmatprep.mubr.bf16.mxu1 %v2658_v18  ;;  %v2616_v59 = vmul.f32 %v2535_v10, %v7144_v49  ;;  %v7147_v51 = vld [vmem:[#allocation28_spill] sm:$0xff] }
 0x366   :  { %v2282_v43 = vpop.f32.mrf.mxu0  ;;  %v2057_v5 = vpop.f32.mrf.mxu1 }
 0x367   :  { %v2536_v23 = vmax.f32 %v2472_v31, 0.0  ;;  %v2403_v39 = vmul.f32 %v2281_v38, %v7146_v2 }
 0x368   :  { %v2283_v58 = vpop.f32.mrf.mxu0  ;;  %v6084_v24 = vpop.f32.mrf.mxu1 }
 0x369   :  { %v2617_v21 = vmul.f32 %v2536_v23, %v7145_v30  ;;  %v2473_v15 = vadd.f32 %v5777_v11, %v2403_v39  ;;  %v2284_v32 = vadd.f32 %v2283_v58, %v5988_v13  ;;  %v7148_v39 = vld [vmem:[#allocation31_spill] sm:$0xff] }
 0x36a   :  { %v2285_v29 = vpop.f32.mrf.mxu0  ;;  %v2060_v20 = vpop.f32.mrf.mxu1 }
 0x36b   :  { %v2404_v18 = vmul.f32 %v2284_v32, %v7147_v51  ;;  %v2659_v9 = vpack.c.bf16 %v2617_v21, %v2616_v59  ;;  %v2537_v38 = vmax.f32 %v2473_v15, 0.0 }
 0x36c   :  { %v2288_v43 = vpop.f32.mrf.mxu0  ;;  %v6091_v31 = vpop.f32.mrf.mxu1 }
 0x36d   :  { %v2474_v5 = vadd.f32 %v5777_v11, %v2404_v18  ;;  %v2289_v6 = vadd.f32 %v2288_v43, %v5995_v35  ;;  %4199 = vmatmul.mubr.bf16.gmra.mxu1 %v2659_v9  ;;  %v2618_v21 = vmul.f32 %v2537_v38, %v7146_v2  ;;  %v7149_v35 = vld [vmem:[#allocation30_spill] sm:$0xff] }
 0x36e   :  { %v2290_v10 = vpop.f32.mrf.mxu0  ;;  %v2065_v23 = vpop.f32.mrf.mxu1 }
 0x36f   :  { %v2538_v30 = vmax.f32 %v2474_v5, 0.0  ;;  %v2405_v49 = vmul.f32 %v2289_v6, %v7148_v39 }
 0x370   :  { %v2291_v13 = vpop.f32.mrf.mxu0  ;;  %v6096_v58 = vpop.f32.mrf.mxu1 }
 0x371   :  { %v2475_v32 = vadd.f32 %v5777_v11, %v2405_v49  ;;  %v2292_v59 = vadd.f32 %v2291_v13, %v6000_v50  ;;  %v2619_v15 = vmul.f32 %v2538_v30, %v7147_v51 }
 0x372   :  { %v2293_v29 = vpop.f32.mrf.mxu0  ;;  %v2068_v20 = vpop.f32.mrf.mxu1 }
 0x373   :  { %v2406_v18 = vmul.f32 %v2292_v59, %v7149_v35  ;;  %v2660_v9 = vpack.c.bf16 %v2619_v15, %v2618_v21  ;;  %v2539_v5 = vmax.f32 %v2475_v32, 0.0  ;;  %v7151_v32 = vld [vmem:[#allocation32_spill] sm:$0xff] }
 0x374   :  { %v2296_v43 = vpop.f32.mrf.mxu0 }
 0x375   :  { %v2476_v6 = vadd.f32 %v5777_v11, %v2406_v18  ;;  %v2297_v10 = vadd.f32 %v2296_v43, %v6007_v53  ;;  %4202 = vmatprep.mubr.bf16.mxu1 %v2660_v9  ;;  %v2620_v38 = vmul.f32 %v2539_v5, %v7148_v39  ;;  %v6114_v9 = vld [vmem:[%s6976_s4] ss:$0 sm:$0xff] }
 0x376   :  { %v2298_v23 = vpop.f32.mrf.mxu0 }
 0x377   :  { %v2540_v49 = vmax.f32 %v2476_v6, 0.0  ;;  %v2407_v50 = vmul.f32 %v2297_v10, %v7150_v60  ;;  %v7152_v10 = vld [vmem:[#allocation35_spill] sm:$0xff] }
 0x378   :  { %v2299_v13 = vpop.f32.mrf.mxu0 }
 0x379   :  { %v2621_v30 = vmul.f32 %v2540_v49, %v7149_v35  ;;  %v2477_v29 = vadd.f32 %v5777_v11, %v2407_v50  ;;  %v2300_v59 = vadd.f32 %v2299_v13, %v6012_v22 }
 0x37a   :  { %v2301_v21 = vpop.f32.mrf.mxu0 }
 0x37b   :  { %v2408_v15 = vmul.f32 %v2300_v59, %v7151_v32  ;;  %v2661_v20 = vpack.c.bf16 %v2621_v30, %v2620_v38  ;;  %v2541_v53 = vmax.f32 %v2477_v29, 0.0  ;;  %v7153_v29 = vld [vmem:[#allocation34_spill] sm:$0xff] }
 0x37c   :  { %v2304_v18 = vpop.f32.mrf.mxu0 }
 0x37d   :  { %v2478_v43 = vadd.f32 %v6114_v9, %v2408_v15  ;;  %v2305_v5 = vadd.f32 %v2304_v18, %v6019_v14  ;;  %4203 = vmatmul.mubr.bf16.gmra.mxu1 %v2661_v20  ;;  %v2622_v13 = vmul.f32 %v2541_v53, %v7150_v60 }
 0x37e   :  { %v2306_v6 = vpop.f32.mrf.mxu0 }
 0x37f   :  { %v2542_v11 = vmax.f32 %v2478_v43, 0.0  ;;  %v2409_v22 = vmul.f32 %v2305_v5, %v7152_v10  ;;  %v7154_v6 = vld [vmem:[#allocation37_spill] sm:$0xff] }
 0x380   :  { %v2307_v23 = vpop.f32.mrf.mxu0 }
 0x381   :  { %v2479_v49 = vadd.f32 %v6114_v9, %v2409_v22  ;;  %v2308_v50 = vadd.f32 %v2307_v23, %v6024_v1  ;;  %v2623_v38 = vmul.f32 %v2542_v11, %v7151_v32 }
 0x382   :  { %v2309_v30 = vpop.f32.mrf.mxu0 }
 0x383   :  { %v2410_v59 = vmul.f32 %v2308_v50, %v7153_v29  ;;  %v2662_v21 = vpack.c.bf16 %v2623_v38, %v2622_v13  ;;  %v2543_v14 = vmax.f32 %v2479_v49, 0.0  ;;  %v7155_v49 = vld [vmem:[#allocation36_spill] sm:$0xff] }
 0x384   :  { %v2312_v15 = vpop.f32.mrf.mxu0 }
 0x385   :  { %v2480_v20 = vadd.f32 %v6114_v9, %v2410_v59  ;;  %v2313_v18 = vadd.f32 %v2312_v15, %v6031_v42  ;;  %4206 = vmatprep.mubr.bf16.mxu1 %v2662_v21  ;;  %v2624_v53 = vmul.f32 %v2543_v14, %v7152_v10  ;;  %v7156_v14 = vld [vmem:[#allocation39_spill] sm:$0xff] }
 0x386   :  { %v2314_v43 = vpop.f32.mrf.mxu0 }
 0x387   :  { %v2544_v5 = vmax.f32 %v2480_v20, 0.0  ;;  %v2411_v22 = vmul.f32 %v2313_v18, %v7154_v6 }
 0x388   :  { %v2315_v1 = vpop.f32.mrf.mxu0 }
 0x389   :  { %v2625_v11 = vmul.f32 %v2544_v5, %v7153_v29  ;;  %v2481_v23 = vadd.f32 %v6114_v9, %v2411_v22  ;;  %v2316_v50 = vadd.f32 %v2315_v1, %v6036_v52 }
 0x38a   :  { %v2317_v13 = vpop.f32.mrf.mxu0 }
 0x38b   :  { %v2412_v38 = vmul.f32 %v2316_v50, %v7155_v49  ;;  %v2663_v30 = vpack.c.bf16 %v2625_v11, %v2624_v53  ;;  %v2545_v42 = vmax.f32 %v2481_v23, 0.0  ;;  %v7157_v50 = vld [vmem:[#allocation38_spill] sm:$0xff] }
 0x38c   :  { %v2320_v59 = vpop.f32.mrf.mxu0 }
 0x38d   :  { %v2482_v21 = vadd.f32 %v6114_v9, %v2412_v38  ;;  %v2321_v15 = vadd.f32 %v2320_v59, %v6043_v44  ;;  %4207 = vmatmul.mubr.bf16.gmra.mxu1 %v2663_v30  ;;  %v2626_v1 = vmul.f32 %v2545_v42, %v7154_v6  ;;  %v6139_v23 = vpop.f32.mrf.mxu1  ;;  %v7158_v42 = vld [vmem:[#allocation41_spill] sm:$0xff] }
 0x38e   :  { %v2322_v20 = vpop.f32.mrf.mxu0 }
 0x38f   :  { %v2546_v18 = vmax.f32 %v2482_v21, 0.0  ;;  %v2413_v43 = vmul.f32 %v2321_v15, %v7156_v14  ;;  %v6144_v20 = vpop.f32.mrf.mxu1 }
 0x390   :  { %v2323_v5 = vpop.f32.mrf.mxu0 }
 0x391   :  { %v2483_v22 = vadd.f32 %v6114_v9, %v2413_v43  ;;  %v2324_v52 = vadd.f32 %v2323_v5, %v6048_v4  ;;  %v2627_v53 = vmul.f32 %v2546_v18, %v7155_v49 }
 0x392   :  { %v2325_v11 = vpop.f32.mrf.mxu0 }
 0x393   :  { %v2414_v13 = vmul.f32 %v2324_v52, %v7157_v50  ;;  %v2664_v44 = vpack.c.bf16 %v2627_v53, %v2626_v1  ;;  %v2547_v30 = vmax.f32 %v2483_v22, 0.0  ;;  %v6151_v53 = vpop.f32.mrf.mxu1 }
 0x394   :  { %v2328_v38 = vpop.f32.mrf.mxu0 }
 0x395   :  { %v2484_v59 = vadd.f32 %v6114_v9, %v2414_v13  ;;  %v2329_v21 = vadd.f32 %v2328_v38, %v6055_v63  ;;  %4210 = vmatprep.mubr.bf16.mxu1 %v2664_v44  ;;  %v2628_v5 = vmul.f32 %v2547_v30, %v7156_v14  ;;  %v7159_v63 = vld [vmem:[#allocation40_spill] sm:$0xff]  ;;  %v6156_v14 = vpop.f32.mrf.mxu1 }
 0x396   :  { %v2330_v15 = vpop.f32.mrf.mxu0 }
 0x397   :  { %v2548_v4 = vmax.f32 %v2484_v59, 0.0  ;;  %v2415_v43 = vmul.f32 %v2329_v21, %v7158_v42 }
 0x398   :  { %v2331_v18 = vpop.f32.mrf.mxu0 }
 0x399   :  { %v2629_v11 = vmul.f32 %v2548_v4, %v7157_v50  ;;  %v2485_v52 = vadd.f32 %v6114_v9, %v2415_v43  ;;  %v2332_v22 = vadd.f32 %v2331_v18, %v6060_v12  ;;  %v7160_v43 = vld [vmem:[#allocation43_spill] sm:$0xff] }
 0x39a   :  { %v2333_v1 = vpop.f32.mrf.mxu0 }
 0x39b   :  { %v2416_v13 = vmul.f32 %v2332_v22, %v7159_v63  ;;  %v2665_v44 = vpack.c.bf16 %v2629_v11, %v2628_v5  ;;  %v2549_v15 = vmax.f32 %v2485_v52, 0.0 }
 0x39c   :  { %v2336_v38 = vpop.f32.mrf.mxu0 }
 0x39d   :  { %v2486_v59 = vadd.f32 %v6114_v9, %v2416_v13  ;;  %v2337_v21 = vadd.f32 %v2336_v38, %v6067_v3  ;;  %4211 = vmatmul.mubr.bf16.gmra.mxu1 %v2665_v44  ;;  %v6160_v1 = vpop.f32.mrf.mxu1  ;;  %v2630_v11 = vmul.f32 %v2549_v15, %v7158_v42  ;;  %v7161_v3 = vld [vmem:[#allocation42_spill] sm:$0xff] }
 0x39e   :  { %v2338_v30 = vpop.f32.mrf.mxu0 }
 0x39f   :  { %v2550_v4 = vmax.f32 %v2486_v59, 0.0  ;;  %v2417_v50 = vmul.f32 %v2337_v21, %v7160_v43  ;;  %v6166_v59 = vpop.f32.mrf.mxu1 }
 0x3a0   :  { %v2339_v12 = vpop.f32.mrf.mxu0 }
 0x3a1   :  { %v2487_v18 = vadd.f32 %v6114_v9, %v2417_v50  ;;  %v2340_v5 = vadd.f32 %v2339_v12, %v6072_v0  ;;  %v2631_v52 = vmul.f32 %v2550_v4, %v7159_v63  ;;  %v7162_v0 = vld [vmem:[#allocation45_spill] sm:$0xff]  ;;  %v7163_v63 = vld [vmem:[#allocation44_spill] sm:$0xff] }
 0x3a2   :  { %v2341_v22 = vpop.f32.mrf.mxu0 }
 0x3a3   :  { %v2418_v13 = vmul.f32 %v2340_v5, %v7161_v3  ;;  %v2666_v44 = vpack.c.bf16 %v2631_v52, %v2630_v11  ;;  %v2551_v30 = vmax.f32 %v2487_v18, 0.0  ;;  %v4165_v5 = vpop.f32.mrf.mxu1 }
 0x3a4   :  { %v2344_v38 = vpop.f32.mrf.mxu0 }
 0x3a5   :  { %v2488_v21 = vadd.f32 %v6114_v9, %v2418_v13  ;;  %v2345_v50 = vadd.f32 %v2344_v38, %v6079_v19  ;;  %4214 = vmatprep.mubr.bf16.mxu1 %v2666_v44  ;;  %v2632_v4 = vmul.f32 %v2551_v30, %v7160_v43  ;;  %v2771_v44 = vpop.f32.mrf.mxu1 }
 0x3a6   :  { %v2346_v49 = vpop.f32.mrf.mxu0 }
 0x3a7   :  { %v2552_v6 = vmax.f32 %v2488_v21, 0.0  ;;  %v2419_v12 = vmul.f32 %v2345_v50, %v7162_v0 }
 0x3a8   :  { %v2347_v15 = vpop.f32.mrf.mxu0 }
 0x3a9   :  { %v2633_v22 = vmul.f32 %v2552_v6, %v7161_v3  ;;  %v2489_v11 = vadd.f32 %v6114_v9, %v2419_v12  ;;  %v2348_v18 = vadd.f32 %v2347_v15, %v6084_v24  ;;  %v7164_v6 = vld [vmem:[#allocation47_spill] sm:$0xff] }
 0x3aa   :  { %v2349_v52 = vpop.f32.mrf.mxu0 }
 0x3ab   :  { %v2420_v13 = vmul.f32 %v2348_v18, %v7163_v63  ;;  %v2667_v42 = vpack.c.bf16 %v2633_v22, %v2632_v4  ;;  %v2553_v49 = vmax.f32 %v2489_v11, 0.0  ;;  %v7165_v52 = vld [vmem:[#allocation46_spill] sm:$0xff] }
 0x3ac   :  { %v2352_v19 = vpop.f32.mrf.mxu0 }
 0x3ad   :  { %v2490_v38 = vadd.f32 %v6114_v9, %v2420_v13  ;;  %v2353_v21 = vadd.f32 %v2352_v19, %v6091_v31  ;;  %4215 = vmatmul.mubr.bf16.gmra.mxu1 %v2667_v42  ;;  %v4168_v43 = vpop.f32.mrf.mxu1  ;;  %v2634_v4 = vmul.f32 %v2553_v49, %v7162_v0 }
 0x3ae   :  { %v2354_v30 = vpop.f32.mrf.mxu0 }
 0x3af   :  { %v2554_v50 = vmax.f32 %v2490_v38, 0.0  ;;  %v2421_v3 = vmul.f32 %v2353_v21, %v7164_v6  ;;  %v2784_v18 = vpop.f32.mrf.mxu1 }
 0x3b0   :  { %v2355_v12 = vpop.f32.mrf.mxu0 }
 0x3b1   :  { %v2491_v24 = vadd.f32 %v6114_v9, %v2421_v3  ;;  %v2356_v15 = vadd.f32 %v2355_v12, %v6096_v58  ;;  %v2635_v22 = vmul.f32 %v2554_v50, %v7163_v63  ;;  %v4169_v21 = vpop.f32.mrf.mxu1  ;;  %v4466_v50 = vld [vmem:[%s6973_s1 + $0x6c] ss:$16 sps:$4 sm:$0xff]  }
 0x3b2   :  { %v2357_v11 = vpop.f32.mrf.mxu0 }
 0x3b3   :  { %v2422_v13 = vmul.f32 %v2356_v15, %v7165_v52  ;;  %v2668_v31 = vpack.c.bf16 %v2635_v22, %v2634_v4  ;;  %v2555_v42 = vmax.f32 %v2491_v24, 0.0  ;;  %v2787_v58 = vpop.f32.mrf.mxu1  ;;  %v7166_v22 = vmov 0  }
 0x3b5   :  { %v2492_v19 = vadd.f32 %v6114_v9, %v2422_v13  ;;  %4218 = vmatprep.mubr.bf16.mxu1 %v2668_v31  ;;  %v2636_v30 = vmul.f32 %v2555_v42, %v7164_v6  ;;  %v3012_v13 = vpack.c.bf16 %v4169_v21, %v4168_v43  ;;  %v3011_v31 = vpack.c.bf16 %v2787_v58, %v2784_v18 }
 0x3b6   :  { %v3010_v42 = vpack.c.bf16 %v4165_v5, %v6160_v1  ;;  %v3008_v43 = vpack.c.bf16 %v6151_v53, %v6139_v23  ;;  %v3007_v1 = vpack.c.bf16 %v6156_v14, %v6144_v20 }
 0x3b7   :  { %v2556_v38 = vmax.f32 %v2492_v19, 0.0 }
 0x3b9   :  { %v2637_v3 = vmul.f32 %v2556_v38, %v7165_v52  ;;  %v3009_v38 = vpack.c.bf16 %v2771_v44, %v6166_v59 }
 0x3bb   :  { %v2669_v12 = vpack.c.bf16 %v2637_v3, %v2636_v30 }
 0x3bd   :  { %v4172_v49 = vpop.f32.mrf.mxu1  ;;  %4219 = vmatmul.mubr.bf16.gmra.mxu1 %v2669_v12 }
 0x3be   :  { %3384 = vmatprep.mubr.bf16.mxu1 %v4466_v50 }
 0x3bf   :  { %v2800_v15 = vpop.f32.mrf.mxu1 }
 0x3c1   :  { %v4173_v24 = vpop.f32.mrf.mxu1 }
 0x3c2   :  { %v3014_v4 = vpack.c.bf16 %v4173_v24, %v4172_v49 }
 0x3c3   :  { %v2803_v9 = vpop.f32.mrf.mxu1 }
 0x3c4   :  { %3040 = vmatpush1.bf16.msra.mxu0 %v3014_v4  ;;  %v3013_v11 = vpack.c.bf16 %v2803_v9, %v2800_v15 }
 0x3c5   :  { %3041 = vmatprep.subr.bf16.mxu0 %v7166_v22 }
 0x3c8   :  { %3042 = vmatpush1.bf16.msra.mxu0 %v3013_v11 }
 0x3c9   :  { %3043 = vmatprep.subr.bf16.mxu0 %v7166_v22 }
 0x3cc   :  { %3044 = vmatpush1.bf16.msra.mxu0 %v3012_v13 }
 0x3cd   :  { %3045 = vmatprep.subr.bf16.mxu0 %v7166_v22  ;;  %v4176_v19 = vpop.f32.mrf.mxu1 }
 0x3cf   :  { %v2816_v30 = vpop.f32.mrf.mxu1 }
 0x3d0   :  { %3046 = vmatpush1.bf16.msra.mxu0 %v3011_v31 }
 0x3d1   :  { %3047 = vmatprep.subr.bf16.mxu0 %v7166_v22  ;;  %v4177_v21 = vpop.f32.mrf.mxu1 }
 0x3d3   :  { %v2819_v5 = vpop.f32.mrf.mxu1 }
 0x3d4   :  { %3048 = vmatpush1.bf16.msra.mxu0 %v3010_v42 }
 0x3d5   :  { %3049 = vmatprep.subr.bf16.mxu0 %v7166_v22 }
 0x3d8   :  { %3050 = vmatpush1.bf16.msra.mxu0 %v3009_v38  ;;  %v3016_v38 = vpack.c.bf16 %v4177_v21, %v4176_v19  ;;  %v4468_v19 = vld [vmem:[%s6973_s1 + $0x24] ss:$16 sps:$4 sm:$0xff]  }
 0x3d9   :  { %3051 = vmatprep.subr.bf16.mxu0 %v7166_v22 }
 0x3dc   :  { %3052 = vmatpush1.bf16.msra.mxu0 %v3008_v43 }
 0x3dd   :  { %3053 = vmatprep.subr.bf16.mxu0 %v7166_v22  ;;  %v4180_v18 = vpop.f32.mrf.mxu1 }
 0x3df   :  { %v2832_v59 = vpop.f32.mrf.mxu1 }
 0x3e0   :  { %3054 = vmatpush1.bf16.msra.mxu0 %v3007_v1  ;;  %v3015_v1 = vpack.c.bf16 %v2819_v5, %v2816_v30  ;;  %v4469_v30 = vld [vmem:[%s6973_s1 + $0x20] ss:$16 sps:$4 sm:$0xff]   ;;  %v4470_v5 = vld [vmem:[%s6973_s1 + $0x44] ss:$16 sps:$4 sm:$0xff]  }
 0x3e1   :  { %3055 = vmatprep.subr.bf16.mxu0 %v7166_v22  ;;  %v4181_v44 = vpop.f32.mrf.mxu1 }
 0x3e2   :  { %v3018_v11 = vpack.c.bf16 %v4181_v44, %v4180_v18 }
 0x3e3   :  { %v2835_v3 = vpop.f32.mrf.mxu1 }
 0x3e4   :  { %v3017_v31 = vpack.c.bf16 %v2835_v3, %v2832_v59  ;;  %v4467_v59 = vld [vmem:[%s6973_s1] ss:$16 sps:$4 sm:$0xff]  }
 0x3ed   :  { %v4184_v58 = vpop.f32.mrf.mxu1 }
 0x3ef   :  { %v2848_v12 = vpop.f32.mrf.mxu1 }
 0x3f1   :  { %v4185_v49 = vpop.f32.mrf.mxu1 }
 0x3f2   :  { %v3020_v20 = vpack.c.bf16 %v4185_v49, %v4184_v58 }
 0x3f3   :  { %v2851_v50 = vpop.f32.mrf.mxu1 }
 0x3f4   :  { %v3019_v9 = vpack.c.bf16 %v2851_v50, %v2848_v12  ;;  %v4471_v50 = vld [vmem:[%s6973_s1 + $0x40] ss:$16 sps:$4 sm:$0xff]  }
 0x3fd   :  { %v4188_v23 = vpop.f32.mrf.mxu1 }
 0x3ff   :  { %v2864_v53 = vpop.f32.mrf.mxu1 }
 0x401   :  { %v4189_v15 = vpop.f32.mrf.mxu1 }
 0x402   :  { %v3022_v24 = vpack.c.bf16 %v4189_v15, %v4188_v23  ;;  %v4472_v23 = vld [vmem:[%s6973_s1 + $0x64] ss:$16 sps:$4 sm:$0xff]  }
 0x403   :  { %v2867_v4 = vpop.f32.mrf.mxu1 }
 0x404   :  { %3056 = vmatpush2.bf16.msra.mxu0 %v3022_v24  ;;  %v3021_v14 = vpack.c.bf16 %v2867_v4, %v2864_v53  ;;  %v4473_v24 = vld [vmem:[%s6973_s1 + $0x60] ss:$16 sps:$4 sm:$0xff]   ;;  %v4474_v4 = vld [vmem:[%s6973_s1 + $0x84] ss:$16 sps:$4 sm:$0xff]  }
 0x405   :  { %3057 = vmatprep.subr.bf16.mxu0 %v7166_v22 }
 0x408   :  { %3058 = vmatpush2.bf16.msra.mxu0 %v3021_v14 }
 0x409   :  { %3059 = vmatprep.subr.bf16.mxu0 %v7166_v22 }
 0x40c   :  { %3060 = vmatpush2.bf16.msra.mxu0 %v3020_v20 }
 0x40d   :  { %3061 = vmatprep.subr.bf16.mxu0 %v7166_v22  ;;  %v6208_v13 = vpop.f32.mrf.mxu1 }
 0x40f   :  { %v6211_v42 = vpop.f32.mrf.mxu1 }
 0x410   :  { %3062 = vmatpush2.bf16.msra.mxu0 %v3019_v9 }
 0x411   :  { %3063 = vmatprep.subr.bf16.mxu0 %v7166_v22  ;;  %v6214_v43 = vpop.f32.mrf.mxu1 }
 0x413   :  { %v6217_v58 = vpop.f32.mrf.mxu1 }
 0x414   :  { %3064 = vmatpush2.bf16.msra.mxu0 %v3018_v11 }
 0x415   :  { %3065 = vmatprep.subr.bf16.mxu0 %v7166_v22 }
 0x418   :  { %3066 = vmatpush2.bf16.msra.mxu0 %v3017_v31 }
 0x419   :  { %3067 = vmatprep.subr.bf16.mxu0 %v7166_v22 }
 0x41c   :  { %3068 = vmatpush2.bf16.msra.mxu0 %v3016_v38  ;;  %v4475_v38 = vld [vmem:[%s6973_s1 + $0x80] ss:$16 sps:$4 sm:$0xff]  }
 0x41d   :  { %3069 = vmatprep.subr.bf16.mxu0 %v7166_v22  ;;  %v4196_v18 = vpop.f32.mrf.mxu1 }
 0x41f   :  { %v2896_v21 = vpop.f32.mrf.mxu1 }
 0x420   :  { %3070 = vmatpush2.bf16.msra.mxu0 %v3015_v1 }
 0x421   :  { %3328 = vmatprep.subr.bf16.mxu0 %v7166_v22  ;;  %v4197_v44 = vpop.f32.mrf.mxu1 }
 0x423   :  { %3072 = vmatmul.mubr.bf16.vlgmr.msra.gmra.mxu0 %v4467_v59  ;;  %v2899_v3 = vpop.f32.mrf.mxu1  ;;  %v4476_v59 = vld [vmem:[%s6973_s1 + $0xa4] ss:$16 sps:$4 sm:$0xff]  }
 0x424   :  { %3079 = vmatprep.mubr.bf16.mxu0 %v4468_v19 }
 0x42b   :  { %3080 = vmatmul.mubr.bf16.gmra.mxu0 %v4469_v30  ;;  %v4477_v30 = vld [vmem:[%s6973_s1 + $0xa0] ss:$16 sps:$4 sm:$0xff]  }
 0x42c   :  { %3087 = vmatprep.mubr.bf16.mxu0 %v4470_v5 }
 0x42d   :  { %v4200_v12 = vpop.f32.mrf.mxu1 }
 0x42f   :  { %v2912_v49 = vpop.f32.mrf.mxu1 }
 0x431   :  { %v4201_v53 = vpop.f32.mrf.mxu1 }
 0x432   :  { %v3028_v19 = vpack.c.bf16 %v4201_v53, %v4200_v12  ;;  %v3026_v12 = vpack.c.bf16 %v4197_v44, %v4196_v18  ;;  %v4479_v53 = vld [vmem:[%s6973_s1 + $0xc0] ss:$16 sps:$4 sm:$0xff]   ;;  %v3024_v44 = vpack.c.bf16 %v6214_v43, %v6208_v13  ;;  %v4482_v13 = vld [vmem:[%s6973_s1 + $0x104] ss:$16 sps:$4 sm:$0xff]  }
 0x433   :  { %3088 = vmatmul.mubr.bf16.gmra.mxu0 %v4471_v50  ;;  %v2915_v15 = vpop.f32.mrf.mxu1  ;;  %v4478_v50 = vld [vmem:[%s6973_s1 + $0xc4] ss:$16 sps:$4 sm:$0xff]  }
 0x434   :  { %3095 = vmatprep.mubr.bf16.mxu0 %v4472_v23  ;;  %v3027_v5 = vpack.c.bf16 %v2915_v15, %v2912_v49  ;;  %v3025_v49 = vpack.c.bf16 %v2899_v3, %v2896_v21  ;;  %v4480_v15 = vld [vmem:[%s6973_s1 + $0xe4] ss:$16 sps:$4 sm:$0xff]   ;;  %v4481_v21 = vld [vmem:[%s6973_s1 + $0xe0] ss:$16 sps:$4 sm:$0xff]   ;;  %v3023_v3 = vpack.c.bf16 %v6217_v58, %v6211_v42 }
 0x435   :  { %v4484_v42 = vld [vmem:[%s6973_s1 + $0x124] ss:$16 sps:$4 sm:$0xff]  }
 0x43b   :  { %3096 = vmatmul.mubr.bf16.gmra.mxu0 %v4473_v24 }
 0x43c   :  { %3103 = vmatprep.mubr.bf16.mxu0 %v4474_v4 }
 0x43d   :  { %v4204_v14 = vpop.f32.mrf.mxu1 }
 0x43f   :  { %v2928_v20 = vpop.f32.mrf.mxu1 }
 0x441   :  { %v4205_v9 = vpop.f32.mrf.mxu1 }
 0x442   :  { %v3030_v11 = vpack.c.bf16 %v4205_v9, %v4204_v14  ;;  %v4483_v14 = vld [vmem:[%s6973_s1 + $0x100] ss:$16 sps:$4 sm:$0xff]  }
 0x443   :  { %v2931_v31 = vpop.f32.mrf.mxu1  ;;  %3104 = vmatmul.mubr.bf16.gmra.mxu0 %v4475_v38  ;;  %v4485_v9 = vld [vmem:[%s6973_s1 + $0x120] ss:$16 sps:$4 sm:$0xff]  }
 0x444   :  { %3329 = vmatpush1.bf16.msra.mxu0 %v3030_v11  ;;  %4238 = vmatpush1.bf16.msra.mxu1 %v3030_v11  ;;  %v3029_v1 = vpack.c.bf16 %v2931_v31, %v2928_v20  ;;  %v4486_v11 = vld [vmem:[%s6973_s1 + $0x144] ss:$16 sps:$4 sm:$0xff]  }
 0x445   :  { %3330 = vmatprep.subr.bf16.mxu0 %v7166_v22  ;;  %4223 = vmatprep.subr.bf16.mxu1 %v7166_v22 }
 0x446   :  { %3111 = vmatprep.mubr.bf16.mxu0 %v4476_v59  ;;  %v4487_v59 = vld [vmem:[%s6973_s1 + $0x140] ss:$16 sps:$4 sm:$0xff]  }
 0x448   :  { %3331 = vmatpush1.bf16.msra.mxu0 %v3029_v1  ;;  %4239 = vmatpush1.bf16.msra.mxu1 %v3029_v1 }
 0x449   :  { %3332 = vmatprep.subr.bf16.mxu0 %v7166_v22  ;;  %4224 = vmatprep.subr.bf16.mxu1 %v7166_v22 }
 0x44b   :  { %3112 = vmatmul.mubr.bf16.gmra.mxu0 %v4477_v30 }
 0x44c   :  { %3333 = vmatpush1.bf16.msra.mxu0 %v3028_v19  ;;  %4240 = vmatpush1.bf16.msra.mxu1 %v3028_v19  ;;  %v4488_v19 = vld [vmem:[%s6973_s1 + $0x164] ss:$16 sps:$4 sm:$0xff]  }
 0x44d   :  { %3334 = vmatprep.subr.bf16.mxu0 %v7166_v22  ;;  %4225 = vmatprep.subr.bf16.mxu1 %v7166_v22  ;;  %v6264_v23 = vpop.f32.mrf.mxu1 }
 0x44e   :  { %3119 = vmatprep.mubr.bf16.mxu0 %v4478_v50  ;;  %v4489_v50 = vld [vmem:[%s6973_s1 + $0x160] ss:$16 sps:$4 sm:$0xff]  }
 0x44f   :  { %v6274_v18 = vpop.f32.mrf.mxu1 }
 0x450   :  { %3335 = vmatpush1.bf16.msra.mxu0 %v3027_v5  ;;  %4241 = vmatpush1.bf16.msra.mxu1 %v3027_v5 }
 0x451   :  { %3336 = vmatprep.subr.bf16.mxu0 %v7166_v22  ;;  %4226 = vmatprep.subr.bf16.mxu1 %v7166_v22  ;;  %v6280_v24 = vpop.f32.mrf.mxu1 }
 0x453   :  { %3120 = vmatmul.mubr.bf16.gmra.mxu0 %v4479_v53  ;;  %v6292_v43 = vpop.f32.mrf.mxu1 }
 0x454   :  { %3337 = vmatpush1.bf16.msra.mxu0 %v3026_v12  ;;  %4242 = vmatpush1.bf16.msra.mxu1 %v3026_v12  ;;  %v4490_v12 = vld [vmem:[%s6973_s1 + $0x184] ss:$16 sps:$4 sm:$0xff]  }
 0x455   :  { %3338 = vmatprep.subr.bf16.mxu0 %v7166_v22  ;;  %4227 = vmatprep.subr.bf16.mxu1 %v7166_v22 }
 0x456   :  { %3127 = vmatprep.mubr.bf16.mxu0 %v4480_v15 }
 0x458   :  { %3339 = vmatpush1.bf16.msra.mxu0 %v3025_v49  ;;  %4243 = vmatpush1.bf16.msra.mxu1 %v3025_v49 }
 0x459   :  { %3340 = vmatprep.subr.bf16.mxu0 %v7166_v22  ;;  %4228 = vmatprep.subr.bf16.mxu1 %v7166_v22 }
 0x45b   :  { %3128 = vmatmul.mubr.bf16.gmra.mxu0 %v4481_v21 }
 0x45c   :  { %3341 = vmatpush1.bf16.msra.mxu0 %v3024_v44  ;;  %4244 = vmatpush1.bf16.msra.mxu1 %v3024_v44 }
 0x45d   :  { %3342 = vmatprep.subr.bf16.mxu0 %v7166_v22  ;;  %4229 = vmatprep.subr.bf16.mxu1 %v7166_v22  ;;  %v4212_v4 = vpop.f32.mrf.mxu1 }
 0x45e   :  { %3135 = vmatprep.mubr.bf16.mxu0 %v4482_v13 }
 0x45f   :  { %v2960_v58 = vpop.f32.mrf.mxu1 }
 0x460   :  { %3343 = vmatpush1.bf16.msra.mxu0 %v3023_v3  ;;  %4245 = vmatpush1.bf16.msra.mxu1 %v3023_v3  ;;  %v4491_v3 = vld [vmem:[%s6973_s1 + $0x180] ss:$16 sps:$4 sm:$0xff]  }
 0x461   :  { %3344 = vmatprep.subr.bf16.mxu0 %v7166_v22  ;;  %4230 = vmatprep.subr.bf16.mxu1 %v7166_v22  ;;  %v4213_v20 = vpop.f32.mrf.mxu1 }
 0x463   :  { %3136 = vmatmul.mubr.bf16.gmra.mxu0 %v4483_v14  ;;  %v2963_v31 = vpop.f32.mrf.mxu1  ;;  %v4492_v14 = vld [vmem:[%s6973_s1 + $0x1a4] ss:$16 sps:$4 sm:$0xff]  }
 0x464   :  { %3143 = vmatprep.mubr.bf16.mxu0 %v4484_v42 }
 0x46b   :  { %3144 = vmatmul.mubr.bf16.gmra.mxu0 %v4485_v9  ;;  %v4493_v9 = vld [vmem:[%s6973_s1 + $0x1a0] ss:$16 sps:$4 sm:$0xff]  }
 0x46c   :  { %3151 = vmatprep.mubr.bf16.mxu0 %v4486_v11 }
 0x46d   :  { %v4216_v38 = vpop.f32.mrf.mxu1 }
 0x46f   :  { %v2976_v1 = vpop.f32.mrf.mxu1 }
 0x471   :  { %v4217_v30 = vpop.f32.mrf.mxu1 }
 0x472   :  { %v3036_v42 = vpack.c.bf16 %v4217_v30, %v4216_v38  ;;  %v3034_v38 = vpack.c.bf16 %v4213_v20, %v4212_v4  ;;  %v4496_v30 = vld [vmem:[%s6973_s1 + $0x1e4] ss:$16 sps:$4 sm:$0xff]   ;;  %v3032_v4 = vpack.c.bf16 %v6280_v24, %v6264_v23  ;;  %v4497_v20 = vld [vmem:[%s6973_s1 + $0x1e0] ss:$16 sps:$4 sm:$0xff]   ;;  %v4500_v24 = vld [vmem:[%s6973_s1 + $0x68] ss:$16 sps:$4 sm:$0xff]  }
 0x473   :  { %3152 = vmatmul.mubr.bf16.gmra.mxu0 %v4487_v59  ;;  %v2979_v5 = vpop.f32.mrf.mxu1  ;;  %v4494_v59 = vld [vmem:[%s6973_s1 + $0x1c4] ss:$16 sps:$4 sm:$0xff]   ;;  %v4499_v23 = vld [vmem:[%s6973_s1 + $0x200] ss:$16 sps:$4 sm:$0xff]  }
 0x474   :  { %3159 = vmatprep.mubr.bf16.mxu0 %v4488_v19  ;;  %v3035_v11 = vpack.c.bf16 %v2979_v5, %v2976_v1  ;;  %v4495_v19 = vld [vmem:[%s6973_s1 + $0x1c0] ss:$16 sps:$4 sm:$0xff]   ;;  %v3033_v1 = vpack.c.bf16 %v2963_v31, %v2960_v58  ;;  %v3031_v58 = vpack.c.bf16 %v6292_v43, %v6274_v18  ;;  %v4498_v31 = vld [vmem:[%s6973_s1 + $0x204] ss:$16 sps:$4 sm:$0xff]   ;;  %v4502_v18 = vld [vmem:[%s6973_s1 + $0x8c] ss:$16 sps:$4 sm:$0xff]  }
 0x475   :  { %v4503_v43 = vld [vmem:[%s6973_s1 + $0x220] ss:$16 sps:$4 sm:$0xff]   ;;  %v4504_v5 = vld [vmem:[%s6973_s1 + $0x88] ss:$16 sps:$4 sm:$0xff]  }
 0x47b   :  { %3160 = vmatmul.mubr.bf16.gmra.mxu0 %v4489_v50  ;;  %v4505_v50 = vld [vmem:[%s6973_s1 + $0x244] ss:$16 sps:$4 sm:$0xff]  }
 0x47c   :  { %3167 = vmatprep.mubr.bf16.mxu0 %v4490_v12  ;;  %v4506_v12 = vld [vmem:[%s6973_s1 + $0xac] ss:$16 sps:$4 sm:$0xff]  }
 0x47d   :  { %v4220_v53 = vpop.f32.mrf.mxu1 }
 0x47f   :  { %v2992_v49 = vpop.f32.mrf.mxu1 }
 0x481   :  { %v4221_v15 = vpop.f32.mrf.mxu1 }
 0x482   :  { %v3038_v44 = vpack.c.bf16 %v4221_v15, %v4220_v53  ;;  %v4507_v53 = vld [vmem:[%s6973_s1 + $0x240] ss:$16 sps:$4 sm:$0xff]   ;;  %v4509_v15 = vld [vmem:[%s6973_s1 + $0x264] ss:$16 sps:$4 sm:$0xff]  }
 0x483   :  { %v2995_v21 = vpop.f32.mrf.mxu1  ;;  %3168 = vmatmul.mubr.bf16.gmra.mxu0 %v4491_v3  ;;  %v4512_v3 = vld [vmem:[%s6973_s1 + $0xc8] ss:$16 sps:$4 sm:$0xff]  }
 0x484   :  { %3345 = vmatpush2.bf16.msra.mxu0 %v3038_v44  ;;  %4246 = vmatpush2.bf16.msra.mxu1 %v3038_v44  ;;  %v3037_v13 = vpack.c.bf16 %v2995_v21, %v2992_v49  ;;  %v4508_v49 = vld [vmem:[%s6973_s1 + $0xa8] ss:$16 sps:$4 sm:$0xff]   ;;  %v4510_v44 = vld [vmem:[%s6973_s1 + $0xcc] ss:$16 sps:$4 sm:$0xff]   ;;  %v4511_v21 = vld [vmem:[%s6973_s1 + $0x260] ss:$16 sps:$4 sm:$0xff]  }
 0x485   :  { %3346 = vmatprep.subr.bf16.mxu0 %v7166_v22  ;;  %4231 = vmatprep.subr.bf16.mxu1 %v7166_v22 }
 0x486   :  { %3175 = vmatprep.mubr.bf16.mxu0 %v4492_v14  ;;  %v4514_v14 = vld [vmem:[%s6973_s1 + $0xec] ss:$16 sps:$4 sm:$0xff]  }
 0x488   :  { %3347 = vmatpush2.bf16.msra.mxu0 %v3037_v13  ;;  %4247 = vmatpush2.bf16.msra.mxu1 %v3037_v13  ;;  %v4513_v13 = vld [vmem:[%s6973_s1 + $0x284] ss:$16 sps:$4 sm:$0xff]  }
 0x489   :  { %3348 = vmatprep.subr.bf16.mxu0 %v7166_v22  ;;  %4232 = vmatprep.subr.bf16.mxu1 %v7166_v22 }
 0x48b   :  { %3176 = vmatmul.mubr.bf16.gmra.mxu0 %v4493_v9  ;;  %v4516_v9 = vld [vmem:[%s6973_s1 + $0xe8] ss:$16 sps:$4 sm:$0xff]  }
 0x48c   :  { %3349 = vmatpush2.bf16.msra.mxu0 %v3036_v42  ;;  %4248 = vmatpush2.bf16.msra.mxu1 %v3036_v42  ;;  %v4515_v42 = vld [vmem:[%s6973_s1 + $0x280] ss:$16 sps:$4 sm:$0xff]  }
 0x48d   :  { %3350 = vmatprep.subr.bf16.mxu0 %v7166_v22  ;;  %4233 = vmatprep.subr.bf16.mxu1 %v7166_v22 }
 0x48e   :  { %3183 = vmatprep.mubr.bf16.mxu0 %v4494_v59  ;;  %v4518_v59 = vld [vmem:[%s6973_s1 + $0x10c] ss:$16 sps:$4 sm:$0xff]  }
 0x490   :  { %3351 = vmatpush2.bf16.msra.mxu0 %v3035_v11  ;;  %4249 = vmatpush2.bf16.msra.mxu1 %v3035_v11  ;;  %v4517_v11 = vld [vmem:[%s6973_s1 + $0x2a4] ss:$16 sps:$4 sm:$0xff]  }
 0x491   :  { %3352 = vmatprep.subr.bf16.mxu0 %v7166_v22  ;;  %4234 = vmatprep.subr.bf16.mxu1 %v7166_v22 }
 0x493   :  { %3184 = vmatmul.mubr.bf16.gmra.mxu0 %v4495_v19  ;;  %v4520_v19 = vld [vmem:[%s6973_s1 + $0x108] ss:$16 sps:$4 sm:$0xff]  }
 0x494   :  { %3353 = vmatpush2.bf16.msra.mxu0 %v3034_v38  ;;  %4250 = vmatpush2.bf16.msra.mxu1 %v3034_v38  ;;  %v4519_v38 = vld [vmem:[%s6973_s1 + $0x2a0] ss:$16 sps:$4 sm:$0xff]  }
 0x495   :  { %3354 = vmatprep.subr.bf16.mxu0 %v7166_v22  ;;  %4235 = vmatprep.subr.bf16.mxu1 %v7166_v22 }
 0x496   :  { %3191 = vmatprep.mubr.bf16.mxu0 %v4496_v30  ;;  %v4522_v30 = vld [vmem:[%s6973_s1 + $0x12c] ss:$16 sps:$4 sm:$0xff]  }
 0x498   :  { %3355 = vmatpush2.bf16.msra.mxu0 %v3033_v1  ;;  %4251 = vmatpush2.bf16.msra.mxu1 %v3033_v1  ;;  %v4521_v1 = vld [vmem:[%s6973_s1 + $0x2c4] ss:$16 sps:$4 sm:$0xff]  }
 0x499   :  { %3356 = vmatprep.subr.bf16.mxu0 %v7166_v22  ;;  %4236 = vmatprep.subr.bf16.mxu1 %v7166_v22 }
 0x49b   :  { %3192 = vmatmul.mubr.bf16.gmra.mxu0 %v4497_v20  ;;  %v4524_v20 = vld [vmem:[%s6973_s1 + $0x128] ss:$16 sps:$4 sm:$0xff]  }
 0x49c   :  { %3357 = vmatpush2.bf16.msra.mxu0 %v3032_v4  ;;  %4252 = vmatpush2.bf16.msra.mxu1 %v3032_v4  ;;  %v4523_v4 = vld [vmem:[%s6973_s1 + $0x2c0] ss:$16 sps:$4 sm:$0xff]  }
 0x49d   :  { %3358 = vmatprep.subr.bf16.mxu0 %v7166_v22  ;;  %4237 = vmatprep.subr.bf16.mxu1 %v7166_v22  ;;  %v4501_v22 = vld [vmem:[%s6973_s1 + $0x224] ss:$16 sps:$4 sm:$0xff]  }
 0x49e   :  { %3199 = vmatprep.mubr.bf16.mxu0 %v4498_v31  ;;  %v4526_v31 = vld [vmem:[%s6973_s1 + $0x14c] ss:$16 sps:$4 sm:$0xff]  }
 0x4a0   :  { %3359 = vmatpush2.bf16.msra.mxu0 %v3031_v58  ;;  %4253 = vmatpush2.bf16.msra.mxu1 %v3031_v58  ;;  %v4525_v58 = vld [vmem:[%s6973_s1 + $0x2e4] ss:$16 sps:$4 sm:$0xff]  }
 0x4a3   :  { %3200 = vmatmul.mubr.bf16.gmra.mxu0 %v4499_v23  ;;  %3385 = vmatmul.mubr.bf16.vlgmr.msra.gmra.mxu1 %v4500_v24  ;;  %v4527_v23 = vld [vmem:[%s6973_s1 + $0x2e0] ss:$16 sps:$4 sm:$0xff]   ;;  %v4528_v24 = vld [vmem:[%s6973_s1 + $0x148] ss:$16 sps:$4 sm:$0xff]  }
 0x4a4   :  { %3207 = vmatprep.mubr.bf16.mxu0 %v4501_v22  ;;  %3392 = vmatprep.mubr.bf16.mxu1 %v4502_v18  ;;  %v4529_v22 = vld [vmem:[%s6973_s1 + $0x304] ss:$16 sps:$4 sm:$0xff]   ;;  %v4530_v18 = vld [vmem:[%s6973_s1 + $0x16c] ss:$16 sps:$4 sm:$0xff]  }
 0x4ab   :  { %3208 = vmatmul.mubr.bf16.gmra.mxu0 %v4503_v43  ;;  %3393 = vmatmul.mubr.bf16.gmra.mxu1 %v4504_v5  ;;  %v4531_v5 = vld [vmem:[%s6973_s1 + $0x300] ss:$16 sps:$4 sm:$0xff]  }
 0x4ac   :  { %3215 = vmatprep.mubr.bf16.mxu0 %v4505_v50  ;;  %3400 = vmatprep.mubr.bf16.mxu1 %v4506_v12  ;;  %v4532_v50 = vld [vmem:[%s6973_s1 + $0x168] ss:$16 sps:$4 sm:$0xff]   ;;  %v4533_v12 = vld [vmem:[%s6973_s1 + $0x324] ss:$16 sps:$4 sm:$0xff]  }
 0x4b3   :  { %3216 = vmatmul.mubr.bf16.gmra.mxu0 %v4507_v53  ;;  %3401 = vmatmul.mubr.bf16.gmra.mxu1 %v4508_v49  ;;  %v4534_v53 = vld [vmem:[%s6973_s1 + $0x18c] ss:$16 sps:$4 sm:$0xff]  }
 0x4b4   :  { %3223 = vmatprep.mubr.bf16.mxu0 %v4509_v15  ;;  %3408 = vmatprep.mubr.bf16.mxu1 %v4510_v44 }
 0x4bb   :  { %3224 = vmatmul.mubr.bf16.gmra.mxu0 %v4511_v21  ;;  %3409 = vmatmul.mubr.bf16.gmra.mxu1 %v4512_v3  ;;  %v4535_v3 = vld [vmem:[%s6973_s1 + $0x320] ss:$16 sps:$4 sm:$0xff]  }
 0x4bc   :  { %3231 = vmatprep.mubr.bf16.mxu0 %v4513_v13  ;;  %3416 = vmatprep.mubr.bf16.mxu1 %v4514_v14  ;;  %v4536_v13 = vld [vmem:[%s6973_s1 + $0x188] ss:$16 sps:$4 sm:$0xff]   ;;  %v4537_v14 = vld [vmem:[%s6973_s1 + $0x344] ss:$16 sps:$4 sm:$0xff]  }
 0x4c3   :  { %3232 = vmatmul.mubr.bf16.gmra.mxu0 %v4515_v42  ;;  %3417 = vmatmul.mubr.bf16.gmra.mxu1 %v4516_v9  ;;  %v4538_v42 = vld [vmem:[%s6973_s1 + $0x1ac] ss:$16 sps:$4 sm:$0xff]  }
 0x4c4   :  { %3239 = vmatprep.mubr.bf16.mxu0 %v4517_v11  ;;  %3424 = vmatprep.mubr.bf16.mxu1 %v4518_v59 }
 0x4cb   :  { %3240 = vmatmul.mubr.bf16.gmra.mxu0 %v4519_v38  ;;  %3425 = vmatmul.mubr.bf16.gmra.mxu1 %v4520_v19  ;;  %v4539_v19 = vld [vmem:[%s6973_s1 + $0x340] ss:$16 sps:$4 sm:$0xff]  }
 0x4cc   :  { %3247 = vmatprep.mubr.bf16.mxu0 %v4521_v1  ;;  %3432 = vmatprep.mubr.bf16.mxu1 %v4522_v30  ;;  %v4540_v1 = vld [vmem:[%s6973_s1 + $0x1a8] ss:$16 sps:$4 sm:$0xff]   ;;  %v4541_v30 = vld [vmem:[%s6973_s1 + $0x364] ss:$16 sps:$4 sm:$0xff]  }
 0x4d3   :  { %3248 = vmatmul.mubr.bf16.gmra.mxu0 %v4523_v4  ;;  %3433 = vmatmul.mubr.bf16.gmra.mxu1 %v4524_v20  ;;  %v4542_v4 = vld [vmem:[%s6973_s1 + $0x1cc] ss:$16 sps:$4 sm:$0xff]  }
 0x4d4   :  { %3255 = vmatprep.mubr.bf16.mxu0 %v4525_v58  ;;  %3440 = vmatprep.mubr.bf16.mxu1 %v4526_v31 }
 0x4db   :  { %3256 = vmatmul.mubr.bf16.gmra.mxu0 %v4527_v23  ;;  %3441 = vmatmul.mubr.bf16.gmra.mxu1 %v4528_v24  ;;  %v4543_v24 = vld [vmem:[%s6973_s1 + $0x360] ss:$16 sps:$4 sm:$0xff]  }
 0x4dc   :  { %3263 = vmatprep.mubr.bf16.mxu0 %v4529_v22  ;;  %3448 = vmatprep.mubr.bf16.mxu1 %v4530_v18  ;;  %v4544_v22 = vld [vmem:[%s6973_s1 + $0x1c8] ss:$16 sps:$4 sm:$0xff]   ;;  %v4545_v18 = vld [vmem:[%s6973_s1 + $0x384] ss:$16 sps:$4 sm:$0xff]  }
 0x4e3   :  { %v6458_v43 = vpop.f32.mrf.mxu0  ;;  %3264 = vmatmul.mubr.bf16.gmra.mxu0 %v4531_v5  ;;  %3449 = vmatmul.mubr.bf16.gmra.mxu1 %v4532_v50  ;;  %v4546_v5 = vld [vmem:[%s6973_s1 + $0x1ec] ss:$16 sps:$4 sm:$0xff]  }
 0x4e4   :  { %7167 = vst [vmem:[#allocation48_spill] sm:$0xff] %v6458_v43  ;;  %3271 = vmatprep.mubr.bf16.mxu0 %v4533_v12  ;;  %3456 = vmatprep.mubr.bf16.mxu1 %v4534_v53 }
 0x4e5   :  { %v3075_v49 = vpop.f32.mrf.mxu0 }
 0x4e7   :  { %v6472_v15 = vpop.f32.mrf.mxu0 }
 0x4e8   :  { %7168 = vst [vmem:[#allocation49_spill] sm:$0xff] %v6472_v15 }
 0x4e9   :  { %v3078_v44 = vpop.f32.mrf.mxu0 }
 0x4ea   :  { %v4547_v44 = vld [vmem:[%s6973_s1 + $0x380] ss:$16 sps:$4 sm:$0xff]  }
 0x4eb   :  { %v6474_v21 = vpop.f32.mrf.mxu0  ;;  %3272 = vmatmul.mubr.bf16.gmra.mxu0 %v4535_v3  ;;  %3457 = vmatmul.mubr.bf16.gmra.mxu1 %v4536_v13  ;;  %v4548_v3 = vld [vmem:[%s6973_s1 + $0x1e8] ss:$16 sps:$4 sm:$0xff]   ;;  %v4549_v13 = vld [vmem:[%s6973_s1 + $0x3a4] ss:$16 sps:$4 sm:$0xff]  }
 0x4ec   :  { %7169 = vst [vmem:[#allocation50_spill] sm:$0xff] %v6474_v21  ;;  %3279 = vmatprep.mubr.bf16.mxu0 %v4537_v14  ;;  %3464 = vmatprep.mubr.bf16.mxu1 %v4538_v42  ;;  %v4550_v14 = vld [vmem:[%s6973_s1 + $0x20c] ss:$16 sps:$4 sm:$0xff]  }
 0x4ed   :  { %v3083_v9 = vpop.f32.mrf.mxu0 }
 0x4ef   :  { %v6488_v11 = vpop.f32.mrf.mxu0 }
 0x4f0   :  { %7170 = vst [vmem:[#allocation51_spill] sm:$0xff] %v6488_v11 }
 0x4f1   :  { %v3086_v59 = vpop.f32.mrf.mxu0 }
 0x4f3   :  { %v6490_v38 = vpop.f32.mrf.mxu0  ;;  %3280 = vmatmul.mubr.bf16.gmra.mxu0 %v4539_v19  ;;  %3465 = vmatmul.mubr.bf16.gmra.mxu1 %v4540_v1  ;;  %v4551_v1 = vld [vmem:[%s6973_s1 + $0x3a0] ss:$16 sps:$4 sm:$0xff]  }
 0x4f4   :  { %7171 = vst [vmem:[#allocation52_spill] sm:$0xff] %v6490_v38  ;;  %3287 = vmatprep.mubr.bf16.mxu0 %v4541_v30  ;;  %3472 = vmatprep.mubr.bf16.mxu1 %v4542_v4  ;;  %v4552_v30 = vld [vmem:[%s6973_s1 + $0x208] ss:$16 sps:$4 sm:$0xff]   ;;  %v4553_v4 = vld [vmem:[%s6973_s1 + $0x3c4] ss:$16 sps:$4 sm:$0xff]  }
 0x4f5   :  { %v3091_v20 = vpop.f32.mrf.mxu0 }
 0x4f6   :  { %v4554_v20 = vld [vmem:[%s6973_s1 + $0x22c] ss:$16 sps:$4 sm:$0xff]  }
 0x4f7   :  { %v6504_v58 = vpop.f32.mrf.mxu0 }
 0x4f8   :  { %7172 = vst [vmem:[#allocation53_spill] sm:$0xff] %v6504_v58 }
 0x4f9   :  { %v3094_v31 = vpop.f32.mrf.mxu0 }
 0x4fb   :  { %v6506_v23 = vpop.f32.mrf.mxu0  ;;  %3288 = vmatmul.mubr.bf16.gmra.mxu0 %v4543_v24  ;;  %3473 = vmatmul.mubr.bf16.gmra.mxu1 %v4544_v22 }
 0x4fc   :  { %3295 = vmatprep.mubr.bf16.mxu0 %v4545_v18  ;;  %3480 = vmatprep.mubr.bf16.mxu1 %v4546_v5  ;;  %v4555_v5 = vld [vmem:[%s6973_s1 + $0x3c0] ss:$16 sps:$4 sm:$0xff]  }
 0x4fd   :  { %v3099_v50 = vpop.f32.mrf.mxu0 }
 0x4fe   :  { %v4556_v50 = vld [vmem:[%s6973_s1 + $0x228] ss:$16 sps:$4 sm:$0xff]  }
 0x4ff   :  { %v6520_v12 = vpop.f32.mrf.mxu0 }
 0x501   :  { %v3102_v53 = vpop.f32.mrf.mxu0 }
 0x502   :  { %v4557_v53 = vld [vmem:[%s6973_s1 + $0x3e4] ss:$16 sps:$4 sm:$0xff]  }
 0x503   :  { %v6522_v49 = vpop.f32.mrf.mxu0  ;;  %3296 = vmatmul.mubr.bf16.gmra.mxu0 %v4547_v44  ;;  %3481 = vmatmul.mubr.bf16.gmra.mxu1 %v4548_v3  ;;  %v4558_v44 = vld [vmem:[%s6973_s1 + $0x24c] ss:$16 sps:$4 sm:$0xff]  }
 0x504   :  { %3303 = vmatprep.mubr.bf16.mxu0 %v4549_v13  ;;  %3488 = vmatprep.mubr.bf16.mxu1 %v4550_v14 }
 0x505   :  { %v3107_v42 = vpop.f32.mrf.mxu0 }
 0x507   :  { %v6536_v9 = vpop.f32.mrf.mxu0 }
 0x509   :  { %v3110_v59 = vpop.f32.mrf.mxu0 }
 0x50a   :  { %v4559_v59 = vld [vmem:[%s6973_s1 + $0x3e0] ss:$16 sps:$4 sm:$0xff]  }
 0x50b   :  { %v6538_v19 = vpop.f32.mrf.mxu0  ;;  %3304 = vmatmul.mubr.bf16.gmra.mxu0 %v4551_v1  ;;  %3489 = vmatmul.mubr.bf16.gmra.mxu1 %v4552_v30  ;;  %v4560_v1 = vld [vmem:[%s6973_s1 + $0x248] ss:$16 sps:$4 sm:$0xff]   ;;  %v4561_v30 = vld [vmem:[%s6973_s1 + $0xc] ss:$16 sps:$4 sm:$0xff]  }
 0x50c   :  { %3311 = vmatprep.mubr.bf16.mxu0 %v4553_v4  ;;  %3496 = vmatprep.mubr.bf16.mxu1 %v4554_v20  ;;  %v4562_v4 = vld [vmem:[%s6973_s1 + $0x26c] ss:$16 sps:$4 sm:$0xff]  }
 0x50d   :  { %v3115_v31 = vpop.f32.mrf.mxu0 }
 0x50f   :  { %v6552_v24 = vpop.f32.mrf.mxu0 }
 0x511   :  { %v3118_v22 = vpop.f32.mrf.mxu0 }
 0x513   :  { %v6554_v18 = vpop.f32.mrf.mxu0  ;;  %3312 = vmatmul.mubr.bf16.gmra.mxu0 %v4555_v5  ;;  %3497 = vmatmul.mubr.bf16.gmra.mxu1 %v4556_v50  ;;  %v4563_v50 = vld [vmem:[%s6973_s1 + $0x8] ss:$16 sps:$4 sm:$0xff]  }
 0x514   :  { %3319 = vmatprep.mubr.bf16.mxu0 %v4557_v53  ;;  %3504 = vmatprep.mubr.bf16.mxu1 %v4558_v44  ;;  %v4564_v53 = vld [vmem:[%s6973_s1 + $0x268] ss:$16 sps:$4 sm:$0xff]   ;;  %v4565_v44 = vld [vmem:[%s6973_s1 + $0x2c] ss:$16 sps:$4 sm:$0xff]  }
 0x515   :  { %v3123_v3 = vpop.f32.mrf.mxu0 }
 0x516   :  { %v4566_v3 = vld [vmem:[%s6973_s1 + $0x28c] ss:$16 sps:$4 sm:$0xff]  }
 0x517   :  { %v6568_v13 = vpop.f32.mrf.mxu0 }
 0x519   :  { %v3126_v14 = vpop.f32.mrf.mxu0 }
 0x51b   :  { %v6570_v42 = vpop.f32.mrf.mxu0  ;;  %3320 = vmatmul.mubr.bf16.gmra.mxu0 %v4559_v59  ;;  %3505 = vmatmul.mubr.bf16.gmra.mxu1 %v4560_v1 }
 0x51c   :  { %3360 = vmatprep.mubr.bf16.mxu0 %v4561_v30  ;;  %3512 = vmatprep.mubr.bf16.mxu1 %v4562_v4  ;;  %v4567_v4 = vld [vmem:[%s6973_s1 + $0x28] ss:$16 sps:$4 sm:$0xff]  }
 0x51d   :  { %v3131_v20 = vpop.f32.mrf.mxu0 }
 0x51e   :  { %v4568_v20 = vld [vmem:[%s6973_s1 + $0x288] ss:$16 sps:$4 sm:$0xff]  }
 0x51f   :  { %v6584_v31 = vpop.f32.mrf.mxu0 }
 0x521   :  { %v3134_v22 = vpop.f32.mrf.mxu0 }
 0x522   :  { %v4569_v22 = vld [vmem:[%s6973_s1 + $0x4c] ss:$16 sps:$4 sm:$0xff]  }
 0x523   :  { %v6586_v5 = vpop.f32.mrf.mxu0  ;;  %3361 = vmatmul.mubr.bf16.vlgmr.msra.gmra.mxu0 %v4563_v50  ;;  %3513 = vmatmul.mubr.bf16.gmra.mxu1 %v4564_v53  ;;  %v4570_v50 = vld [vmem:[%s6973_s1 + $0x2ac] ss:$16 sps:$4 sm:$0xff]  }
 0x524   :  { %3368 = vmatprep.mubr.bf16.mxu0 %v4565_v44  ;;  %3520 = vmatprep.mubr.bf16.mxu1 %v4566_v3 }
 0x525   :  { %v3139_v14 = vpop.f32.mrf.mxu0 }
 0x527   :  { %v6600_v59 = vpop.f32.mrf.mxu0 }
 0x529   :  { %v3142_v1 = vpop.f32.mrf.mxu0 }
 0x52a   :  { %v4571_v1 = vld [vmem:[%s6973_s1 + $0x48] ss:$16 sps:$4 sm:$0xff]  }
 0x52b   :  { %v6602_v30 = vpop.f32.mrf.mxu0  ;;  %3369 = vmatmul.mubr.bf16.gmra.mxu0 %v4567_v4  ;;  %3521 = vmatmul.mubr.bf16.gmra.mxu1 %v4568_v20  ;;  %v4572_v4 = vld [vmem:[%s6973_s1 + $0x2a8] ss:$16 sps:$4 sm:$0xff]   ;;  %v4573_v20 = vld [vmem:[%s6973_s1 + $0x2cc] ss:$16 sps:$4 sm:$0xff]  }
 0x52c   :  { %3376 = vmatprep.mubr.bf16.mxu0 %v4569_v22  ;;  %3528 = vmatprep.mubr.bf16.mxu1 %v4570_v50 }
 0x52d   :  { %v3147_v53 = vpop.f32.mrf.mxu0 }
 0x52f   :  { %v6616_v44 = vpop.f32.mrf.mxu0 }
 0x531   :  { %v3150_v3 = vpop.f32.mrf.mxu0 }
 0x533   :  { %v6618_v14 = vpop.f32.mrf.mxu0  ;;  %3377 = vmatmul.mubr.bf16.gmra.mxu0 %v4571_v1  ;;  %3529 = vmatmul.mubr.bf16.gmra.mxu1 %v4572_v4  ;;  %v4574_v1 = vld [vmem:[%s6973_s1 + $0x2c8] ss:$16 sps:$4 sm:$0xff]   ;;  %v4575_v4 = vld [vmem:[%s6973_s1 + $0x2ec] ss:$16 sps:$4 sm:$0xff]  }
 0x534   :  { %3536 = vmatprep.mubr.bf16.mxu1 %v4573_v20 }
 0x535   :  { %v3155_v22 = vpop.f32.mrf.mxu0 }
 0x537   :  { %v6629_v50 = vpop.f32.mrf.mxu0 }
 0x539   :  { %v3158_v53 = vpop.f32.mrf.mxu0 }
 0x53a   :  { %v4576_v53 = vld [vmem:[%s6973_s1 + $0x2e8] ss:$16 sps:$4 sm:$0xff]  }
 0x53b   :  { %v6631_v3 = vpop.f32.mrf.mxu0  ;;  %3537 = vmatmul.mubr.bf16.gmra.mxu1 %v4574_v1  ;;  %v4577_v1 = vld [vmem:[%s6973_s1 + $0x30c] ss:$16 sps:$4 sm:$0xff]  }
 0x53c   :  { %3544 = vmatprep.mubr.bf16.mxu1 %v4575_v4 }
 0x53d   :  { %v3163_v52 = vpop.f32.mrf.mxu0 }
 0x53f   :  { %v6639_v6 = vpop.f32.mrf.mxu0 }
 0x541   :  { %v3166_v20 = vpop.f32.mrf.mxu0 }
 0x542   :  { %v4578_v20 = vld [vmem:[%s6973_s1 + $0x308] ss:$16 sps:$4 sm:$0xff]  }
 0x543   :  { %v6641_v22 = vpop.f32.mrf.mxu0  ;;  %3545 = vmatmul.mubr.bf16.gmra.mxu1 %v4576_v53  ;;  %v4579_v53 = vld [vmem:[%s6973_s1 + $0x32c] ss:$16 sps:$4 sm:$0xff]  }
 0x544   :  { %3552 = vmatprep.mubr.bf16.mxu1 %v4577_v1 }
 0x545   :  { %v3171_v63 = vpop.f32.mrf.mxu0 }
 0x547   :  { %v6649_v0 = vpop.f32.mrf.mxu0 }
 0x549   :  { %v3174_v4 = vpop.f32.mrf.mxu0 }
 0x54a   :  { %v4580_v4 = vld [vmem:[%s6973_s1 + $0x328] ss:$16 sps:$4 sm:$0xff]  }
 0x54b   :  { %v6651_v52 = vpop.f32.mrf.mxu0  ;;  %3553 = vmatmul.mubr.bf16.gmra.mxu1 %v4578_v20  ;;  %v4581_v20 = vld [vmem:[%s6973_s1 + $0x34c] ss:$16 sps:$4 sm:$0xff]  }
 0x54c   :  { %3560 = vmatprep.mubr.bf16.mxu1 %v4579_v53 }
 0x54d   :  { %v3179_v29 = vpop.f32.mrf.mxu0 }
 0x54f   :  { %v6659_v10 = vpop.f32.mrf.mxu0 }
 0x551   :  { %v3182_v1 = vpop.f32.mrf.mxu0 }
 0x552   :  { %v4582_v1 = vld [vmem:[%s6973_s1 + $0x348] ss:$16 sps:$4 sm:$0xff]  }
 0x553   :  { %v6661_v63 = vpop.f32.mrf.mxu0  ;;  %3561 = vmatmul.mubr.bf16.gmra.mxu1 %v4580_v4  ;;  %v4583_v4 = vld [vmem:[%s6973_s1 + $0x36c] ss:$16 sps:$4 sm:$0xff]  }
 0x554   :  { %3568 = vmatprep.mubr.bf16.mxu1 %v4581_v20 }
 0x555   :  { %v3187_v32 = vpop.f32.mrf.mxu0 }
 0x557   :  { %v6669_v60 = vpop.f32.mrf.mxu0 }
 0x559   :  { %v3190_v53 = vpop.f32.mrf.mxu0 }
 0x55a   :  { %v4584_v53 = vld [vmem:[%s6973_s1 + $0x368] ss:$16 sps:$4 sm:$0xff]  }
 0x55b   :  { %v6671_v29 = vpop.f32.mrf.mxu0  ;;  %3569 = vmatmul.mubr.bf16.gmra.mxu1 %v4582_v1  ;;  %v4585_v1 = vld [vmem:[%s6973_s1 + $0x38c] ss:$16 sps:$4 sm:$0xff]  }
 0x55c   :  { %3576 = vmatprep.mubr.bf16.mxu1 %v4583_v4 }
 0x55d   :  { %v3195_v35 = vpop.f32.mrf.mxu0 }
 0x55e   :  { %v6693_v35 = vld [vmem:[%s6978_s6] ss:$0 sm:$0xff] }
 0x55f   :  { %v6679_v39 = vpop.f32.mrf.mxu0 }
 0x561   :  { %v3198_v20 = vpop.f32.mrf.mxu0 }
 0x563   :  { %v6681_v32 = vpop.f32.mrf.mxu0  ;;  %v3386_v51 = vpop.f32.mrf.mxu1  ;;  %3577 = vmatmul.mubr.bf16.gmra.mxu1 %v4584_v53 }
 0x564   :  { %v3387_v2 = vadd.f32 %v3386_v51, %v6506_v23  ;;  %3584 = vmatprep.mubr.bf16.mxu1 %v4585_v1 }
 0x565   :  { %v3203_v4 = vpop.f32.mrf.mxu0  ;;  %v3388_v20 = vpop.f32.mrf.mxu1 }
 0x566   :  { %v3623_v58 = vmul.f32 %v3387_v2, %v4929_v27  ;;  %v4586_v4 = vld [vmem:[%s6973_s1 + $0x388] ss:$16 sps:$4 sm:$0xff]  }
 0x567   :  { %v6696_v38 = vpop.f32.mrf.mxu0  ;;  %v3389_v11 = vpop.f32.mrf.mxu1 }
 0x568   :  { %v3693_v53 = vadd.f32 %v6693_v35, %v3623_v58  ;;  %v3390_v51 = vadd.f32 %v3389_v11, %v6520_v12  ;;  %v4587_v11 = vld [vmem:[%s6973_s1 + $0x3ac] ss:$16 sps:$4 sm:$0xff]  }
 0x569   :  { %v3206_v23 = vpop.f32.mrf.mxu0  ;;  %v3391_v21 = vpop.f32.mrf.mxu1 }
 0x56a   :  { %3757 = vst [vmem:[#allocation5 + $0x30] sm:$0xff] %v3693_v53  ;;  %v3624_v1 = vmul.f32 %v3390_v51, %v4927_v26 }
 0x56b   :  { %v6701_v15 = vpop.f32.mrf.mxu0  ;;  %v3394_v43 = vpop.f32.mrf.mxu1  ;;  %3585 = vmatmul.mubr.bf16.gmra.mxu1 %v4586_v4 }
 0x56c   :  { %v3694_v27 = vadd.f32 %v6693_v35, %v3624_v1  ;;  %v3395_v2 = vadd.f32 %v3394_v43, %v6522_v49  ;;  %3592 = vmatprep.mubr.bf16.mxu1 %v4587_v11 }
 0x56d   :  { %v3211_v21 = vpop.f32.mrf.mxu0  ;;  %v3396_v58 = vpop.f32.mrf.mxu1 }
 0x56e   :  { %3758 = vst [vmem:[#allocation5 + $0x38] sm:$0xff] %v3694_v27  ;;  %v3625_v26 = vmul.f32 %v3395_v2, %v4942_v34  ;;  %v4588_v27 = vld [vmem:[%s6973_s1 + $0x3a8] ss:$16 sps:$4 sm:$0xff]  }
 0x56f   :  { %v6712_v12 = vpop.f32.mrf.mxu0  ;;  %v3397_v20 = vpop.f32.mrf.mxu1 }
 0x570   :  { %v3695_v53 = vadd.f32 %v6693_v35, %v3625_v26  ;;  %v3398_v51 = vadd.f32 %v3397_v20, %v6536_v9  ;;  %v4589_v9 = vld [vmem:[%s6973_s1 + $0x3cc] ss:$16 sps:$4 sm:$0xff]  }
 0x571   :  { %v3214_v23 = vpop.f32.mrf.mxu0  ;;  %v3399_v1 = vpop.f32.mrf.mxu1 }
 0x572   :  { %3759 = vst [vmem:[#allocation5 + $0x40] sm:$0xff] %v3695_v53  ;;  %v3626_v43 = vmul.f32 %v3398_v51, %v4940_v33 }
 0x573   :  { %v6717_v49 = vpop.f32.mrf.mxu0  ;;  %v3402_v4 = vpop.f32.mrf.mxu1  ;;  %3593 = vmatmul.mubr.bf16.gmra.mxu1 %v4588_v27 }
 0x574   :  { %v3696_v34 = vadd.f32 %v6693_v35, %v3626_v43  ;;  %v3403_v2 = vadd.f32 %v3402_v4, %v6538_v19  ;;  %3600 = vmatprep.mubr.bf16.mxu1 %v4589_v9  ;;  %v4590_v4 = vld [vmem:[%s6973_s1 + $0x3c8] ss:$16 sps:$4 sm:$0xff]  }
 0x575   :  { %v3219_v11 = vpop.f32.mrf.mxu0  ;;  %v3404_v21 = vpop.f32.mrf.mxu1 }
 0x576   :  { %3760 = vst [vmem:[#allocation5 + $0x48] sm:$0xff] %v3696_v34  ;;  %v3627_v33 = vmul.f32 %v3403_v2, %v4955_v41 }
 0x577   :  { %v6728_v58 = vpop.f32.mrf.mxu0  ;;  %v3405_v26 = vpop.f32.mrf.mxu1 }
 0x578   :  { %v3697_v20 = vadd.f32 %v6693_v35, %v3627_v33  ;;  %v3406_v53 = vadd.f32 %v3405_v26, %v6552_v24  ;;  %v4591_v24 = vld [vmem:[%s6973_s1 + $0x3ec] ss:$16 sps:$4 sm:$0xff]  }
 0x579   :  { %v3222_v51 = vpop.f32.mrf.mxu0  ;;  %v3407_v23 = vpop.f32.mrf.mxu1 }
 0x57a   :  { %3761 = vst [vmem:[#allocation5 + $0x50] sm:$0xff] %v3697_v20  ;;  %v3628_v19 = vmul.f32 %v3406_v53, %v4953_v40  ;;  %v4592_v23 = vld [vmem:[%s6973_s1 + $0x3e8] ss:$16 sps:$4 sm:$0xff]   ;;  %s4641_s1 = smov [#allocation5]  }
 0x57b   :  { %v6733_v1 = vpop.f32.mrf.mxu0  ;;  %v3410_v43 = vpop.f32.mrf.mxu1  ;;  %3601 = vmatmul.mubr.bf16.gmra.mxu1 %v4590_v4  ;;  %s3820_s8 = sshll.u32 %s4641_s1, 4  ;;  %s3821_s8 = int_to_ptr.vmem [resolvable:$true] %s3820_s8 }
 0x57c   :  { %v3698_v41 = vadd.f32 %v6693_v35, %v3628_v19  ;;  %v3411_v27 = vadd.f32 %v3410_v43, %v6554_v18  ;;  %3608 = vmatprep.mubr.bf16.mxu1 %v4591_v24  ;;  %s4613_s9 = scalar_lea.vmem %s3821_s8, 8192  ;;  %p4618_p6 = scmp.lt.s32.totalorder %s3821_s8, %s3821_s8 }
 0x57d   :  { %v3227_v34 = vpop.f32.mrf.mxu0  ;;  %v3412_v2 = vpop.f32.mrf.mxu1  ;;  %p4614_p5 = scmp.ne.s32.totalorder %s3821_s8, %s4613_s9  ;;  %p4619_p7 = scmp.lt.s32.totalorder %s4613_s9, %s4613_s9 }
 0x57e   :  { %3762 = vst [vmem:[#allocation5 + $0x58] sm:$0xff] %v3698_v41  ;;  %v3629_v40 = vmul.f32 %v3411_v27, %v4968_v48 }
 0x57f   :  { %v6744_v9 = vpop.f32.mrf.mxu0  ;;  %v3413_v11 = vpop.f32.mrf.mxu1  ;;  %p4620_p8 = por %p4619_p7, %p4618_p6 }
 0x580   :  { %v3699_v21 = vadd.f32 %v6693_v35, %v3629_v40  ;;  %v3414_v33 = vadd.f32 %v3413_v11, %v6568_v13 }
 0x581   :  { %v3230_v26 = vpop.f32.mrf.mxu0  ;;  %v3415_v20 = vpop.f32.mrf.mxu1  ;;  %p4621_p9 = pnand %p4620_p8, %p4614_p5 }
 0x582   :  { %3763 = vst [vmem:[#allocation5 + $0x60] sm:$0xff] %v3699_v21  ;;  %v3630_v18 = vmul.f32 %v3414_v33, %v4966_v47 }
 0x583   :  { %v6749_v53 = vpop.f32.mrf.mxu0  ;;  %v3418_v51 = vpop.f32.mrf.mxu1  ;;  %3609 = vmatmul.mubr.bf16.gmra.mxu1 %v4592_v23 }
 0x584   :  { %v3700_v48 = vadd.f32 %v6693_v35, %v3630_v18  ;;  %v3419_v19 = vadd.f32 %v3418_v51, %v6570_v42 }
 0x585   :  { %v3235_v43 = vpop.f32.mrf.mxu0  ;;  %v3420_v4 = vpop.f32.mrf.mxu1 }
 0x586   :  { %3764 = vst [vmem:[#allocation5 + $0x68] sm:$0xff] %v3700_v48  ;;  %v3631_v13 = vmul.f32 %v3419_v19, %v4981_v55 }
 0x587   :  { %v6757_v41 = vpop.f32.mrf.mxu0  ;;  %v3421_v47 = vpop.f32.mrf.mxu1 }
 0x588   :  { %v3701_v27 = vadd.f32 %v6693_v35, %v3631_v13  ;;  %v3422_v24 = vadd.f32 %v3421_v47, %v6584_v31 }
 0x589   :  { %v3238_v34 = vpop.f32.mrf.mxu0  ;;  %v3423_v2 = vpop.f32.mrf.mxu1 }
 0x58a   :  { %3765 = vst [vmem:[#allocation5 + $0x70] sm:$0xff] %v3701_v27  ;;  %v3632_v40 = vmul.f32 %v3422_v24, %v4979_v54 }
 0x58b   :  { %v6762_v11 = vpop.f32.mrf.mxu0  ;;  %v3426_v42 = vpop.f32.mrf.mxu1 }
 0x58c   :  { %v3702_v21 = vadd.f32 %v6693_v35, %v3632_v40  ;;  %v3427_v33 = vadd.f32 %v3426_v42, %v6586_v5 }
 0x58d   :  { %v3243_v55 = vpop.f32.mrf.mxu0  ;;  %v3428_v26 = vpop.f32.mrf.mxu1 }
 0x58e   :  { %3766 = vst [vmem:[#allocation5 + $0x78] sm:$0xff] %v3702_v21  ;;  %v3633_v20 = vmul.f32 %v3427_v33, %v4994_v62 }
 0x58f   :  { %v6767_v18 = vpop.f32.mrf.mxu0  ;;  %v3429_v31 = vpop.f32.mrf.mxu1 }
 0x590   :  { %v3703_v51 = vadd.f32 %v6693_v35, %v3633_v20  ;;  %v3430_v23 = vadd.f32 %v3429_v31, %v6600_v59 }
 0x591   :  { %v3246_v54 = vpop.f32.mrf.mxu0  ;;  %v3431_v48 = vpop.f32.mrf.mxu1 }
 0x592   :  { %3767 = vst [vmem:[#allocation5 + $0x80] sm:$0xff] %v3703_v51  ;;  %v3634_v19 = vmul.f32 %v3430_v23, %v4992_v61 }
 0x593   :  { %v6772_v43 = vpop.f32.mrf.mxu0  ;;  %v3434_v5 = vpop.f32.mrf.mxu1 }
 0x594   :  { %v3704_v4 = vadd.f32 %v6693_v35, %v3634_v19  ;;  %v3435_v13 = vadd.f32 %v3434_v5, %v6602_v30 }
 0x595   :  { %v3251_v62 = vpop.f32.mrf.mxu0  ;;  %v3436_v47 = vpop.f32.mrf.mxu1 }
 0x596   :  { %3768 = vst [vmem:[#allocation5 + $0x88] sm:$0xff] %v3704_v4  ;;  %v3635_v27 = vmul.f32 %v3435_v13, %v5007_v8 }
 0x597   :  { %v6777_v24 = vpop.f32.mrf.mxu0  ;;  %v3437_v59 = vpop.f32.mrf.mxu1 }
 0x598   :  { %v3705_v34 = vadd.f32 %v6693_v35, %v3635_v27  ;;  %v3438_v2 = vadd.f32 %v3437_v59, %v6616_v44 }
 0x599   :  { %v3254_v61 = vpop.f32.mrf.mxu0  ;;  %v3439_v40 = vpop.f32.mrf.mxu1 }
 0x59a   :  { %3769 = vst [vmem:[#allocation5 + $0x90] sm:$0xff] %v3705_v34  ;;  %v3636_v42 = vmul.f32 %v3438_v2, %v5005_v7 }
 0x59b   :  { %v6782_v21 = vpop.f32.mrf.mxu0  ;;  %v3442_v30 = vpop.f32.mrf.mxu1 }
 0x59c   :  { %v3706_v33 = vadd.f32 %v6693_v35, %v3636_v42  ;;  %v3443_v55 = vadd.f32 %v3442_v30, %v6618_v14 }
 0x59d   :  { %v3259_v8 = vpop.f32.mrf.mxu0  ;;  %v3444_v26 = vpop.f32.mrf.mxu1 }
 0x59e   :  { %3770 = vst [vmem:[#allocation5 + $0x98] sm:$0xff] %v3706_v33  ;;  %v3637_v20 = vmul.f32 %v3443_v55, %v5020_v17 }
 0x59f   :  { %v6787_v31 = vpop.f32.mrf.mxu0  ;;  %v3445_v44 = vpop.f32.mrf.mxu1 }
 0x5a0   :  { %v3707_v51 = vadd.f32 %v6693_v35, %v3637_v20  ;;  %v3446_v23 = vadd.f32 %v3445_v44, %v6629_v50 }
 0x5a1   :  { %v3262_v7 = vpop.f32.mrf.mxu0  ;;  %v3447_v54 = vpop.f32.mrf.mxu1 }
 0x5a2   :  { %3771 = vst [vmem:[#allocation5 + $0xa0] sm:$0xff] %v3707_v51  ;;  %v3638_v48 = vmul.f32 %v3446_v23, %v5018_v16 }
 0x5a3   :  { %v6792_v19 = vpop.f32.mrf.mxu0  ;;  %v3450_v14 = vpop.f32.mrf.mxu1 }
 0x5a4   :  { %v3708_v5 = vadd.f32 %v6693_v35, %v3638_v48  ;;  %v3451_v4 = vadd.f32 %v3450_v14, %v6631_v3 }
 0x5a5   :  { %v3267_v17 = vpop.f32.mrf.mxu0  ;;  %v3452_v13 = vpop.f32.mrf.mxu1 }
 0x5a6   :  { %3772 = vst [vmem:[#allocation5 + $0xa8] sm:$0xff] %v3708_v5  ;;  %v3639_v62 = vmul.f32 %v3451_v4, %v5033_v28 }
 0x5a7   :  { %v6797_v47 = vpop.f32.mrf.mxu0  ;;  %v3453_v50 = vpop.f32.mrf.mxu1 }
 0x5a8   :  { %v3709_v27 = vadd.f32 %v6693_v35, %v3639_v62  ;;  %v3454_v59 = vadd.f32 %v3453_v50, %v6639_v6 }
 0x5a9   :  { %v3270_v16 = vpop.f32.mrf.mxu0  ;;  %v3455_v34 = vpop.f32.mrf.mxu1 }
 0x5aa   :  { %3773 = vst [vmem:[#allocation5 + $0xb0] sm:$0xff] %v3709_v27  ;;  %v3640_v2 = vmul.f32 %v3454_v59, %v5031_v25 }
 0x5ab   :  { %v6802_v61 = vpop.f32.mrf.mxu0  ;;  %v3458_v3 = vpop.f32.mrf.mxu1 }
 0x5ac   :  { %v3710_v40 = vadd.f32 %v6693_v35, %v3640_v2  ;;  %v3459_v42 = vadd.f32 %v3458_v3, %v6641_v22 }
 0x5ad   :  { %v3275_v28 = vpop.f32.mrf.mxu0  ;;  %v3460_v30 = vpop.f32.mrf.mxu1 }
 0x5ae   :  { %3774 = vst [vmem:[#allocation5 + $0xb8] sm:$0xff] %v3710_v40  ;;  %v3641_v33 = vmul.f32 %v3459_v42, %v5046_v37 }
 0x5af   :  { %v6807_v55 = vpop.f32.mrf.mxu0  ;;  %v3461_v6 = vpop.f32.mrf.mxu1 }
 0x5b0   :  { %v3711_v8 = vadd.f32 %v6693_v35, %v3641_v33  ;;  %v3462_v26 = vadd.f32 %v3461_v6, %v6649_v0 }
 0x5b1   :  { %v3278_v25 = vpop.f32.mrf.mxu0  ;;  %v3463_v20 = vpop.f32.mrf.mxu1 }
 0x5b2   :  { %3775 = vst [vmem:[#allocation5 + $0xc0] sm:$0xff] %v3711_v8  ;;  %v3642_v44 = vmul.f32 %v3462_v26, %v5044_v36  ;;  %v7173_v8 = vld [vmem:[#allocation15_spill] sm:$0xff] }
 0x5b3   :  { %v6812_v51 = vpop.f32.mrf.mxu0  ;;  %v3466_v22 = vpop.f32.mrf.mxu1 }
 0x5b4   :  { %v3712_v23 = vadd.f32 %v6693_v35, %v3642_v44  ;;  %v3467_v7 = vadd.f32 %v3466_v22, %v6651_v52 }
 0x5b5   :  { %v3283_v37 = vpop.f32.mrf.mxu0  ;;  %v3468_v54 = vpop.f32.mrf.mxu1 }
 0x5b6   :  { %3776 = vst [vmem:[#allocation5 + $0xc8] sm:$0xff] %v3712_v23  ;;  %v3643_v48 = vmul.f32 %v3467_v7, %v5059_v46  ;;  %v7174_v23 = vld [vmem:[#allocation14_spill] sm:$0xff] }
 0x5b7   :  { %v6817_v14 = vpop.f32.mrf.mxu0  ;;  %v3469_v0 = vpop.f32.mrf.mxu1 }
 0x5b8   :  { %v3713_v5 = vadd.f32 %v6693_v35, %v3643_v48  ;;  %v3470_v4 = vadd.f32 %v3469_v0, %v6659_v10 }
 0x5b9   :  { %v3286_v36 = vpop.f32.mrf.mxu0  ;;  %v3471_v17 = vpop.f32.mrf.mxu1 }
 0x5ba   :  { %3777 = vst [vmem:[#allocation5 + $0xd0] sm:$0xff] %v3713_v5  ;;  %v3644_v13 = vmul.f32 %v3470_v4, %v5057_v45  ;;  %v7175_v4 = vld [vmem:[#allocation17_spill] sm:$0xff] }
 0x5bb   :  { %v6822_v62 = vpop.f32.mrf.mxu0  ;;  %v3474_v52 = vpop.f32.mrf.mxu1 }
 0x5bc   :  { %v3714_v50 = vadd.f32 %v6693_v35, %v3644_v13  ;;  %v3475_v27 = vadd.f32 %v3474_v52, %v6661_v63 }
 0x5bd   :  { %v3291_v46 = vpop.f32.mrf.mxu0  ;;  %v3476_v59 = vpop.f32.mrf.mxu1 }
 0x5be   :  { %3778 = vst [vmem:[#allocation5 + $0xd8] sm:$0xff] %v3714_v50  ;;  %v3645_v16 = vmul.f32 %v3475_v27, %v5072_v57  ;;  %v7176_v46 = vld [vmem:[#allocation16_spill] sm:$0xff] }
 0x5bf   :  { %v6827_v34 = vpop.f32.mrf.mxu0  ;;  %v3477_v10 = vpop.f32.mrf.mxu1 }
 0x5c0   :  { %v3715_v2 = vadd.f32 %v6693_v35, %v3645_v16  ;;  %v3478_v3 = vadd.f32 %v3477_v10, %v6669_v60 }
 0x5c1   :  { %v3294_v45 = vpop.f32.mrf.mxu0  ;;  %v3479_v40 = vpop.f32.mrf.mxu1 }
 0x5c2   :  { %3779 = vst [vmem:[#allocation5 + $0xe0] sm:$0xff] %v3715_v2  ;;  %v3646_v42 = vmul.f32 %v3478_v3, %v5070_v56  ;;  %v7177_v40 = vld [vmem:[#allocation19_spill] sm:$0xff] }
 0x5c3   :  { %v6832_v28 = vpop.f32.mrf.mxu0  ;;  %v3482_v63 = vpop.f32.mrf.mxu1 }
 0x5c4   :  { %v3716_v30 = vadd.f32 %v6693_v35, %v3646_v42  ;;  %v3483_v33 = vadd.f32 %v3482_v63, %v6671_v29 }
 0x5c5   :  { %v3299_v57 = vpop.f32.mrf.mxu0  ;;  %v3484_v6 = vpop.f32.mrf.mxu1 }
 0x5c6   :  { %3780 = vst [vmem:[#allocation5 + $0xe8] sm:$0xff] %v3716_v30  ;;  %v3647_v26 = vmul.f32 %v3483_v33, %v7173_v8  ;;  %v7178_v8 = vld [vmem:[#allocation18_spill] sm:$0xff] }
 0x5c7   :  { %v6837_v25 = vpop.f32.mrf.mxu0  ;;  %v3485_v60 = vpop.f32.mrf.mxu1 }
 0x5c8   :  { %v3717_v20 = vadd.f32 %v6693_v35, %v3647_v26  ;;  %v3486_v44 = vadd.f32 %v3485_v60, %v6679_v39 }
 0x5c9   :  { %v3302_v56 = vpop.f32.mrf.mxu0  ;;  %v3487_v22 = vpop.f32.mrf.mxu1 }
 0x5ca   :  { %3781 = vst [vmem:[#allocation5 + $0xf0] sm:$0xff] %v3717_v20  ;;  %v3648_v7 = vmul.f32 %v3486_v44, %v7174_v23  ;;  %v7179_v23 = vld [vmem:[#allocation21_spill] sm:$0xff] }
 0x5cb   :  { %v6842_v37 = vpop.f32.mrf.mxu0  ;;  %v3490_v29 = vpop.f32.mrf.mxu1 }
 0x5cc   :  { %v3718_v54 = vadd.f32 %v6693_v35, %v3648_v7  ;;  %v3491_v48 = vadd.f32 %v3490_v29, %v6681_v32 }
 0x5cd   :  { %v3307_v0 = vpop.f32.mrf.mxu0  ;;  %v3492_v5 = vpop.f32.mrf.mxu1 }
 0x5ce   :  { %3782 = vst [vmem:[#allocation5 + $0xf8] sm:$0xff] %v3718_v54  ;;  %v3649_v36 = vmul.f32 %v3491_v48, %v7175_v4  ;;  %v7180_v4 = vld [vmem:[#allocation20_spill] sm:$0xff] }
 0x5cf   :  { %v6847_v17 = vpop.f32.mrf.mxu0  ;;  %v3493_v39 = vpop.f32.mrf.mxu1 }
 0x5d0   :  { %v3719_v13 = vadd.f32 %v6693_v35, %v3649_v36  ;;  %v3494_v52 = vadd.f32 %v3493_v39, %v6696_v38 }
 0x5d1   :  { %v3310_v50 = vpop.f32.mrf.mxu0  ;;  %v3495_v27 = vpop.f32.mrf.mxu1 }
 0x5d2   :  { %3783 = vst [vmem:[#allocation5 + $0x100] sm:$0xff] %v3719_v13  ;;  %v3650_v59 = vmul.f32 %v3494_v52, %v7176_v46  ;;  %v7181_v52 = vld [vmem:[#allocation48_spill] sm:$0xff] }
 0x5d3   :  { %v6852_v16 = vpop.f32.mrf.mxu0  ;;  %v3498_v32 = vpop.f32.mrf.mxu1 }
 0x5d4   :  { %v3720_v10 = vadd.f32 %v6693_v35, %v3650_v59  ;;  %v3499_v2 = vadd.f32 %v3498_v32, %v6701_v15  ;;  %v7182_v32 = vld [vmem:[#allocation9_spill] sm:$0xff] }
 0x5d5   :  { %v3315_v3 = vpop.f32.mrf.mxu0  ;;  %v3500_v45 = vpop.f32.mrf.mxu1 }
 0x5d6   :  { %3784 = vst [vmem:[#allocation5 + $0x108] sm:$0xff] %v3720_v10  ;;  %v3651_v42 = vmul.f32 %v3499_v2, %v7177_v40  ;;  %v7183_v2 = vld [vmem:[#allocation23_spill] sm:$0xff] }
 0x5d7   :  { %v6857_v63 = vpop.f32.mrf.mxu0  ;;  %v3501_v38 = vpop.f32.mrf.mxu1 }
 0x5d8   :  { %v3721_v30 = vadd.f32 %v6693_v35, %v3651_v42  ;;  %v3502_v33 = vadd.f32 %v3501_v38, %v6712_v12  ;;  %v7184_v38 = vld [vmem:[#allocation49_spill] sm:$0xff] }
 0x5d9   :  { %v3318_v57 = vpop.f32.mrf.mxu0  ;;  %v3503_v6 = vpop.f32.mrf.mxu1 }
 0x5da   :  { %3785 = vst [vmem:[#allocation5 + $0x110] sm:$0xff] %v3721_v30  ;;  %v3652_v26 = vmul.f32 %v3502_v33, %v7178_v8 }
 0x5db   :  { %v6862_v60 = vpop.f32.mrf.mxu0  ;;  %v3506_v15 = vpop.f32.mrf.mxu1 }
 0x5dc   :  { %v3722_v20 = vadd.f32 %v6693_v35, %v3652_v26  ;;  %v3507_v44 = vadd.f32 %v3506_v15, %v6717_v49  ;;  %v7186_v26 = vld [vmem:[#allocation22_spill] sm:$0xff] }
 0x5dd   :  { %v3323_v56 = vpop.f32.mrf.mxu0  ;;  %v3508_v22 = vpop.f32.mrf.mxu1 }
 0x5de   :  { %3786 = vst [vmem:[#allocation5 + $0x118] sm:$0xff] %v3722_v20  ;;  %v3653_v7 = vmul.f32 %v3507_v44, %v7179_v23  ;;  %v7187_v23 = vld [vmem:[#allocation50_spill] sm:$0xff] }
 0x5df   :  { %v6867_v29 = vpop.f32.mrf.mxu0  ;;  %v3509_v12 = vpop.f32.mrf.mxu1 }
 0x5e0   :  { %v3723_v54 = vadd.f32 %v6693_v35, %v3653_v7  ;;  %v3510_v48 = vadd.f32 %v3509_v12, %v6728_v58 }
 0x5e1   :  { %v3326_v0 = vpop.f32.mrf.mxu0  ;;  %v3511_v5 = vpop.f32.mrf.mxu1 }
 0x5e2   :  { %3787 = vst [vmem:[#allocation5 + $0x120] sm:$0xff] %v3723_v54  ;;  %v3654_v36 = vmul.f32 %v3510_v48, %v7180_v4  ;;  %v7188_v48 = vld [vmem:[#allocation8_spill] sm:$0xff]  ;;  %v7189_v5 = vld [vmem:[#allocation25_spill] sm:$0xff] }
 0x5e3   :  { %v3362_v39 = vpop.f32.mrf.mxu0  ;;  %v3514_v13 = vpop.f32.mrf.mxu1 }
 0x5e4   :  { %v3724_v49 = vadd.f32 %v6693_v35, %v3654_v36  ;;  %v3363_v50 = vadd.f32 %v3362_v39, %v7181_v52  ;;  %v3515_v27 = vadd.f32 %v3514_v13, %v6733_v1  ;;  %v7185_v1 = vld [vmem:[#allocation11_spill] sm:$0xff] }
 0x5e5   :  { %v3364_v46 = vpop.f32.mrf.mxu0  ;;  %v3516_v59 = vpop.f32.mrf.mxu1  ;;  %v7190_v52 = vld [vmem:[#allocation51_spill] sm:$0xff] }
 0x5e6   :  { %3788 = vst [vmem:[#allocation5 + $0x128] sm:$0xff] %v3724_v49  ;;  %v3617_v10 = vmul.f32 %v3363_v50, %v7182_v32  ;;  %v3655_v58 = vmul.f32 %v3515_v27, %v7183_v2  ;;  %v7191_v59 = vld [vmem:[#allocation10_spill] sm:$0xff] }
 0x5e7   :  { %v3365_v3 = vpop.f32.mrf.mxu0  ;;  %v3517_v45 = vpop.f32.mrf.mxu1 }
 0x5e8   :  { %v3687_v40 = vadd.f32 %v6693_v35, %v3617_v10  ;;  %v3725_v42 = vadd.f32 %v6693_v35, %v3655_v58  ;;  %v3366_v30 = vadd.f32 %v3365_v3, %v7184_v38  ;;  %v3518_v33 = vadd.f32 %v3517_v45, %v6744_v9  ;;  %v7192_v10 = vld [vmem:[#allocation24_spill] sm:$0xff] }
 0x5e9   :  { %v3367_v57 = vpop.f32.mrf.mxu0  ;;  %v3519_v6 = vpop.f32.mrf.mxu1 }
 0x5ea   :  { %3751 = vst [vmem:[#allocation5] sm:$0xff] %v3687_v40  ;;  %3789 = vst [vmem:[#allocation5 + $0x130] sm:$0xff] %v3725_v42  ;;  %v3618_v8 = vmul.f32 %v3366_v30, %v7185_v1  ;;  %v3656_v15 = vmul.f32 %v3518_v33, %v7186_v26  ;;  %v7193_v42 = vld [vmem:[#allocation52_spill] sm:$0xff]  ;;  %v7194_v57 = vld [vmem:[#allocation13_spill] sm:$0xff] }
 0x5eb   :  { %v3370_v20 = vpop.f32.mrf.mxu0  ;;  %v3522_v44 = vpop.f32.mrf.mxu1  ;;  %v7195_v1 = vld [vmem:[#allocation27_spill] sm:$0xff] }
 0x5ec   :  { %v3688_v56 = vadd.f32 %v6693_v35, %v3618_v8  ;;  %v3726_v22 = vadd.f32 %v6693_v35, %v3656_v15  ;;  %v3371_v7 = vadd.f32 %v3370_v20, %v7187_v23  ;;  %v3523_v12 = vadd.f32 %v3522_v44, %v6749_v53 }
 0x5ed   :  { %v3372_v54 = vpop.f32.mrf.mxu0  ;;  %v3524_v9 = vpop.f32.mrf.mxu1 }
 0x5ee   :  { %3752 = vst [vmem:[#allocation5 + $0x8] sm:$0xff] %v3688_v56  ;;  %3790 = vst [vmem:[#allocation5 + $0x138] sm:$0xff] %v3726_v22  ;;  %v3619_v0 = vmul.f32 %v3371_v7, %v7188_v48  ;;  %v3657_v4 = vmul.f32 %v3523_v12, %v7189_v5  ;;  %v7196_v56 = vld [vmem:[#allocation53_spill] sm:$0xff]  ;;  %v7197_v12 = vld [vmem:[#allocation12_spill] sm:$0xff] }
 0x5ef   :  { %v3373_v36 = vpop.f32.mrf.mxu0  ;;  %v3525_v39 = vpop.f32.mrf.mxu1  ;;  %v7198_v9 = vld [vmem:[#allocation26_spill] sm:$0xff] }
 0x5f0   :  { %v3689_v13 = vadd.f32 %v6693_v35, %v3619_v0  ;;  %v3727_v49 = vadd.f32 %v6693_v35, %v3657_v4  ;;  %v3374_v50 = vadd.f32 %v3373_v36, %v7190_v52  ;;  %v3526_v27 = vadd.f32 %v3525_v39, %v6757_v41 }
 0x5f1   :  { %v3375_v46 = vpop.f32.mrf.mxu0  ;;  %v3527_v53 = vpop.f32.mrf.mxu1 }
 0x5f2   :  { %3753 = vst [vmem:[#allocation5 + $0x10] sm:$0xff] %v3689_v13  ;;  %3791 = vst [vmem:[#allocation5 + $0x140] sm:$0xff] %v3727_v49  ;;  %v3620_v32 = vmul.f32 %v3374_v50, %v7191_v59  ;;  %v3658_v2 = vmul.f32 %v3526_v27, %v7192_v10  ;;  %v7199_v13 = vld [vmem:[#allocation29_spill] sm:$0xff]  ;;  %v7200_v46 = vld [vmem:[#allocation28_spill] sm:$0xff] }
 0x5f3   :  { %v3378_v58 = vpop.f32.mrf.mxu0  ;;  %v3530_v3 = vpop.f32.mrf.mxu1 }
 0x5f4   :  { %v3690_v45 = vadd.f32 %v6693_v35, %v3620_v32  ;;  %v3728_v40 = vadd.f32 %v6693_v35, %v3658_v2  ;;  %v3379_v38 = vadd.f32 %v3378_v58, %v7193_v42  ;;  %v3531_v30 = vadd.f32 %v3530_v3, %v6762_v11  ;;  %v7201_v2 = vld [vmem:[#allocation31_spill] sm:$0xff] }
 0x5f5   :  { %v3380_v33 = vpop.f32.mrf.mxu0  ;;  %v3532_v41 = vpop.f32.mrf.mxu1 }
 0x5f6   :  { %3754 = vst [vmem:[#allocation5 + $0x18] sm:$0xff] %v3690_v45  ;;  %3792 = vst [vmem:[#allocation5 + $0x148] sm:$0xff] %v3728_v40  ;;  %v3621_v6 = vmul.f32 %v3379_v38, %v7194_v57  ;;  %v3659_v8 = vmul.f32 %v3531_v30, %v7195_v1 }
 0x5f7   :  { %v3381_v26 = vpop.f32.mrf.mxu0  ;;  %v3533_v15 = vpop.f32.mrf.mxu1 }
 0x5f8   :  { %v3691_v20 = vadd.f32 %v6693_v35, %v3621_v6  ;;  %v3729_v44 = vadd.f32 %v6693_v35, %v3659_v8  ;;  %v3382_v22 = vadd.f32 %v3381_v26, %v7196_v56  ;;  %v3534_v23 = vadd.f32 %v3533_v15, %v6767_v18 }
 0x5f9   :  { %v3535_v7 = vpop.f32.mrf.mxu1  ;;  %v3383_v11 = vpop.f32.mrf.mxu0 }
 0x5fa   :  { %3755 = vst [vmem:[#allocation5 + $0x20] sm:$0xff] %v3691_v20  ;;  %3793 = vst [vmem:[#allocation5 + $0x150] sm:$0xff] %v3729_v44  ;;  %v3622_v54 = vmul.f32 %v3382_v22, %v7197_v12  ;;  %v3660_v48 = vmul.f32 %v3534_v23, %v7198_v9 }
 0x5fb   :  { %v3538_v0 = vpop.f32.mrf.mxu1 }
 0x5fc   :  { %v3692_v5 = vadd.f32 %v6693_v35, %v3622_v54  ;;  %v3730_v4 = vadd.f32 %v6693_v35, %v3660_v48  ;;  %v3539_v36 = vadd.f32 %v3538_v0, %v6772_v43 }
 0x5fd   :  { %v3540_v39 = vpop.f32.mrf.mxu1 }
 0x5fe   :  { %3756 = vst [vmem:[#allocation5 + $0x28] sm:$0xff] %v3692_v5  ;;  %3794 = vst [vmem:[#allocation5 + $0x158] sm:$0xff] %v3730_v4  ;;  %v3661_v18 = vmul.f32 %v3539_v36, %v7199_v13 }
 0x5ff   :  { %v3541_v49 = vpop.f32.mrf.mxu1 }
 0x600   :  { %v3731_v52 = vadd.f32 %v6693_v35, %v3661_v18  ;;  %v3542_v50 = vadd.f32 %v3541_v49, %v6777_v24  ;;  %v7202_v24 = vld [vmem:[#allocation30_spill] sm:$0xff] }
 0x601   :  { %v3543_v27 = vpop.f32.mrf.mxu1 }
 0x602   :  { %3795 = vst [vmem:[#allocation5 + $0x160] sm:$0xff] %v3731_v52  ;;  %v3662_v53 = vmul.f32 %v3542_v50, %v7200_v46 }
 0x603   :  { %v3546_v59 = vpop.f32.mrf.mxu1 }
 0x604   :  { %v3732_v32 = vadd.f32 %v6693_v35, %v3662_v53  ;;  %v3547_v10 = vadd.f32 %v3546_v59, %v6782_v21  ;;  %v7203_v21 = vld [vmem:[#allocation33_spill] sm:$0xff] }
 0x605   :  { %v3548_v43 = vpop.f32.mrf.mxu1 }
 0x606   :  { %3796 = vst [vmem:[#allocation5 + $0x168] sm:$0xff] %v3732_v32  ;;  %v3663_v58 = vmul.f32 %v3547_v10, %v7201_v2 }
 0x607   :  { %v3549_v3 = vpop.f32.mrf.mxu1 }
 0x608   :  { %v3733_v45 = vadd.f32 %v6693_v35, %v3663_v58  ;;  %v3550_v40 = vadd.f32 %v3549_v3, %v6787_v31  ;;  %v7204_v31 = vld [vmem:[#allocation32_spill] sm:$0xff] }
 0x609   :  { %v3551_v42 = vpop.f32.mrf.mxu1 }
 0x60a   :  { %3797 = vst [vmem:[#allocation5 + $0x170] sm:$0xff] %v3733_v45  ;;  %v3664_v38 = vmul.f32 %v3550_v40, %v7202_v24 }
 0x60b   :  { %v3554_v30 = vpop.f32.mrf.mxu1 }
 0x60c   :  { %v3734_v33 = vadd.f32 %v6693_v35, %v3664_v38  ;;  %v3555_v41 = vadd.f32 %v3554_v30, %v6792_v19  ;;  %v7205_v19 = vld [vmem:[#allocation35_spill] sm:$0xff] }
 0x60d   :  { %v3556_v57 = vpop.f32.mrf.mxu1 }
 0x60e   :  { %3798 = vst [vmem:[#allocation5 + $0x178] sm:$0xff] %v3734_v33  ;;  %v3665_v6 = vmul.f32 %v3555_v41, %v7203_v21 }
 0x60f   :  { %v3557_v1 = vpop.f32.mrf.mxu1 }
 0x610   :  { %v3735_v8 = vadd.f32 %v6693_v35, %v3665_v6  ;;  %v3558_v26 = vadd.f32 %v3557_v1, %v6797_v47  ;;  %v7206_v47 = vld [vmem:[#allocation34_spill] sm:$0xff] }
 0x611   :  { %v3559_v15 = vpop.f32.mrf.mxu1 }
 0x612   :  { %3799 = vst [vmem:[#allocation5 + $0x180] sm:$0xff] %v3735_v8  ;;  %v3666_v20 = vmul.f32 %v3558_v26, %v7204_v31 }
 0x613   :  { %v3562_v44 = vpop.f32.mrf.mxu1 }
 0x614   :  { %v3736_v56 = vadd.f32 %v6693_v35, %v3666_v20  ;;  %v3563_v22 = vadd.f32 %v3562_v44, %v6802_v61  ;;  %v7207_v61 = vld [vmem:[#allocation37_spill] sm:$0xff] }
 0x615   :  { %v3564_v23 = vpop.f32.mrf.mxu1 }
 0x616   :  { %3800 = vst [vmem:[#allocation5 + $0x188] sm:$0xff] %v3736_v56  ;;  %v3667_v7 = vmul.f32 %v3563_v22, %v7205_v19 }
 0x617   :  { %v3565_v11 = vpop.f32.mrf.mxu1 }
 0x618   :  { %v3737_v12 = vadd.f32 %v6693_v35, %v3667_v7  ;;  %v3566_v54 = vadd.f32 %v3565_v11, %v6807_v55  ;;  %v7208_v55 = vld [vmem:[#allocation36_spill] sm:$0xff] }
 0x619   :  { %v3567_v9 = vpop.f32.mrf.mxu1 }
 0x61a   :  { %3801 = vst [vmem:[#allocation5 + $0x190] sm:$0xff] %v3737_v12  ;;  %v3668_v48 = vmul.f32 %v3566_v54, %v7206_v47 }
 0x61b   :  { %v3570_v0 = vpop.f32.mrf.mxu1 }
 0x61c   :  { %v3738_v5 = vadd.f32 %v6693_v35, %v3668_v48  ;;  %v3571_v4 = vadd.f32 %v3570_v0, %v6812_v51  ;;  %v7209_v51 = vld [vmem:[#allocation39_spill] sm:$0xff] }
 0x61d   :  { %v3572_v36 = vpop.f32.mrf.mxu1 }
 0x61e   :  { %3802 = vst [vmem:[#allocation5 + $0x198] sm:$0xff] %v3738_v5  ;;  %v3669_v39 = vmul.f32 %v3571_v4, %v7207_v61 }
 0x61f   :  { %v3573_v13 = vpop.f32.mrf.mxu1 }
 0x620   :  { %v3739_v18 = vadd.f32 %v6693_v35, %v3669_v39  ;;  %v3574_v49 = vadd.f32 %v3573_v13, %v6817_v14  ;;  %v7210_v14 = vld [vmem:[#allocation38_spill] sm:$0xff] }
 0x621   :  { %v3575_v52 = vpop.f32.mrf.mxu1 }
 0x622   :  { %3803 = vst [vmem:[#allocation5 + $0x1a0] sm:$0xff] %v3739_v18  ;;  %v3670_v50 = vmul.f32 %v3574_v49, %v7208_v55  ;;  %v7218_v52 = vld [vmem:[#allocation46_spill] sm:$0xff] }
 0x623   :  { %v3578_v27 = vpop.f32.mrf.mxu1 }
 0x624   :  { %v3740_v46 = vadd.f32 %v6693_v35, %v3670_v50  ;;  %v3579_v53 = vadd.f32 %v3578_v27, %v6822_v62  ;;  %v7211_v62 = vld [vmem:[#allocation41_spill] sm:$0xff] }
 0x625   :  { %v3580_v59 = vpop.f32.mrf.mxu1 }
 0x626   :  { %3804 = vst [vmem:[#allocation5 + $0x1a8] sm:$0xff] %v3740_v46  ;;  %v3671_v32 = vmul.f32 %v3579_v53, %v7209_v51 }
 0x627   :  { %v3581_v10 = vpop.f32.mrf.mxu1 }
 0x628   :  { %v3741_v43 = vadd.f32 %v6693_v35, %v3671_v32  ;;  %v3582_v2 = vadd.f32 %v3581_v10, %v6827_v34  ;;  %v7212_v34 = vld [vmem:[#allocation40_spill] sm:$0xff] }
 0x629   :  { %v3583_v58 = vpop.f32.mrf.mxu1 }
 0x62a   :  { %3805 = vst [vmem:[#allocation5 + $0x1b0] sm:$0xff] %v3741_v43  ;;  %v3672_v3 = vmul.f32 %v3582_v2, %v7210_v14 }
 0x62b   :  { %v3586_v45 = vpop.f32.mrf.mxu1 }
 0x62c   :  { %v3742_v40 = vadd.f32 %v6693_v35, %v3672_v3  ;;  %v3587_v42 = vadd.f32 %v3586_v45, %v6832_v28  ;;  %v7213_v28 = vld [vmem:[#allocation43_spill] sm:$0xff] }
 0x62d   :  { %v3588_v24 = vpop.f32.mrf.mxu1 }
 0x62e   :  { %3806 = vst [vmem:[#allocation5 + $0x1b8] sm:$0xff] %v3742_v40  ;;  %v3673_v38 = vmul.f32 %v3587_v42, %v7211_v62 }
 0x62f   :  { %v3589_v30 = vpop.f32.mrf.mxu1 }
 0x630   :  { %v3743_v33 = vadd.f32 %v6693_v35, %v3673_v38  ;;  %v3590_v41 = vadd.f32 %v3589_v30, %v6837_v25  ;;  %v7214_v25 = vld [vmem:[#allocation42_spill] sm:$0xff] }
 0x631   :  { %v3591_v57 = vpop.f32.mrf.mxu1 }
 0x632   :  { %3807 = vst [vmem:[#allocation5 + $0x1c0] sm:$0xff] %v3743_v33  ;;  %v3674_v21 = vmul.f32 %v3590_v41, %v7212_v34 }
 0x633   :  { %v3594_v6 = vpop.f32.mrf.mxu1 }
 0x634   :  { %v3744_v1 = vadd.f32 %v6693_v35, %v3674_v21  ;;  %v3595_v8 = vadd.f32 %v3594_v6, %v6842_v37  ;;  %v7215_v37 = vld [vmem:[#allocation45_spill] sm:$0xff] }
 0x635   :  { %v3596_v26 = vpop.f32.mrf.mxu1 }
 0x636   :  { %3808 = vst [vmem:[#allocation5 + $0x1c8] sm:$0xff] %v3744_v1  ;;  %v3675_v15 = vmul.f32 %v3595_v8, %v7213_v28 }
 0x637   :  { %v3597_v31 = vpop.f32.mrf.mxu1 }
 0x638   :  { %v3745_v20 = vadd.f32 %v6693_v35, %v3675_v15  ;;  %v3598_v44 = vadd.f32 %v3597_v31, %v6847_v17  ;;  %v7216_v17 = vld [vmem:[#allocation44_spill] sm:$0xff] }
 0x639   :  { %v3599_v56 = vpop.f32.mrf.mxu1 }
 0x63a   :  { %3809 = vst [vmem:[#allocation5 + $0x1d0] sm:$0xff] %v3745_v20  ;;  %v3676_v22 = vmul.f32 %v3598_v44, %v7214_v25 }
 0x63b   :  { %v3602_v23 = vpop.f32.mrf.mxu1 }
 0x63c   :  { %v3746_v19 = vadd.f32 %v6693_v35, %v3676_v22  ;;  %v3603_v7 = vadd.f32 %v3602_v23, %v6852_v16  ;;  %v7217_v16 = vld [vmem:[#allocation47_spill] sm:$0xff] }
 0x63d   :  { %v3604_v11 = vpop.f32.mrf.mxu1 }
 0x63e   :  { %3810 = vst [vmem:[#allocation5 + $0x1d8] sm:$0xff] %v3746_v19  ;;  %v3677_v12 = vmul.f32 %v3603_v7, %v7215_v37 }
 0x63f   :  { %v3605_v54 = vpop.f32.mrf.mxu1 }
 0x640   :  { %v3747_v9 = vadd.f32 %v6693_v35, %v3677_v12  ;;  %v3606_v47 = vadd.f32 %v3605_v54, %v6857_v63 }
 0x641   :  { %v3607_v48 = vpop.f32.mrf.mxu1 }
 0x642   :  { %3811 = vst [vmem:[#allocation5 + $0x1e0] sm:$0xff] %v3747_v9  ;;  %v3678_v0 = vmul.f32 %v3606_v47, %v7216_v17 }
 0x643   :  { %v3610_v5 = vpop.f32.mrf.mxu1 }
 0x644   :  { %v3748_v4 = vadd.f32 %v6693_v35, %v3678_v0  ;;  %v3611_v36 = vadd.f32 %v3610_v5, %v6862_v60 }
 0x645   :  { %v3612_v61 = vpop.f32.mrf.mxu1 }
 0x646   :  { %3812 = vst [vmem:[#allocation5 + $0x1e8] sm:$0xff] %v3748_v4  ;;  %v3679_v39 = vmul.f32 %v3611_v36, %v7217_v16 }
 0x647   :  { %v3613_v13 = vpop.f32.mrf.mxu1 }
 0x648   :  { %v3749_v18 = vadd.f32 %v6693_v35, %v3679_v39  ;;  %v3614_v49 = vadd.f32 %v3613_v13, %v6867_v29 }
 0x649   :  { %v3615_v63 = vpop.f32.mrf.mxu1 }
 0x64a   :  { %3813 = vst [vmem:[#allocation5 + $0x1f0] sm:$0xff] %v3749_v18  ;;  %v3680_v55 = vmul.f32 %v3614_v49, %v7218_v52 }
 0x64c   :  { %v3750_v50 = vadd.f32 %v6693_v35, %v3680_v55 }
 0x64e   :  { %3814 = vst [vmem:[#allocation5 + $0x1f8] sm:$0xff] %v3750_v50 }
 0x64f   :  { %4624 = shalt.err (!%p4621_p9)
}
 0x650   :  { %s4642_s10 = smov 128   ;;  %s4643_s5 = smov 8  }
 0x651   :  { %3826 = dma.vmem_to_hbm [thread:$0]  %s3821_s8, 8192, %s6979_s7, [#allocation4], %s4642_s10, %s4642_s10, %s4643_s5  }
 0x652   :  { %4635 = dma.done.wait [#allocation4], 8192  }
 0x653   :  { %4636 = vsyncadd [#allocation4], 4294959104 }
 0x654   :  { %3830 = vsyncpa [#allocation3], 1 }
 0x655   :  { %3831 = vsyncpa [#allocation4], 1 }

</bundles_post_ra>
